<compile_context>
chip_gen: v7x
topology: tpu7x:2x2x1
jax: 0.10.0
libtpu: 0.0.40
codegen_flags: <defaults>
</compile_context>

<pallas_src>
import functools

import jax
import jax.numpy as jnp
from jax import lax
from jax.experimental import pallas as pl
from jax.experimental.pallas import tpu as pltpu


def _round_up(x: int, m: int) -> int:
    return ((x + m - 1) // m) * m


def _cdiv(a: int, b: int) -> int:
    return (a + b - 1) // b


def deepfm_fm_kernel(idx_ref, xv_ref, table_ref, bias_ref, out_ref):
    """One batch tile of the fused FM forward.

    idx_ref:   (F, TB)        int32 feature indices (batch on lanes)
    xv_ref:    (F, TB)        f32   feature values
    table_ref: (F, EP, V_pad) f32   packed per-field tables, VMEM-resident:
               row 0 = first-order weight, rows 1..E = second-order embedding,
               rows E+1..EP-1 and cols V..V_pad-1 are zeros.
    bias_ref:  (1,)           f32   scalar bias in SMEM
    out_ref:   (1, TB)        f32   lane-dense output
    """
    F, TB = idx_ref.shape
    EP, V_pad = table_ref.shape[1], table_ref.shape[2]

    # Hoisted: vocab-axis iota shared by every field (JAX does not CSE broadcasts).
    iota_v = lax.broadcasted_iota(jnp.int32, (V_pad, TB), 0)

    acc = jnp.zeros((EP, TB), jnp.float32)   # sum_f emb_f       (row 0 = 1st-order sum)
    sq = jnp.zeros((EP, TB), jnp.float32)    # sum_f emb_f ** 2

    # F is small & static -> fully unrolled; each iteration is one MXU one-hot lookup.
    for f in range(F):
        idx_f = idx_ref[pl.ds(f, 1), :]                       # (1, TB) int32
        xv_f = xv_ref[pl.ds(f, 1), :]                         # (1, TB) f32
        onehot = (iota_v == idx_f).astype(jnp.float32)        # (V_pad, TB), in-reg
        emb = jnp.dot(table_ref[f], onehot,                   # (EP, V_pad) @ (V_pad, TB)
                      preferred_element_type=jnp.float32,
                      precision=lax.Precision.HIGHEST)        # (EP, TB)
        emb = emb * xv_f
        acc = acc + emb
        sq = sq + emb * emb

    first = acc[0:1, :]                                       # (1, TB) first-order sum
    # FM second-order term over the E embedding dims.  Padded rows are exactly zero;
    # row 0 is the first-order channel and is subtracted back out.
    sum_sq = jnp.sum(acc * acc, axis=0, keepdims=True) - first * first
    sq_sum = jnp.sum(sq, axis=0, keepdims=True) - sq[0:1, :]
    second = 0.5 * (sum_sq - sq_sum)

    out_ref[...] = first + second + bias_ref[0]


@functools.partial(jax.jit, static_argnames=("tb_max",))
def deepfm_forward(Xi, Xv, first_w, second_w, bias, *, tb_max=None):
    """Xi: (B, F, 1) int32, Xv: (B, F) f32,
    first_w: (F, V, 1) f32, second_w: (F, V, E) f32, bias: (1,) f32."""
    B, F, _ = Xi.shape
    V = first_w.shape[1]
    E = second_w.shape[-1]
    EP = _round_up(E + 1, 8)        # packed table rows: [first, emb_0..emb_{E-1}, 0-pad]
    V_pad = _round_up(V, 128)       # one-hot / table lane width

    # ---- batch-tile selection ----
    B128 = _round_up(B, 128)
    # Bytes per unit of TB: streamed idx+xv (double-buffered) + in-kernel temporaries
    # (one-hot slab, emb, two accumulators) + double-buffered output.
    per_tb_bytes = 16 * F + 4 * (V_pad + 4 * EP) + 8
    budget = 8 * 1024 * 1024
    tb_budget = max(128, (budget // per_tb_bytes) // 128 * 128)
    # Aim for ~8 grid tiles so megacore (v7x 2 TCs) and DMA/compute pipelining engage,
    # while the budget cap keeps per-step overhead amortized at large B.
    tb_target = max(128, _round_up(_cdiv(B128, 8), 128))
    TB = min(tb_budget, tb_target, B128)
    if tb_max is not None:
        TB = min(TB, max(128, _round_up(int(tb_max), 128)))
    TB = max(TB, 128)
    B_pad = _round_up(B, TB)
    grid = (B_pad // TB,)

    # ---- pack per-field tables: (F, EP, V_pad), row 0 = first-order, rows 1..E = FM emb
    table = jnp.zeros((F, EP, V_pad), jnp.float32)
    table = table.at[:, 0, :V].set(first_w.astype(jnp.float32)[:, :, 0])
    table = table.at[:, 1:1 + E, :V].set(
        jnp.transpose(second_w.astype(jnp.float32), (0, 2, 1)))

    # ---- per-row inputs, batch on lanes; padded columns: idx=0 (valid row), xv=0 -> 0
    idx_t = Xi[:, :, 0].T.astype(jnp.int32)          # (F, B)
    xv_t = Xv.T.astype(jnp.float32)                  # (F, B)
    if B_pad != B:
        pad = ((0, 0), (0, B_pad - B))
        idx_t = jnp.pad(idx_t, pad)
        xv_t = jnp.pad(xv_t, pad)

    bias = bias.astype(jnp.float32).reshape((1,))

    out = pl.pallas_call(
        deepfm_fm_kernel,
        out_shape=jax.ShapeDtypeStruct((1, B_pad), jnp.float32),
        grid_spec=pltpu.PrefetchScalarGridSpec(
            num_scalar_prefetch=0,
            grid=grid,
            in_specs=[
                pl.BlockSpec((F, TB), lambda i: (0, i)),            # idx tile
                pl.BlockSpec((F, TB), lambda i: (0, i)),            # xv tile
                pl.BlockSpec((F, EP, V_pad), lambda i: (0, 0, 0)),  # tables, VMEM-resident
                pl.BlockSpec(memory_space=pltpu.MemorySpace.SMEM),  # bias scalar
            ],
            out_specs=pl.BlockSpec((1, TB), lambda i: (0, i)),
        ),
        compiler_params=pltpu.CompilerParams(
            dimension_semantics=("parallel",),
            # Raised vs v5e's 16 MiB scoped default; footprint stays well under
            # this and under v7x's 64 MiB physical VMEM at the chosen TB budget.
            vmem_limit_bytes=32 * 1024 * 1024,
        ),
    )(idx_t, xv_t, table, bias)

    return out[0, :B]                     # (B,), matches torch total_sum shape


def reference_forward(Xi, Xv, first_w, second_w, bias):
    idx = Xi[:, :, 0]
    f_ids = jnp.arange(Xi.shape[1])[None, :]
    first_emb = first_w[f_ids, idx, 0] * Xv                       # (B, F)
    sec = second_w[f_ids, idx] * Xv[:, :, None]                   # (B, F, E)
    sum_emb = jnp.sum(sec, axis=1)
    second_order = 0.5 * (sum_emb * sum_emb - jnp.sum(sec * sec, axis=1))
    return jnp.sum(first_emb, axis=1) + jnp.sum(second_order, axis=1) + bias[0]


if __name__ == "__main__":
    # Small, deterministic setup. B deliberately not a multiple of 128 so the
    # padded, multi-tile grid path (grid=(3,) with TB=128) is exercised.
    B = 300             # batch
    F = 8               # field_size
    V = 16              # feature_size per field (same for all fields)
    E = 4               # embedding_size

    key = jax.random.PRNGKey(0)
    k_xi, k_xv, k_b, k_w1, k_w2 = jax.random.split(key, 5)

    Xi = jax.random.randint(k_xi, (B, F, 1), 0, V, dtype=jnp.int32)
    Xv = jax.random.normal(k_xv, (B, F), dtype=jnp.float32)

    # Parameters (nn.Embedding default init ~ N(0,1); bias = randn(1)).
    bias = jax.random.normal(k_b, (1,), dtype=jnp.float32)
    first_w = jax.random.normal(k_w1, (F, V, 1), dtype=jnp.float32)
    second_w = jax.random.normal(k_w2, (F, V, E), dtype=jnp.float32)

    out = deepfm_forward(Xi, Xv, first_w, second_w, bias)
    out = jax.block_until_ready(out)

    ref = reference_forward(Xi, Xv, first_w, second_w, bias)
    assert out.shape == (B,)
    assert jnp.allclose(out, ref, atol=1e-3, rtol=1e-3), (out, ref)

    print("KERNEL_OK")
</pallas_src>

<mosaic_0001>
module attributes {stable_mosaic.version = 11 : i64} {
  func.func @deepfm_fm_kernel(%arg0: i32, %arg1: memref<8x128xi32, #tpu.memory_space<vmem>>, %arg2: memref<8x128xf32, #tpu.memory_space<vmem>>, %arg3: memref<8x8x128xf32, #tpu.memory_space<vmem>>, %arg4: memref<1xf32, #tpu.memory_space<smem>>, %arg5: memref<1x128xf32, #tpu.memory_space<vmem>>) attributes {dimension_semantics = [#tpu.dimension_semantics<parallel>], iteration_bounds = array<i64: 3>, scalar_prefetch = 0 : i64, scratch_operands = 0 : i64, tpu.core_type = #tpu.core_type<tc>, window_params = [{transform_indices = @transform_0, window_bounds = array<i64: 8, 128>}, {transform_indices = @transform_1, window_bounds = array<i64: 8, 128>}, {pipeline_mode = #tpu.pipeline_mode<synchronous>, transform_indices = @transform_2, window_bounds = array<i64: 8, 8, 128>}, {transform_indices = @transform_3, window_bounds = array<i64: 1>}, {transform_indices = @transform_4, window_bounds = array<i64: 1, 128>}]} {
    %0 = tpu.iota {dimensions = array<i32: 0>} : vector<128x128xi32>
    %cst = arith.constant 0.000000e+00 : f32
    %1 = vector.broadcast %cst : f32 to vector<8x128xf32>
    %cst_0 = arith.constant 0.000000e+00 : f32
    %2 = vector.broadcast %cst_0 : f32 to vector<8x128xf32>
    %c0 = arith.constant 0 : index
    %c0_1 = arith.constant 0 : index
    %3 = vector.load %arg1[%c0, %c0_1] : memref<8x128xi32, #tpu.memory_space<vmem>>, vector<1x128xi32>
    %c0_2 = arith.constant 0 : index
    %c0_3 = arith.constant 0 : index
    %4 = vector.load %arg2[%c0_2, %c0_3] : memref<8x128xf32, #tpu.memory_space<vmem>>, vector<1x128xf32>
    %5 = vector.broadcast %3 : vector<1x128xi32> to vector<128x128xi32>
    %6 = arith.cmpi eq, %0, %5 : vector<128x128xi32>
    %7 = arith.extui %6 : vector<128x128xi1> to vector<128x128xi32>
    %8 = arith.sitofp %7 : vector<128x128xi32> to vector<128x128xf32>
    %c0_4 = arith.constant 0 : index
    %c0_5 = arith.constant 0 : index
    %c0_6 = arith.constant 0 : index
    %9 = vector.load %arg3[%c0_4, %c0_5, %c0_6] : memref<8x8x128xf32, #tpu.memory_space<vmem>>, vector<1x8x128xf32>
    %10 = vector.shape_cast %9 : vector<1x8x128xf32> to vector<8x128xf32>
    %cst_7 = arith.constant dense<0.000000e+00> : vector<8x128xf32>
    %11 = tpu.matmul %10, %8, %cst_7 {dimension_numbers = #tpu.dot_dimension_numbers<[1], [0], [0], [1], [0, 0, 1, 1], [], []>, precision = #tpu.contract_precision<fp32>} : vector<8x128xf32>, vector<128x128xf32>, vector<8x128xf32> -> vector<8x128xf32>
    %12 = vector.broadcast %4 : vector<1x128xf32> to vector<8x128xf32>
    %13 = arith.mulf %11, %12 : vector<8x128xf32>
    %14 = arith.addf %1, %13 : vector<8x128xf32>
    %15 = arith.mulf %13, %13 : vector<8x128xf32>
    %16 = arith.addf %2, %15 : vector<8x128xf32>
    %c1 = arith.constant 1 : index
    %c0_8 = arith.constant 0 : index
    %17 = vector.load %arg1[%c1, %c0_8] : memref<8x128xi32, #tpu.memory_space<vmem>>, vector<1x128xi32>
    %c1_9 = arith.constant 1 : index
    %c0_10 = arith.constant 0 : index
    %18 = vector.load %arg2[%c1_9, %c0_10] : memref<8x128xf32, #tpu.memory_space<vmem>>, vector<1x128xf32>
    %19 = vector.broadcast %17 : vector<1x128xi32> to vector<128x128xi32>
    %20 = arith.cmpi eq, %0, %19 : vector<128x128xi32>
    %21 = arith.extui %20 : vector<128x128xi1> to vector<128x128xi32>
    %22 = arith.sitofp %21 : vector<128x128xi32> to vector<128x128xf32>
    %c1_11 = arith.constant 1 : index
    %c0_12 = arith.constant 0 : index
    %c0_13 = arith.constant 0 : index
    %23 = vector.load %arg3[%c1_11, %c0_12, %c0_13] : memref<8x8x128xf32, #tpu.memory_space<vmem>>, vector<1x8x128xf32>
    %24 = vector.shape_cast %23 : vector<1x8x128xf32> to vector<8x128xf32>
    %cst_14 = arith.constant dense<0.000000e+00> : vector<8x128xf32>
    %25 = tpu.matmul %24, %22, %cst_14 {dimension_numbers = #tpu.dot_dimension_numbers<[1], [0], [0], [1], [0, 0, 1, 1], [], []>, precision = #tpu.contract_precision<fp32>} : vector<8x128xf32>, vector<128x128xf32>, vector<8x128xf32> -> vector<8x128xf32>
    %26 = vector.broadcast %18 : vector<1x128xf32> to vector<8x128xf32>
    %27 = arith.mulf %25, %26 : vector<8x128xf32>
    %28 = arith.addf %14, %27 : vector<8x128xf32>
    %29 = arith.mulf %27, %27 : vector<8x128xf32>
    %30 = arith.addf %16, %29 : vector<8x128xf32>
    %c2 = arith.constant 2 : index
    %c0_15 = arith.constant 0 : index
    %31 = vector.load %arg1[%c2, %c0_15] : memref<8x128xi32, #tpu.memory_space<vmem>>, vector<1x128xi32>
    %c2_16 = arith.constant 2 : index
    %c0_17 = arith.constant 0 : index
    %32 = vector.load %arg2[%c2_16, %c0_17] : memref<8x128xf32, #tpu.memory_space<vmem>>, vector<1x128xf32>
    %33 = vector.broadcast %31 : vector<1x128xi32> to vector<128x128xi32>
    %34 = arith.cmpi eq, %0, %33 : vector<128x128xi32>
    %35 = arith.extui %34 : vector<128x128xi1> to vector<128x128xi32>
    %36 = arith.sitofp %35 : vector<128x128xi32> to vector<128x128xf32>
    %c2_18 = arith.constant 2 : index
    %c0_19 = arith.constant 0 : index
    %c0_20 = arith.constant 0 : index
    %37 = vector.load %arg3[%c2_18, %c0_19, %c0_20] : memref<8x8x128xf32, #tpu.memory_space<vmem>>, vector<1x8x128xf32>
    %38 = vector.shape_cast %37 : vector<1x8x128xf32> to vector<8x128xf32>
    %cst_21 = arith.constant dense<0.000000e+00> : vector<8x128xf32>
    %39 = tpu.matmul %38, %36, %cst_21 {dimension_numbers = #tpu.dot_dimension_numbers<[1], [0], [0], [1], [0, 0, 1, 1], [], []>, precision = #tpu.contract_precision<fp32>} : vector<8x128xf32>, vector<128x128xf32>, vector<8x128xf32> -> vector<8x128xf32>
    %40 = vector.broadcast %32 : vector<1x128xf32> to vector<8x128xf32>
    %41 = arith.mulf %39, %40 : vector<8x128xf32>
    %42 = arith.addf %28, %41 : vector<8x128xf32>
    %43 = arith.mulf %41, %41 : vector<8x128xf32>
    %44 = arith.addf %30, %43 : vector<8x128xf32>
    %c3 = arith.constant 3 : index
    %c0_22 = arith.constant 0 : index
    %45 = vector.load %arg1[%c3, %c0_22] : memref<8x128xi32, #tpu.memory_space<vmem>>, vector<1x128xi32>
    %c3_23 = arith.constant 3 : index
    %c0_24 = arith.constant 0 : index
    %46 = vector.load %arg2[%c3_23, %c0_24] : memref<8x128xf32, #tpu.memory_space<vmem>>, vector<1x128xf32>
    %47 = vector.broadcast %45 : vector<1x128xi32> to vector<128x128xi32>
    %48 = arith.cmpi eq, %0, %47 : vector<128x128xi32>
    %49 = arith.extui %48 : vector<128x128xi1> to vector<128x128xi32>
    %50 = arith.sitofp %49 : vector<128x128xi32> to vector<128x128xf32>
    %c3_25 = arith.constant 3 : index
    %c0_26 = arith.constant 0 : index
    %c0_27 = arith.constant 0 : index
    %51 = vector.load %arg3[%c3_25, %c0_26, %c0_27] : memref<8x8x128xf32, #tpu.memory_space<vmem>>, vector<1x8x128xf32>
    %52 = vector.shape_cast %51 : vector<1x8x128xf32> to vector<8x128xf32>
    %cst_28 = arith.constant dense<0.000000e+00> : vector<8x128xf32>
    %53 = tpu.matmul %52, %50, %cst_28 {dimension_numbers = #tpu.dot_dimension_numbers<[1], [0], [0], [1], [0, 0, 1, 1], [], []>, precision = #tpu.contract_precision<fp32>} : vector<8x128xf32>, vector<128x128xf32>, vector<8x128xf32> -> vector<8x128xf32>
    %54 = vector.broadcast %46 : vector<1x128xf32> to vector<8x128xf32>
    %55 = arith.mulf %53, %54 : vector<8x128xf32>
    %56 = arith.addf %42, %55 : vector<8x128xf32>
    %57 = arith.mulf %55, %55 : vector<8x128xf32>
    %58 = arith.addf %44, %57 : vector<8x128xf32>
    %c4 = arith.constant 4 : index
    %c0_29 = arith.constant 0 : index
    %59 = vector.load %arg1[%c4, %c0_29] : memref<8x128xi32, #tpu.memory_space<vmem>>, vector<1x128xi32>
    %c4_30 = arith.constant 4 : index
    %c0_31 = arith.constant 0 : index
    %60 = vector.load %arg2[%c4_30, %c0_31] : memref<8x128xf32, #tpu.memory_space<vmem>>, vector<1x128xf32>
    %61 = vector.broadcast %59 : vector<1x128xi32> to vector<128x128xi32>
    %62 = arith.cmpi eq, %0, %61 : vector<128x128xi32>
    %63 = arith.extui %62 : vector<128x128xi1> to vector<128x128xi32>
    %64 = arith.sitofp %63 : vector<128x128xi32> to vector<128x128xf32>
    %c4_32 = arith.constant 4 : index
    %c0_33 = arith.constant 0 : index
    %c0_34 = arith.constant 0 : index
    %65 = vector.load %arg3[%c4_32, %c0_33, %c0_34] : memref<8x8x128xf32, #tpu.memory_space<vmem>>, vector<1x8x128xf32>
    %66 = vector.shape_cast %65 : vector<1x8x128xf32> to vector<8x128xf32>
    %cst_35 = arith.constant dense<0.000000e+00> : vector<8x128xf32>
    %67 = tpu.matmul %66, %64, %cst_35 {dimension_numbers = #tpu.dot_dimension_numbers<[1], [0], [0], [1], [0, 0, 1, 1], [], []>, precision = #tpu.contract_precision<fp32>} : vector<8x128xf32>, vector<128x128xf32>, vector<8x128xf32> -> vector<8x128xf32>
    %68 = vector.broadcast %60 : vector<1x128xf32> to vector<8x128xf32>
    %69 = arith.mulf %67, %68 : vector<8x128xf32>
    %70 = arith.addf %56, %69 : vector<8x128xf32>
    %71 = arith.mulf %69, %69 : vector<8x128xf32>
    %72 = arith.addf %58, %71 : vector<8x128xf32>
    %c5 = arith.constant 5 : index
    %c0_36 = arith.constant 0 : index
    %73 = vector.load %arg1[%c5, %c0_36] : memref<8x128xi32, #tpu.memory_space<vmem>>, vector<1x128xi32>
    %c5_37 = arith.constant 5 : index
    %c0_38 = arith.constant 0 : index
    %74 = vector.load %arg2[%c5_37, %c0_38] : memref<8x128xf32, #tpu.memory_space<vmem>>, vector<1x128xf32>
    %75 = vector.broadcast %73 : vector<1x128xi32> to vector<128x128xi32>
    %76 = arith.cmpi eq, %0, %75 : vector<128x128xi32>
    %77 = arith.extui %76 : vector<128x128xi1> to vector<128x128xi32>
    %78 = arith.sitofp %77 : vector<128x128xi32> to vector<128x128xf32>
    %c5_39 = arith.constant 5 : index
    %c0_40 = arith.constant 0 : index
    %c0_41 = arith.constant 0 : index
    %79 = vector.load %arg3[%c5_39, %c0_40, %c0_41] : memref<8x8x128xf32, #tpu.memory_space<vmem>>, vector<1x8x128xf32>
    %80 = vector.shape_cast %79 : vector<1x8x128xf32> to vector<8x128xf32>
    %cst_42 = arith.constant dense<0.000000e+00> : vector<8x128xf32>
    %81 = tpu.matmul %80, %78, %cst_42 {dimension_numbers = #tpu.dot_dimension_numbers<[1], [0], [0], [1], [0, 0, 1, 1], [], []>, precision = #tpu.contract_precision<fp32>} : vector<8x128xf32>, vector<128x128xf32>, vector<8x128xf32> -> vector<8x128xf32>
    %82 = vector.broadcast %74 : vector<1x128xf32> to vector<8x128xf32>
    %83 = arith.mulf %81, %82 : vector<8x128xf32>
    %84 = arith.addf %70, %83 : vector<8x128xf32>
    %85 = arith.mulf %83, %83 : vector<8x128xf32>
    %86 = arith.addf %72, %85 : vector<8x128xf32>
    %c6 = arith.constant 6 : index
    %c0_43 = arith.constant 0 : index
    %87 = vector.load %arg1[%c6, %c0_43] : memref<8x128xi32, #tpu.memory_space<vmem>>, vector<1x128xi32>
    %c6_44 = arith.constant 6 : index
    %c0_45 = arith.constant 0 : index
    %88 = vector.load %arg2[%c6_44, %c0_45] : memref<8x128xf32, #tpu.memory_space<vmem>>, vector<1x128xf32>
    %89 = vector.broadcast %87 : vector<1x128xi32> to vector<128x128xi32>
    %90 = arith.cmpi eq, %0, %89 : vector<128x128xi32>
    %91 = arith.extui %90 : vector<128x128xi1> to vector<128x128xi32>
    %92 = arith.sitofp %91 : vector<128x128xi32> to vector<128x128xf32>
    %c6_46 = arith.constant 6 : index
    %c0_47 = arith.constant 0 : index
    %c0_48 = arith.constant 0 : index
    %93 = vector.load %arg3[%c6_46, %c0_47, %c0_48] : memref<8x8x128xf32, #tpu.memory_space<vmem>>, vector<1x8x128xf32>
    %94 = vector.shape_cast %93 : vector<1x8x128xf32> to vector<8x128xf32>
    %cst_49 = arith.constant dense<0.000000e+00> : vector<8x128xf32>
    %95 = tpu.matmul %94, %92, %cst_49 {dimension_numbers = #tpu.dot_dimension_numbers<[1], [0], [0], [1], [0, 0, 1, 1], [], []>, precision = #tpu.contract_precision<fp32>} : vector<8x128xf32>, vector<128x128xf32>, vector<8x128xf32> -> vector<8x128xf32>
    %96 = vector.broadcast %88 : vector<1x128xf32> to vector<8x128xf32>
    %97 = arith.mulf %95, %96 : vector<8x128xf32>
    %98 = arith.addf %84, %97 : vector<8x128xf32>
    %99 = arith.mulf %97, %97 : vector<8x128xf32>
    %100 = arith.addf %86, %99 : vector<8x128xf32>
    %c7 = arith.constant 7 : index
    %c0_50 = arith.constant 0 : index
    %101 = vector.load %arg1[%c7, %c0_50] : memref<8x128xi32, #tpu.memory_space<vmem>>, vector<1x128xi32>
    %c7_51 = arith.constant 7 : index
    %c0_52 = arith.constant 0 : index
    %102 = vector.load %arg2[%c7_51, %c0_52] : memref<8x128xf32, #tpu.memory_space<vmem>>, vector<1x128xf32>
    %103 = vector.broadcast %101 : vector<1x128xi32> to vector<128x128xi32>
    %104 = arith.cmpi eq, %0, %103 : vector<128x128xi32>
    %105 = arith.extui %104 : vector<128x128xi1> to vector<128x128xi32>
    %106 = arith.sitofp %105 : vector<128x128xi32> to vector<128x128xf32>
    %c7_53 = arith.constant 7 : index
    %c0_54 = arith.constant 0 : index
    %c0_55 = arith.constant 0 : index
    %107 = vector.load %arg3[%c7_53, %c0_54, %c0_55] : memref<8x8x128xf32, #tpu.memory_space<vmem>>, vector<1x8x128xf32>
    %108 = vector.shape_cast %107 : vector<1x8x128xf32> to vector<8x128xf32>
    %cst_56 = arith.constant dense<0.000000e+00> : vector<8x128xf32>
    %109 = tpu.matmul %108, %106, %cst_56 {dimension_numbers = #tpu.dot_dimension_numbers<[1], [0], [0], [1], [0, 0, 1, 1], [], []>, precision = #tpu.contract_precision<fp32>} : vector<8x128xf32>, vector<128x128xf32>, vector<8x128xf32> -> vector<8x128xf32>
    %110 = vector.broadcast %102 : vector<1x128xf32> to vector<8x128xf32>
    %111 = arith.mulf %109, %110 : vector<8x128xf32>
    %112 = arith.addf %98, %111 : vector<8x128xf32>
    %113 = arith.mulf %111, %111 : vector<8x128xf32>
    %114 = arith.addf %100, %113 : vector<8x128xf32>
    %115 = vector.extract_strided_slice %112 {offsets = [0, 0], sizes = [1, 128], strides = [1, 1]} : vector<8x128xf32> to vector<1x128xf32>
    %116 = arith.mulf %112, %112 : vector<8x128xf32>
    %cst_57 = arith.constant dense<0.000000e+00> : vector<128xf32>
    %117 = vector.multi_reduction <add>, %116, %cst_57 [0] : vector<8x128xf32> to vector<128xf32>
    %118 = vector.shape_cast %117 : vector<128xf32> to vector<1x128xf32>
    %119 = arith.mulf %115, %115 : vector<1x128xf32>
    %120 = arith.subf %118, %119 : vector<1x128xf32>
    %cst_58 = arith.constant dense<0.000000e+00> : vector<128xf32>
    %121 = vector.multi_reduction <add>, %114, %cst_58 [0] : vector<8x128xf32> to vector<128xf32>
    %122 = vector.shape_cast %121 : vector<128xf32> to vector<1x128xf32>
    %123 = vector.extract_strided_slice %114 {offsets = [0, 0], sizes = [1, 128], strides = [1, 1]} : vector<8x128xf32> to vector<1x128xf32>
    %124 = arith.subf %122, %123 : vector<1x128xf32>
    %125 = arith.subf %120, %124 : vector<1x128xf32>
    %cst_59 = arith.constant 5.000000e-01 : f32
    %126 = vector.broadcast %cst_59 : f32 to vector<1x128xf32>
    %127 = arith.mulf %126, %125 : vector<1x128xf32>
    %128 = arith.addf %115, %127 : vector<1x128xf32>
    %c0_60 = arith.constant 0 : index
    %129 = memref.load %arg4[%c0_60] : memref<1xf32, #tpu.memory_space<smem>>
    %130 = vector.broadcast %129 : f32 to vector<1x128xf32>
    %131 = arith.addf %128, %130 : vector<1x128xf32>
    %c0_61 = arith.constant 0 : index
    %c0_62 = arith.constant 0 : index
    %132 = vector.load %arg5[%c0_61, %c0_62] : memref<1x128xf32, #tpu.memory_space<vmem>>, vector<1x128xf32>
    tpu.vector_store %arg5[%c0_61, %c0_62], %131 {strides = array<i32>} : memref<1x128xf32, #tpu.memory_space<vmem>>, vector<1x128xf32>,
    return
  }
  func.func @transform_0(%arg0: i32) -> (i32, i32) {
    %c0_i32 = arith.constant 0 : i32
    %c0_i32_0 = arith.constant 0 : i32
    return %c0_i32, %arg0 : i32, i32
  }
  func.func @transform_1(%arg0: i32) -> (i32, i32) {
    %c0_i32 = arith.constant 0 : i32
    %c0_i32_0 = arith.constant 0 : i32
    return %c0_i32, %arg0 : i32, i32
  }
  func.func @transform_2(%arg0: i32) -> (i32, i32, i32) {
    %c0_i32 = arith.constant 0 : i32
    %c0_i32_0 = arith.constant 0 : i32
    %c0_i32_1 = arith.constant 0 : i32
    %c0_i32_2 = arith.constant 0 : i32
    return %c0_i32, %c0_i32_0, %c0_i32_1 : i32, i32, i32
  }
  func.func @transform_3(%arg0: i32) -> i32 {
    %c0_i32 = arith.constant 0 : i32
    %c0_i32_0 = arith.constant 0 : i32
    return %c0_i32 : i32
  }
  func.func @transform_4(%arg0: i32) -> (i32, i32) {
    %c0_i32 = arith.constant 0 : i32
    %c0_i32_0 = arith.constant 0 : i32
    return %c0_i32, %arg0 : i32, i32
  }
}

</mosaic_0001>

<bundles_post_ra>
// kernel: deepfm_forward.1
= control target key start
LH: loop header
LB: loop body
LE: loop exit
PB: predicated region body
PF: predicated region fallthrough
CT: control target
= control target key end

     0   :  { %s10270_s17 = smov 0   ;;  %s14053_s0 = inlined_call_operand.vmem [shape: s32[8,384], index: 0, kind: input, shape index: {}]   ;;  %s14054_s1 = inlined_call_operand.vmem [shape: f32[8,384], index: 1, kind: input, shape index: {}]   ;;  %s14055_s2 = inlined_call_operand.vmem [shape: f32[8,8,128], index: 2, kind: input, shape index: {}]   ;;  %s14056_s3 = inlined_call_operand.<no memory space> [shape: f32[1], index: 3, kind: input, shape index: {}]   ;;  %s14057_s4 = inlined_call_operand.vmem [shape: f32[1,384], index: 4, kind: output, shape index: {}]  }
   0x1   :  { %9 = sst [smem:[#allocation2]] %s14056_s3 }
   0x2 LB: > { %s5946_s18 = sadd.s32 4294967295, %s10236_s17   ;;  %p5950_p0 = scmp.ge.s32.totalorder %s10236_s17, 1  ;;  %s10236_s17 = sphi %s10270_s17, %s15_s17  }
   0x3   : > { %p171_p1 = scmp.lt.s32.totalorder %s10236_s17, 4 }
   0x5   : > { %p172_p2 = pnand %p5950_p0, %p171_p1 }
   0x7   : > { %175 = sbr.rel (%p172_p2) target bundleno = 1046 (0x416), region = 36 }
   0xe   : > { %p198_p3 = scmp.lt.s32.totalorder %s5946_s18, 2  ;;  %v209_v0 = vlaneseq  ;;  %v14072_v1 = vmov 0.0|0.0   ;;  %vm14062_vm0 = vmmov 0   ;;  %v14088_v3 = vmov 0.0   ;;  %v280_v4 = vld [vmem:[%s14055_s2] sm:$0xff]  ;;  %v6036_v11 = vld [vmem:[%s14055_s2 + $0x8] sm:$0xff] }
   0xf   : > { %8986 = vmatprep.subr.bf16.mxu0 %v14072_v1  ;;  %9130 = vmatprep.subr.bf16.mxu1 %v14072_v1  ;;  %v10302_v6 = vand.u32 4294901760, %v280_v4  ;;  %v14371_v14 = vmov 0  ;;  %v14076_v17 = vmov 1.0|1.0   ;;  %v14374_v20 = vmov 0  ;;  %s5883_s15 = sld [smem:[#allocation2]] }
  0x10   : > { %s15007_s18 = smov (!%p198_p3, %s5946_s18), 2  ;;  %v10282_v2 = vshrl.u32 %v209_v0, 7  ;;  %7338 = vmatprep.mubr.msk.f32.mxu0 %vm14062_vm0, %v14088_v3  ;;  %7548 = vmatprep.mubr.msk.f32.mxu1 %vm14062_vm0, %v14088_v3  ;;  %v10360_v23 = vand.u32 4294901760, %v6036_v11  ;;  %v14378_v28 = vmov 0  ;;  %v14384_v35 = vmov 0 }
  0x11   : > { %s5951_s20 = sshll.u32 %s15007_s18, 3  ;;  %v10380_v31 = vsub.f32 %v280_v4, %v10302_v6  ;;  %v14391_v50 = vmov 0  ;;  %v14397_v58 = vmov 0  ;;  %v14400_v4 = vmov 0  ;;  %s208_s19 = scalar_lea.vmem %s14057_s4, %s15007_s18 }
  0x12   : > { %14367 = vst [vmem:[#allocation3_spill] sm:$0xff] %v10282_v2  ;;  %v10293_v5 = vadd.s32 8, %v10282_v2  ;;  %s10300_s23 = scalar_lea.vmem %s14053_s0, %s5951_s20  ;;  %v10311_v9 = vadd.s32 16, %v10282_v2  ;;  %v10314_v10 = vadd.s32 24, %v10282_v2  ;;  %14377 = vst [vmem:[#allocation9_spill] sm:$0xff] %v10360_v23  ;;  %v10374_v29 = vadd.s32 32, %v10282_v2  ;;  %s12458_s10 = scalar_lea.vmem %s14054_s1, %s5951_s20 }
  0x13   : > { %v10305_v7 = vld [vmem:[%s10300_s23] ss:$0 sm:$0xff]  ;;  %v10308_v8 = vld [vmem:[%s10300_s23 + $0x1] ss:$0 sm:$0xff]  ;;  %v10377_v30 = vadd.s32 40, %v10282_v2  ;;  %14383 = vst [vmem:[#allocation13_spill] sm:$0xff] %v10380_v31  ;;  %v10467_v53 = vsub.f32 %v6036_v11, %v10360_v23 }
  0x14   : > { %14368 = vst [vmem:[#allocation4_spill] sm:$0xff] %v10293_v5  ;;  %14369 = vst [vmem:[#allocation5_spill] sm:$0xff] %v10311_v9  ;;  %vm232_vm1 = vcmp.eq.s32.totalorder %v10282_v2, %v10305_v7  ;;  %vm233_vm2 = vcmp.eq.s32.totalorder %v10293_v5, %v10305_v7  ;;  %vm936_vm3 = vcmp.eq.s32.totalorder %v10282_v2, %v10308_v8  ;;  %v10399_v36 = vadd.s32 48, %v10282_v2 }
  0x15   : > { %14370 = vst [vmem:[#allocation6_spill] sm:$0xff] %v10314_v10  ;;  %vm937_vm4 = vcmp.eq.s32.totalorder %v10293_v5, %v10308_v8  ;;  %v5954_v12 = vsel %vm232_vm1, 1.0, %v14088_v3  ;;  %v5955_v13 = vsel %vm233_vm2, 1.0, %v14088_v3  ;;  %vm10329_vm5 = vmpackc.low %vm233_vm2, %vm232_vm1  ;;  %v6020_v15 = vsel %vm936_vm3, 1.0, %v14088_v3 }
  0x16   : > { %v14372_v14 = vsel %vm10329_vm5, 4294967295, %v14371_v14  ;;  %v6021_v16 = vsel %vm937_vm4, 1.0, %v14088_v3  ;;  %8988 = vmatpush3.bf16.msk.msra.mxu0 %vm10329_vm5, %v14076_v17  ;;  %v10338_v18 = vsub.f32 %v5954_v12, %v5954_v12  ;;  %v10340_v19 = vsub.f32 %v5955_v13, %v5955_v13  ;;  %vm10342_vm6 = vmpackc.low %vm937_vm4, %vm936_vm3  ;;  %14381 = vst [vmem:[#allocation11_spill] sm:$0xff] %v10374_v29 }
  0x17   : > { %14373 = vst [vmem:[#allocation7_spill] sm:$0xff] %v14372_v14  ;;  %v14375_v20 = vsel %vm10342_vm6, 4294967295, %v14374_v20  ;;  %v10346_v21 = vsub.f32 %v6020_v15, %v6020_v15  ;;  %v10348_v22 = vsub.f32 %v6021_v16, %v6021_v16  ;;  %9132 = vmatpush3.bf16.msk.msra.mxu1 %vm10342_vm6, %v14076_v17  ;;  %8989 = vmatprep.subr.bf16.mxu0 %v14072_v1  ;;  %14382 = vst [vmem:[#allocation12_spill] sm:$0xff] %v10377_v30  ;;  %v14417_v59 = vmov 0 }
  0x18   : > { %14376 = vst [vmem:[#allocation8_spill] sm:$0xff] %v14375_v20  ;;  %vm234_vm7 = vcmp.eq.s32.totalorder %v10311_v9, %v10305_v7  ;;  %vm235_vm8 = vcmp.eq.s32.totalorder %v10314_v10, %v10305_v7  ;;  %vm938_vm9 = vcmp.eq.s32.totalorder %v10311_v9, %v10308_v8  ;;  %v14061_v24 = vand.u32 4294901760, %v10338_v18  ;;  %9133 = vmatprep.subr.bf16.mxu1 %v14072_v1 }
  0x19   : > { %v14060_v25 = vand.u32 4294901760, %v10340_v19  ;;  %v14059_v26 = vand.u32 4294901760, %v10346_v21  ;;  %v14058_v27 = vand.u32 4294901760, %v10348_v22  ;;  %vm10367_vm10 = vmpackc.low %vm235_vm8, %vm234_vm7  ;;  %vm939_vm11 = vcmp.eq.s32.totalorder %v10314_v10, %v10308_v8  ;;  %14387 = vst [vmem:[#allocation15_spill] sm:$0xff] %v10399_v36 }
  0x1a   : > { %v14379_v28 = vsel %vm10367_vm10, 4294967295, %v14378_v28  ;;  %v5956_v32 = vsel %vm234_vm7, 1.0, %v14088_v3  ;;  %v5957_v33 = vsel %vm235_vm8, 1.0, %v14088_v3  ;;  %8991 = vmatpush3.bf16.msk.msra.mxu0 %vm10367_vm10, %v14076_v17  ;;  %v6022_v34 = vsel %vm938_vm9, 1.0, %v14088_v3  ;;  %vm10394_vm12 = vmpackc.low %vm939_vm11, %vm938_vm9  ;;  %14396 = vst [vmem:[#allocation22_spill] sm:$0xff] %v10467_v53 }
  0x1b   : > { %14380 = vst [vmem:[#allocation10_spill] sm:$0xff] %v14379_v28  ;;  %v14385_v35 = vsel %vm10394_vm12, 4294967295, %v14384_v35  ;;  %v10404_v37 = vsub.f32 %v10338_v18, %v14061_v24  ;;  %v6023_v38 = vsel %vm939_vm11, 1.0, %v14088_v3  ;;  %9135 = vmatpush3.bf16.msk.msra.mxu1 %vm10394_vm12, %v14076_v17  ;;  %8992 = vmatprep.subr.bf16.mxu0 %v14072_v1  ;;  %v10412_v39 = vadd.s32 56, %v10282_v2 }
  0x1c   : > { %14386 = vst [vmem:[#allocation14_spill] sm:$0xff] %v14385_v35  ;;  %v10415_v40 = vadd.s32 64, %v10282_v2  ;;  %v10420_v41 = vsub.f32 %v10340_v19, %v14060_v25  ;;  %v10425_v42 = vsub.f32 %v10346_v21, %v14059_v26  ;;  %v10430_v43 = vsub.f32 %v10348_v22, %v14058_v27  ;;  %9136 = vmatprep.subr.bf16.mxu1 %v14072_v1 }
  0x1d   : > { %14388 = vst [vmem:[#allocation16_spill] sm:$0xff] %v10412_v39  ;;  %v10434_v44 = vadd.s32 72, %v10282_v2  ;;  %v10436_v45 = vsub.f32 %v5956_v32, %v5956_v32  ;;  %v10438_v46 = vsub.f32 %v5957_v33, %v5957_v33  ;;  %v10440_v47 = vsub.f32 %v6022_v34, %v6022_v34 }
  0x1e   : > { %14389 = vst [vmem:[#allocation17_spill] sm:$0xff] %v10415_v40  ;;  %v10442_v48 = vsub.f32 %v6023_v38, %v6023_v38  ;;  %vm236_vm13 = vcmp.eq.s32.totalorder %v10374_v29, %v10305_v7  ;;  %vm237_vm14 = vcmp.eq.s32.totalorder %v10377_v30, %v10305_v7  ;;  %vm940_vm15 = vcmp.eq.s32.totalorder %v10374_v29, %v10308_v8 }
  0x1f   : > { %14390 = vst [vmem:[#allocation18_spill] sm:$0xff] %v10434_v44  ;;  %vm941_vm1 = vcmp.eq.s32.totalorder %v10377_v30, %v10308_v8  ;;  %vm10456_vm2 = vmpackc.low %vm237_vm14, %vm236_vm13  ;;  %v10461_v51 = vadd.s32 80, %v10282_v2  ;;  %v10464_v52 = vadd.s32 88, %v10282_v2  ;;  %v5958_v57 = vsel %vm236_vm13, 1.0, %v14088_v3 }
  0x20   : > { %v14392_v50 = vsel %vm10456_vm2, 4294967295, %v14391_v50  ;;  %8994 = vmatpush3.bf16.msk.msra.mxu0 %vm10456_vm2, %v14076_v17  ;;  %vm10482_vm3 = vmpackc.low %vm941_vm1, %vm940_vm15  ;;  %vm238_vm4 = vcmp.eq.s32.totalorder %v10399_v36, %v10305_v7  ;;  %vm239_vm7 = vcmp.eq.s32.totalorder %v10412_v39, %v10305_v7  ;;  %v5959_v63 = vsel %vm237_vm14, 1.0, %v14088_v3 }
  0x21   : > { %14393 = vst [vmem:[#allocation19_spill] sm:$0xff] %v14392_v50  ;;  %14394 = vst [vmem:[#allocation20_spill] sm:$0xff] %v10461_v51  ;;  %v14398_v58 = vsel %vm10482_vm3, 4294967295, %v14397_v58  ;;  %9138 = vmatpush3.bf16.msk.msra.mxu1 %vm10482_vm3, %v14076_v17  ;;  %8995 = vmatprep.subr.bf16.mxu0 %v14072_v1  ;;  %v6024_v0 = vsel %vm940_vm15, 1.0, %v14088_v3  ;;  %v10511_v11 = vsub.f32 %v5958_v57, %v5958_v57  ;;  %v6025_v12 = vsel %vm941_vm1, 1.0, %v14088_v3 }
  0x22   : > { %14395 = vst [vmem:[#allocation21_spill] sm:$0xff] %v10464_v52  ;;  %14399 = vst [vmem:[#allocation23_spill] sm:$0xff] %v14398_v58  ;;  %9139 = vmatprep.subr.bf16.mxu1 %v14072_v1  ;;  %v5960_v13 = vsel %vm238_vm4, 1.0, %v14088_v3  ;;  %vm942_vm9 = vcmp.eq.s32.totalorder %v10399_v36, %v10308_v8  ;;  %v5961_v15 = vsel %vm239_vm7, 1.0, %v14088_v3  ;;  %vm943_vm11 = vcmp.eq.s32.totalorder %v10412_v39, %v10308_v8 }
  0x23   : > { %vm10507_vm8 = vmpackc.low %vm239_vm7, %vm238_vm4  ;;  %v6026_v16 = vsel %vm942_vm9, 1.0, %v14088_v3  ;;  %vm240_vm13 = vcmp.eq.s32.totalorder %v10415_v40, %v10305_v7  ;;  %v10529_v32 = vsub.f32 %v5959_v63, %v5959_v63  ;;  %v10531_v33 = vsub.f32 %v6024_v0, %v6024_v0 }
  0x24   : > { %v14401_v4 = vsel %vm10507_vm8, 4294967295, %v14400_v4  ;;  %8997 = vmatpush3.bf16.msk.msra.mxu0 %vm10507_vm8, %v14076_v17  ;;  %v6027_v34 = vsel %vm943_vm11, 1.0, %v14088_v3  ;;  %vm10534_vm14 = vmpackc.low %vm943_vm11, %vm942_vm9  ;;  %v14403_v38 = vmov 0  ;;  %vm241_vm15 = vcmp.eq.s32.totalorder %v10434_v44, %v10305_v7 }
  0x25   : > { %14402 = vst [vmem:[#allocation24_spill] sm:$0xff] %v14401_v4  ;;  %v14404_v38 = vsel %vm10534_vm14, 4294967295, %v14403_v38  ;;  %8998 = vmatprep.subr.bf16.mxu0 %v14072_v1  ;;  %v10541_v57 = vsub.f32 %v6025_v12, %v6025_v12  ;;  %v10543_v27 = vsub.f32 %v5960_v13, %v5960_v13  ;;  %9141 = vmatpush3.bf16.msk.msra.mxu1 %vm10534_vm14, %v14076_v17  ;;  %v5962_v63 = vsel %vm240_vm13, 1.0, %v14088_v3  ;;  %vm10550_vm1 = vmpackc.low %vm241_vm15, %vm240_vm13 }
  0x26   : > { %14405 = vst [vmem:[#allocation25_spill] sm:$0xff] %v14404_v38  ;;  %v5963_v0 = vsel %vm241_vm15, 1.0, %v14088_v3  ;;  %v14406_v26 = vmov 0  ;;  %v10554_v25 = vsub.f32 %v5961_v15, %v5961_v15  ;;  %v10556_v24 = vsub.f32 %v6026_v16, %v6026_v16  ;;  %9142 = vmatprep.subr.bf16.mxu1 %v14072_v1 }
  0x27   : > { %v14407_v26 = vsel %vm10550_vm1, 4294967295, %v14406_v26  ;;  %v10558_v12 = vsub.f32 %v6027_v34, %v6027_v34  ;;  %vm944_vm4 = vcmp.eq.s32.totalorder %v10415_v40, %v10308_v8  ;;  %v10566_v13 = vsub.f32 %v5962_v63, %v5962_v63 }
  0x28   : > { %14408 = vst [vmem:[#allocation26_spill] sm:$0xff] %v14407_v26  ;;  %9000 = vmatpush3.bf16.msk.msra.mxu0 %vm10550_vm1, %v14076_v17  ;;  %v10568_v62 = vsub.f32 %v5963_v0, %v5963_v0  ;;  %vm14064_vm7 = vcmp.eq.s32.totalorder %v10434_v44, %v10308_v8  ;;  %vm14067_vm9 = vcmp.eq.s32.totalorder %v10461_v51, %v10305_v7  ;;  %v14409_v63 = vmov 0 }
  0x29   : > { %vm10583_vm11 = vmpackc.low %vm14064_vm7, %vm944_vm4  ;;  %9001 = vmatprep.subr.bf16.mxu0 %v14072_v1  ;;  %v10589_v0 = vadd.s32 96, %v10282_v2  ;;  %vm243_vm13 = vcmp.eq.s32.totalorder %v10464_v52, %v10305_v7  ;;  %vm946_vm15 = vcmp.eq.s32.totalorder %v10461_v51, %v10308_v8  ;;  %v14413_v16 = vmov 0 }
  0x2a   : > { %v14410_v63 = vsel %vm10583_vm11, 4294967295, %v14409_v63  ;;  %9144 = vmatpush3.bf16.msk.msra.mxu1 %vm10583_vm11, %v14076_v17  ;;  %vm10607_vm0 = vmpackc.low %vm243_vm13, %vm14067_vm9  ;;  %vm947_vm7 = vcmp.eq.s32.totalorder %v10464_v52, %v10308_v8  ;;  %v6028_v60 = vsel %vm944_vm4, 1.0, %v14088_v3  ;;  %vm14416_vm11 = vcmp.eq.s32.totalorder %v10434_v44, %v10308_v8 }
  0x2b   : > { %14411 = vst [vmem:[#allocation27_spill] sm:$0xff] %v14410_v63  ;;  %14412 = vst [vmem:[#allocation28_spill] sm:$0xff] %v10589_v0  ;;  %9145 = vmatprep.subr.bf16.mxu1 %v14072_v1  ;;  %v14414_v16 = vsel %vm10607_vm0, 4294967295, %v14413_v16  ;;  %v6029_v61 = vsel %vm14416_vm11, 1.0, %v14088_v3  ;;  %vm14420_vm1 = vcmp.eq.s32.totalorder %v10461_v51, %v10305_v7  ;;  %v5965_v15 = vsel %vm243_vm13, 1.0, %v14088_v3 }
  0x2c   : > { %14415 = vst [vmem:[#allocation29_spill] sm:$0xff] %v14414_v16  ;;  %9003 = vmatpush3.bf16.msk.msra.mxu0 %vm10607_vm0, %v14076_v17  ;;  %vm10626_vm9 = vmpackc.low %vm947_vm7, %vm946_vm15  ;;  %v5964_v34 = vsel %vm14420_vm1, 1.0, %v14088_v3  ;;  %v6030_v56 = vsel %vm946_vm15, 1.0, %v14088_v3  ;;  %v10638_v55 = vadd.s32 104, %v10282_v2  ;;  %v6031_v54 = vsel %vm947_vm7, 1.0, %v14088_v3 }
  0x2d   : > { %v14418_v59 = vsel %vm10626_vm9, 4294967295, %v14417_v59  ;;  %9004 = vmatprep.subr.bf16.mxu0 %v14072_v1  ;;  %vm244_vm4 = vcmp.eq.s32.totalorder %v10589_v0, %v10305_v7  ;;  %vm948_vm1 = vcmp.eq.s32.totalorder %v10589_v0, %v10308_v8  ;;  %v10649_v49 = vadd.s32 112, %v10282_v2 }
  0x2e   : > { %14419 = vst [vmem:[#allocation30_spill] sm:$0xff] %v14418_v59  ;;  %14421 = vst [vmem:[#allocation31_spill] sm:$0xff] %v10638_v55  ;;  %9147 = vmatpush3.bf16.msk.msra.mxu1 %vm10626_vm9, %v14076_v17  ;;  %v10651_v52 = vsub.f32 %v6028_v60, %v6028_v60  ;;  %v10653_v1 = vsub.f32 %v6029_v61, %v6029_v61  ;;  %v14423_v51 = vmov 0.0|0.0   ;;  %vm245_vm7 = vcmp.eq.s32.totalorder %v10638_v55, %v10305_v7 }
  0x2f   : > { %14422 = vst [vmem:[#allocation32_spill] sm:$0xff] %v10649_v49  ;;  %9148 = vmatprep.subr.bf16.mxu1 %v14423_v51  ;;  %v5966_v17 = vsel %vm244_vm4, 1.0, %v14088_v3  ;;  %v10659_v44 = vsub.f32 %v5964_v34, %v5964_v34  ;;  %v10661_v40 = vsub.f32 %v5965_v15, %v5965_v15  ;;  %v5967_v39 = vsel %vm245_vm7, 1.0, %v14088_v3  ;;  %vm10664_vm11 = vmpackc.low %vm245_vm7, %vm244_vm4 }
  0x30   : > { %v14424_v36 = vmov 0  ;;  %vm949_vm13 = vcmp.eq.s32.totalorder %v10638_v55, %v10308_v8  ;;  %v10670_v60 = vsub.f32 %v6030_v56, %v6030_v56  ;;  %v10672_v61 = vsub.f32 %v6031_v54, %v6031_v54 }
  0x31   : > { %v14425_v36 = vsel %vm10664_vm11, 4294967295, %v14424_v36  ;;  %v14427_v30 = vmov 1.0|1.0   ;;  %v10677_v34 = vsub.f32 %v5966_v17, %v5966_v17  ;;  %vm10682_vm15 = vmpackc.low %vm949_vm13, %vm948_vm1  ;;  %v14428_v15 = vmov 0 }
  0x32   : > { %14426 = vst [vmem:[#allocation33_spill] sm:$0xff] %v14425_v36  ;;  %9006 = vmatpush3.bf16.msk.msra.mxu0 %vm10664_vm11, %v14427_v30  ;;  %v14429_v15 = vsel %vm10682_vm15, 4294967295, %v14428_v15  ;;  %v10687_v3 = vadd.s32 120, %v10282_v2  ;;  %v10689_v56 = vsub.f32 %v5967_v39, %v5967_v39  ;;  %v14432_v54 = vmov 0.0   ;;  %9150 = vmatpush3.bf16.msk.msra.mxu1 %vm10682_vm15, %v14427_v30 }
  0x33   : > { %14430 = vst [vmem:[#allocation34_spill] sm:$0xff] %v14429_v15  ;;  %v6032_v55 = vsel %vm948_vm1, 1.0, %v14432_v54  ;;  %9007 = vmatprep.subr.bf16.mxu0 %v14423_v51  ;;  %vm246_vm4 = vcmp.eq.s32.totalorder %v10649_v49, %v10305_v7  ;;  %v6033_v29 = vsel %vm949_vm13, 1.0, %v14432_v54  ;;  %9151 = vmatprep.subr.bf16.mxu1 %v14423_v51  ;;  %v14433_v5 = vmov 0 }
  0x34   : > { %14431 = vst [vmem:[#allocation35_spill] sm:$0xff] %v10687_v3  ;;  %vm247_vm1 = vcmp.eq.s32.totalorder %v10687_v3, %v10305_v7  ;;  %v5968_v9 = vsel %vm246_vm4, 1.0, %v14432_v54  ;;  %vm951_vm7 = vcmp.eq.s32.totalorder %v10687_v3, %v10308_v8  ;;  %v10720_v2 = vsub.f32 %v6032_v55, %v6032_v55 }
  0x35   : > { %vm10712_vm15 = vmpackc.low %vm247_vm1, %vm246_vm4  ;;  %vm14436_vm13 = vcmp.eq.s32.totalorder %v10649_v49, %v10308_v8  ;;  %v14437_v7 = vmov 0  ;;  %v10738_v10 = vsub.f32 %v6033_v29, %v6033_v29  ;;  %v5969_v0 = vsel %vm247_vm1, 1.0, %v14432_v54 }
  0x36   : > { %v14434_v5 = vsel %vm10712_vm15, 4294967295, %v14433_v5  ;;  %9009 = vmatpush3.bf16.msk.msra.mxu0 %vm10712_vm15, %v14427_v30  ;;  %vm10731_vm4 = vmpackc.low %vm951_vm7, %vm14436_vm13  ;;  %v6034_v39 = vsel %vm14436_vm13, 1.0, %v14432_v54  ;;  %v14440_v29 = vand.u32 4294901760, %v10380_v31  ;;  %v14126_v17 = vand.u32 4294901760, %v10467_v53 }
  0x37   : > { %14435 = vst [vmem:[#allocation36_spill] sm:$0xff] %v14434_v5  ;;  %v14438_v7 = vsel %vm10731_vm4, 4294967295, %v14437_v7  ;;  %9153 = vmatpush3.bf16.msk.msra.mxu1 %vm10731_vm4, %v14427_v30  ;;  %9010 = vmatprep.subr.bf16.mxu0 %v14423_v51  ;;  %v10745_v5 = vsub.f32 %v5968_v9, %v5968_v9  ;;  %v14442_v15 = vand.u32 4294901760, %v10420_v41  ;;  %v14443_v9 = vand.u32 4294901760, %v10425_v42 }
  0x38   : > { %14439 = vst [vmem:[#allocation37_spill] sm:$0xff] %v14438_v7  ;;  %9154 = vmatprep.subr.bf16.mxu1 %v14423_v51  ;;  %v365_v55 = vsub.f32 %v10380_v31, %v14440_v29  ;;  %v14441_v7 = vand.u32 4294901760, %v10404_v37  ;;  %v14444_v59 = vand.u32 4294901760, %v10430_v43  ;;  %v14445_v49 = vand.u32 4294901760, %v10436_v45 }
  0x39   : > { %v14446_v26 = vand.u32 4294901760, %v10438_v46  ;;  %v1070_v37 = vsub.f32 %v10467_v53, %v14126_v17  ;;  %v14447_v41 = vand.u32 4294901760, %v10440_v47  ;;  %v14448_v43 = vand.u32 4294901760, %v10442_v48 }
  0x3a   : > { %v9011_v36 = vpack.c.bf16 %v14442_v15, %v14441_v7  ;;  %v9155_v16 = vpack.c.bf16 %v14444_v59, %v14443_v9  ;;  %v390_v63 = vsub.f32 %v10436_v45, %v14445_v49  ;;  %v366_v38 = vand.u32 4294901760, %v365_v55 }
  0x3b   : > { %v397_v29 = vsub.f32 %v10438_v46, %v14446_v26  ;;  %v1095_v42 = vsub.f32 %v10440_v47, %v14447_v41  ;;  %v1102_v59 = vsub.f32 %v10442_v48, %v14448_v43  ;;  %v14449_v49 = vand.u32 4294901760, %v10511_v11 }
  0x3c   : > { %v391_v15 = vand.u32 4294901760, %v390_v63  ;;  %v14450_v26 = vand.u32 4294901760, %v10529_v32  ;;  %7339 = vmatmul.mubr.f32.vlgmr.msra.gmra.mrb[0].mxu0 %v366_v38  ;;  %v1071_v17 = vand.u32 4294901760, %v1070_v37  ;;  %v14451_v41 = vand.u32 4294901760, %v10531_v33 }
  0x3d   : > { %v398_v7 = vand.u32 4294901760, %v397_v29  ;;  %v404_v9 = vsub.f32 %v10511_v11, %v14449_v49  ;;  %v1096_v4 = vand.u32 4294901760, %v1095_v42  ;;  %v1103_v58 = vand.u32 4294901760, %v1102_v59  ;;  %9012 = vmatpush3.bf16.msra.mxu0 %v9011_v36 }
  0x3e   : > { %v411_v55 = vsub.f32 %v10529_v32, %v14450_v26  ;;  %v1109_v50 = vsub.f32 %v10531_v33, %v14451_v41  ;;  %v14452_v35 = vand.u32 4294901760, %v10541_v57  ;;  %vm14453_vm1 = vmmov 0   ;;  %7549 = vmatmul.mubr.f32.vlgmr.msra.gmra.mrb[0].mxu1 %v1071_v17  ;;  %9013 = vmatprep.subr.bf16.mxu0 %v14423_v51 }
  0x3f   : > { %v9014_v43 = vpack.c.bf16 %v398_v7, %v391_v15  ;;  %v405_v63 = vand.u32 4294901760, %v404_v9  ;;  %7373 = vmatprep.mubr.msk.f32.mxu0 %vm14453_vm1, %v14432_v54  ;;  %v6035_v38 = vsel %vm951_vm7, 1.0, %v14432_v54  ;;  %v9158_v37 = vpack.c.bf16 %v1103_v58, %v1096_v4  ;;  %9156 = vmatpush3.bf16.msra.mxu1 %v9155_v16 }
  0x40   : > { %v412_v29 = vand.u32 4294901760, %v411_v55  ;;  %v1116_v49 = vsub.f32 %v10541_v57, %v14452_v35  ;;  %v14454_v36 = vand.u32 4294901760, %v10543_v27  ;;  %v14455_v59 = vand.u32 4294901760, %v10554_v25  ;;  %7583 = vmatprep.mubr.msk.f32.mxu1 %vm14453_vm1, %v14432_v54  ;;  %9157 = vmatprep.subr.bf16.mxu1 %v14423_v51 }
  0x41   : > { %v1110_v15 = vand.u32 4294901760, %v1109_v50  ;;  %v14456_v9 = vand.u32 4294901760, %v10556_v24  ;;  %v14457_v17 = vand.u32 4294901760, %v10558_v12  ;;  %v14458_v55 = vand.u32 4294901760, %v10566_v13  ;;  %9015 = vmatpush3.bf16.msra.mxu0 %v9014_v43 }
  0x42   : > { %v418_v42 = vsub.f32 %v10543_v27, %v14454_v36  ;;  %v425_v35 = vsub.f32 %v10554_v25, %v14455_v59  ;;  %v1117_v7 = vand.u32 4294901760, %v1116_v49  ;;  %v14459_v16 = vand.u32 4294901760, %v10568_v62  ;;  %9016 = vmatprep.subr.bf16.mxu0 %v14423_v51 }
  0x43   : > { %v1123_v8 = vsub.f32 %v10556_v24, %v14456_v9  ;;  %v1130_v26 = vsub.f32 %v10558_v12, %v14457_v17  ;;  %v432_v50 = vsub.f32 %v10566_v13, %v14458_v55  ;;  %v9017_v59 = vpack.c.bf16 %v412_v29, %v405_v63  ;;  %9159 = vmatpush3.bf16.msra.mxu1 %v9158_v37 }
  0x44   : > { %v419_v58 = vand.u32 4294901760, %v418_v42  ;;  %v426_v4 = vand.u32 4294901760, %v425_v35  ;;  %v439_v41 = vsub.f32 %v10568_v62, %v14459_v16  ;;  %v14460_v9 = vand.u32 4294901760, %v10651_v52  ;;  %9160 = vmatprep.subr.bf16.mxu1 %v14423_v51 }
  0x45   : > { %v10825_v35 = vsub.f32 %v5969_v0, %v5969_v0  ;;  %v10827_v3 = vsub.f32 %v6034_v39, %v6034_v39  ;;  %v14461_v55 = vand.u32 4294901760, %v10653_v1  ;;  %v10833_v49 = vsub.f32 %v6035_v38, %v6035_v38  ;;  %9018 = vmatpush3.bf16.msra.mxu0 %v9017_v59 }
  0x46   : > { %v1137_v17 = vsub.f32 %v10651_v52, %v14460_v9  ;;  %v9161_v43 = vpack.c.bf16 %v1117_v7, %v1110_v15  ;;  %v1124_v63 = vand.u32 4294901760, %v1123_v8  ;;  %v1131_v29 = vand.u32 4294901760, %v1130_v26  ;;  %9019 = vmatprep.subr.bf16.mxu0 %v14423_v51 }
  0x47   : > { %v1144_v16 = vsub.f32 %v10653_v1, %v14461_v55  ;;  %v9020_v9 = vpack.c.bf16 %v426_v4, %v419_v58  ;;  %v433_v42 = vand.u32 4294901760, %v432_v50  ;;  %v440_v0 = vand.u32 4294901760, %v439_v41 }
  0x48   : > { %v1138_v36 = vand.u32 4294901760, %v1137_v17  ;;  %v14462_v28 = vand.u32 4294901760, %v10659_v44  ;;  %v14463_v55 = vand.u32 4294901760, %v10661_v40  ;;  %v14464_v37 = vand.u32 4294901760, %v10670_v60  ;;  %9162 = vmatpush3.bf16.msra.mxu1 %v9161_v43 }
  0x49   : > { %v1145_v39 = vand.u32 4294901760, %v1144_v16  ;;  %v480_v7 = vand.u32 4294901760, %v10825_v35  ;;  %v14465_v8 = vand.u32 4294901760, %v10672_v61  ;;  %v14466_v58 = vand.u32 4294901760, %v10677_v34  ;;  %9163 = vmatprep.subr.bf16.mxu1 %v14423_v51  ;;  %9021 = vmatpush3.bf16.msra.mxu0 %v9020_v9 }
  0x4a   : > { %v446_v20 = vsub.f32 %v10659_v44, %v14462_v28  ;;  %v453_v38 = vsub.f32 %v10661_v40, %v14463_v55  ;;  %v1151_v15 = vsub.f32 %v10670_v60, %v14464_v37  ;;  %v14467_v4 = vand.u32 4294901760, %v10689_v56  ;;  %9022 = vmatprep.subr.bf16.mxu0 %v14423_v51 }
  0x4b   : > { %v1158_v26 = vsub.f32 %v10672_v61, %v14465_v8  ;;  %v460_v28 = vsub.f32 %v10677_v34, %v14466_v58  ;;  %v1178_v41 = vand.u32 4294901760, %v10827_v3  ;;  %v9164_v59 = vpack.c.bf16 %v1131_v29, %v1124_v63 }
  0x4c   : > { %v467_v50 = vsub.f32 %v10689_v56, %v14467_v4  ;;  %v14468_v17 = vand.u32 4294901760, %v10720_v2  ;;  %v14469_v55 = vand.u32 4294901760, %v10738_v10  ;;  %v1185_v8 = vand.u32 4294901760, %v10833_v49 }
  0x4d   : > { %v9023_v58 = vpack.c.bf16 %v440_v0, %v433_v42  ;;  %v9167_v53 = vpack.c.bf16 %v1145_v39, %v1138_v36  ;;  %v447_v4 = vand.u32 4294901760, %v446_v20  ;;  %v454_v14 = vand.u32 4294901760, %v453_v38  ;;  %9165 = vmatpush3.bf16.msra.mxu1 %v9164_v59 }
  0x4e   : > { %v1165_v16 = vsub.f32 %v10720_v2, %v14468_v17  ;;  %v1172_v37 = vsub.f32 %v10738_v10, %v14469_v55  ;;  %v1152_v30 = vand.u32 4294901760, %v1151_v15  ;;  %v1159_v43 = vand.u32 4294901760, %v1158_v26  ;;  %9166 = vmatprep.subr.bf16.mxu1 %v14423_v51 }
  0x4f   : > { %v461_v63 = vand.u32 4294901760, %v460_v28  ;;  %v468_v29 = vand.u32 4294901760, %v467_v50  ;;  %v14470_v17 = vand.u32 4294901760, %v10745_v5  ;;  %v481_v54 = vsub.f32 %v10825_v35, %v480_v7  ;;  %9024 = vmatpush3.bf16.msra.mxu0 %v9023_v58 }
  0x50   : > { %v1166_v55 = vand.u32 4294901760, %v1165_v16  ;;  %v1173_v23 = vand.u32 4294901760, %v1172_v37  ;;  %v1179_v42 = vsub.f32 %v10827_v3, %v1178_v41  ;;  %v9026_v20 = vpack.c.bf16 %v454_v14, %v447_v4  ;;  %9025 = vmatprep.subr.bf16.mxu0 %v14423_v51 }
  0x51   : > { %v474_v31 = vsub.f32 %v10745_v5, %v14470_v17  ;;  %v9170_v36 = vpack.c.bf16 %v1159_v43, %v1152_v30  ;;  %v9029_v9 = vpack.c.bf16 %v468_v29, %v461_v63  ;;  %v1186_v39 = vsub.f32 %v10833_v49, %v1185_v8  ;;  %9168 = vmatpush3.bf16.msra.mxu1 %v9167_v53 }
  0x52   : > { %v9173_v38 = vpack.c.bf16 %v1173_v23, %v1166_v55  ;;  %v482_v15 = vand.u32 4294901760, %v481_v54  ;;  %v1180_v26 = vand.u32 4294901760, %v1179_v42  ;;  %v14471_v28 = vand.u32 4294901760, %v10338_v18  ;;  %9169 = vmatprep.subr.bf16.mxu1 %v14423_v51 }
  0x53   : > { %v475_v0 = vand.u32 4294901760, %v474_v31  ;;  %v14472_v50 = vand.u32 4294901760, %v10340_v19  ;;  %v14473_v14 = vand.u32 4294901760, %v10346_v21  ;;  %v14474_v30 = vand.u32 4294901760, %v10348_v22  ;;  %9027 = vmatpush3.bf16.msra.mxu0 %v9026_v20 }
  0x54   : > { %v14475_v31 = vand.u32 4294901760, %v10436_v45  ;;  %v14476_v23 = vand.u32 4294901760, %v10438_v46  ;;  %v14477_v54 = vand.u32 4294901760, %v10440_v47  ;;  %v14478_v37 = vand.u32 4294901760, %v10442_v48  ;;  %9028 = vmatprep.subr.bf16.mxu0 %v14423_v51 }
  0x55   : > { %v10878_v59 = vpack.c.bf16 %v14472_v50, %v14471_v28  ;;  %v10885_v16 = vpack.c.bf16 %v14474_v30, %v14473_v14  ;;  %v14479_v4 = vand.u32 4294901760, %v10511_v11  ;;  %v14480_v43 = vand.u32 4294901760, %v10529_v32  ;;  %9171 = vmatpush3.bf16.msra.mxu1 %v9170_v36 }
  0x56   : > { %v10891_v53 = vpack.c.bf16 %v14476_v23, %v14475_v31  ;;  %v10897_v58 = vpack.c.bf16 %v14478_v37, %v14477_v54  ;;  %v14481_v29 = vand.u32 4294901760, %v10531_v33  ;;  %v14482_v17 = vand.u32 4294901760, %v10541_v57  ;;  %9172 = vmatprep.subr.bf16.mxu1 %v14423_v51 }
  0x57   : > { %v10903_v63 = vpack.c.bf16 %v14480_v43, %v14479_v4  ;;  %v14483_v42 = vand.u32 4294901760, %v10543_v27  ;;  %v14484_v28 = vand.u32 4294901760, %v10554_v25  ;;  %v14485_v14 = vand.u32 4294901760, %v10556_v24  ;;  %9030 = vmatpush3.bf16.msra.mxu0 %v9029_v9  ;;  %v14504_v9 = vld [vmem:[#allocation9_spill] sm:$0xff] }
  0x58   : > { %v10909_v55 = vpack.c.bf16 %v14482_v17, %v14481_v29  ;;  %v14486_v30 = vand.u32 4294901760, %v10558_v12  ;;  %v14487_v20 = vand.u32 4294901760, %v10566_v13  ;;  %v14488_v23 = vand.u32 4294901760, %v10568_v62  ;;  %9031 = vmatprep.subr.bf16.mxu0 %v14423_v51 }
  0x59   : > { %v10915_v50 = vpack.c.bf16 %v14484_v28, %v14483_v42  ;;  %v14490_v37 = vand.u32 4294901760, %v10651_v52  ;;  %v14491_v4 = vand.u32 4294901760, %v10653_v1  ;;  %v14493_v29 = vand.u32 4294901760, %v10659_v44  ;;  %9174 = vmatpush3.bf16.msra.mxu1 %v9173_v38 }
  0x5a   : > { %v10921_v31 = vpack.c.bf16 %v14486_v30, %v14485_v14  ;;  %v10927_v54 = vpack.c.bf16 %v14488_v23, %v14487_v20  ;;  %v14494_v17 = vand.u32 4294901760, %v10661_v40  ;;  %v14496_v28 = vand.u32 4294901760, %v10670_v60  ;;  %9175 = vmatprep.subr.bf16.mxu1 %v14423_v51 }
  0x5b   : > { %v10934_v43 = vpack.c.bf16 %v14491_v4, %v14490_v37  ;;  %v14497_v14 = vand.u32 4294901760, %v10672_v61  ;;  %v14498_v20 = vand.u32 4294901760, %v10677_v34  ;;  %v14499_v23 = vand.u32 4294901760, %v10689_v56 }
  0x5c   : > { %14489 = vst [vmem:[#allocation38_spill] sm:$0xff] %v10927_v54  ;;  %v10940_v42 = vpack.c.bf16 %v14494_v17, %v14493_v29  ;;  %v1187_v37 = vand.u32 4294901760, %v1186_v39  ;;  %v14500_v4 = vand.u32 4294901760, %v10720_v2  ;;  %v14502_v17 = vand.u32 4294901760, %v10745_v5 }
  0x5d   : > { %14492 = vst [vmem:[#allocation39_spill] sm:$0xff] %v10934_v43  ;;  %v10946_v30 = vpack.c.bf16 %v14497_v14, %v14496_v28  ;;  %v10952_v54 = vpack.c.bf16 %v14499_v23, %v14498_v20  ;;  %v14501_v43 = vand.u32 4294901760, %v10738_v10  ;;  %v10964_v28 = vpack.c.bf16 %v1185_v8, %v1178_v41 }
  0x5e   : > { %14495 = vst [vmem:[#allocation40_spill] sm:$0xff] %v10940_v42  ;;  %v10962_v42 = vpack.c.bf16 %v480_v7, %v14502_v17  ;;  %v9032_v14 = vpack.c.bf16 %v482_v15, %v475_v0  ;;  %v9176_v36 = vpack.c.bf16 %v1187_v37, %v1180_v26  ;;  %v9035_v39 = vpack.c.bf16 %v10340_v19, %v10338_v18  ;;  %v14543_v17 = vld [vmem:[#allocation12_spill] sm:$0xff] }
  0x5f   : > { %v10958_v29 = vpack.c.bf16 %v14501_v43, %v14500_v4  ;;  %v9179_v7 = vpack.c.bf16 %v10348_v22, %v10346_v21  ;;  %v9038_v41 = vpack.c.bf16 %v10438_v46, %v10436_v45  ;;  %v14503_v8 = vmov 0.0  }
  0x60   : > { %9033 = vmatpush3.bf16.msra.mxu0 %v9032_v14  ;;  %9177 = vmatpush3.bf16.msra.mxu1 %v9176_v36  ;;  %v9182_v18 = vpack.c.bf16 %v10442_v48, %v10440_v47  ;;  %v9041_v19 = vpack.c.bf16 %v10529_v32, %v10511_v11  ;;  %v9185_v21 = vpack.c.bf16 %v10541_v57, %v10531_v33  ;;  %v14539_v20 = vmov 0  ;;  %v14558_v11 = vld [vmem:[#allocation17_spill] sm:$0xff]  ;;  %v14559_v32 = vld [vmem:[#allocation18_spill] sm:$0xff] }
  0x61   : > { %9034 = vmatprep.subr.bf16.mxu0 %v14423_v51  ;;  %9178 = vmatprep.subr.bf16.mxu1 %v14423_v51  ;;  %v9044_v22 = vpack.c.bf16 %v10554_v25, %v10543_v27  ;;  %v9188_v45 = vpack.c.bf16 %v10558_v12, %v10556_v24  ;;  %v9047_v46 = vpack.c.bf16 %v10568_v62, %v10566_v13  ;;  %v14516_v12 = vld [vmem:[#allocation26_spill] sm:$0xff]  ;;  %v14518_v13 = vld [vmem:[#allocation27_spill] sm:$0xff] }
  0x62   : > { %v9191_v47 = vpack.c.bf16 %v10653_v1, %v10651_v52  ;;  %v9050_v25 = vpack.c.bf16 %v10661_v40, %v10659_v44  ;;  %v9194_v24 = vpack.c.bf16 %v10672_v61, %v10670_v60  ;;  %v9053_v27 = vpack.c.bf16 %v10689_v56, %v10677_v34  ;;  %v14523_v56 = vld [vmem:[#allocation34_spill] sm:$0xff]  ;;  %v14563_v34 = vld [vmem:[#allocation20_spill] sm:$0xff] }
  0x63   : > { %7374 = vmatmul.mubr.f32.vlgmr.msra.gmra.mrb[0].mxu0 %v10302_v6  ;;  %7584 = vmatmul.mubr.f32.vlgmr.msra.gmra.mrb[0].mxu1 %v14504_v9  ;;  %v9197_v1 = vpack.c.bf16 %v10738_v10, %v10720_v2  ;;  %v9056_v40 = vpack.c.bf16 %v10825_v35, %v10745_v5  ;;  %v9200_v44 = vpack.c.bf16 %v10833_v49, %v10827_v3  ;;  %v14505_v2 = vld [vmem:[#allocation13_spill] sm:$0xff]  ;;  %v14506_v10 = vmov 1.0|1.0   ;;  %v14508_v5 = vld [vmem:[#allocation22_spill] sm:$0xff] }
  0x64   : > { %9036 = vmatpush3.bf16.msra.mxu0 %v9035_v39  ;;  %7408 = vmatprep.mubr.msk.f32.mxu0 %vm14453_vm1, %v14503_v8  ;;  %vm14517_vm7 = vnez %v14516_v12  ;;  %vm14519_vm13 = vnez %v14518_v13  ;;  %v14527_v0 = vand.u32 4294901760, %v14505_v2  ;;  %v14528_v38 = vand.u32 4294901760, %v14508_v5  ;;  %v14529_v15 = vld [vmem:[#allocation38_spill] sm:$0xff]  ;;  %v14530_v26 = vld [vmem:[#allocation39_spill] sm:$0xff]  ;;  %v6103_v12 = vld [vmem:[%s14055_s2 + $0x10] sm:$0xff] }
  0x65   : > { %9037 = vmatprep.subr.bf16.mxu0 %v14423_v51  ;;  %9180 = vmatpush3.bf16.msra.mxu1 %v9179_v7  ;;  %v14555_v3 = vmov 0  ;;  %v6170_v49 = vld [vmem:[%s14055_s2 + $0x18] sm:$0xff] }
  0x66   : > { %7618 = vmatprep.mubr.msk.f32.mxu1 %vm14453_vm1, %v14503_v8  ;;  %9181 = vmatprep.subr.bf16.mxu1 %v14423_v51 }
  0x68   : > { %9039 = vmatpush3.bf16.msra.mxu0 %v9038_v41 }
  0x69   : > { %9040 = vmatprep.subr.bf16.mxu0 %v14423_v51  ;;  %9183 = vmatpush3.bf16.msra.mxu1 %v9182_v18 }
  0x6a   : > { %9184 = vmatprep.subr.bf16.mxu1 %v14423_v51 }
  0x6c   : > { %9042 = vmatpush3.bf16.msra.mxu0 %v9041_v19 }
  0x6d   : > { %9043 = vmatprep.subr.bf16.mxu0 %v14423_v51  ;;  %9186 = vmatpush3.bf16.msra.mxu1 %v9185_v21 }
  0x6e   : > { %9187 = vmatprep.subr.bf16.mxu1 %v14423_v51 }
  0x70   : > { %9045 = vmatpush3.bf16.msra.mxu0 %v9044_v22 }
  0x71   : > { %9046 = vmatprep.subr.bf16.mxu0 %v14423_v51  ;;  %9189 = vmatpush3.bf16.msra.mxu1 %v9188_v45  ;;  %v14547_v45 = vmov 0 }
  0x72   : > { %9190 = vmatprep.subr.bf16.mxu1 %v14423_v51 }
  0x74   : > { %9048 = vmatpush3.bf16.msra.mxu0 %v9047_v46 }
  0x75   : > { %9049 = vmatprep.subr.bf16.mxu0 %v14423_v51  ;;  %9192 = vmatpush3.bf16.msra.mxu1 %v9191_v47 }
  0x76   : > { %9193 = vmatprep.subr.bf16.mxu1 %v14423_v51 }
  0x78   : > { %9051 = vmatpush3.bf16.msra.mxu0 %v9050_v25 }
  0x79   : > { %9052 = vmatprep.subr.bf16.mxu0 %v14423_v51  ;;  %9195 = vmatpush3.bf16.msra.mxu1 %v9194_v24 }
  0x7a   : > { %9196 = vmatprep.subr.bf16.mxu1 %v14423_v51 }
  0x7c   : > { %9054 = vmatpush3.bf16.msra.mxu0 %v9053_v27  ;;  %v14550_v27 = vmov 0 }
  0x7d   : > { %9055 = vmatprep.subr.bf16.mxu0 %v14423_v51  ;;  %9198 = vmatpush3.bf16.msra.mxu1 %v9197_v1 }
  0x7e   : > { %9199 = vmatprep.subr.bf16.mxu1 %v14423_v51 }
  0x80   : > { %9057 = vmatpush3.bf16.msra.mxu0 %v9056_v40 }
  0x81   : > { %9058 = vmatprep.subr.bf16.mxu0 %v14423_v51  ;;  %9201 = vmatpush3.bf16.msra.mxu1 %v9200_v44  ;;  %v14553_v44 = vld [vmem:[#allocation15_spill] sm:$0xff] }
  0x82   : > { %9202 = vmatprep.subr.bf16.mxu1 %v14423_v51 }
  0x83   : > { %7409 = vmatmul.mubr.f32.vlgmr.msra.gmra.mrb[0].mxu0 %v14505_v2  ;;  %v14554_v2 = vld [vmem:[#allocation16_spill] sm:$0xff] }
  0x84   : > { %9060 = vmatpush3.bf16.msk.msra.mxu0 %vm10329_vm5, %v14506_v10  ;;  %7443 = vmatprep.mubr.msk.f32.mxu0 %vm14453_vm1, %v14503_v8 }
  0x85   : > { %7619 = vmatmul.mubr.f32.vlgmr.msra.gmra.mrb[0].mxu1 %v14508_v5  ;;  %9061 = vmatprep.subr.bf16.mxu0 %v14423_v51 }
  0x86   : > { %9204 = vmatpush3.bf16.msk.msra.mxu1 %vm10342_vm6, %v14506_v10  ;;  %7653 = vmatprep.mubr.msk.f32.mxu1 %vm14453_vm1, %v14503_v8 }
  0x87   : > { %9205 = vmatprep.subr.bf16.mxu1 %v14423_v51 }
  0x88   : > { %9063 = vmatpush3.bf16.msk.msra.mxu0 %vm10367_vm10, %v14506_v10 }
  0x89   : > { %9064 = vmatprep.subr.bf16.mxu0 %v14423_v51 }
  0x8a   : > { %9207 = vmatpush3.bf16.msk.msra.mxu1 %vm10394_vm12, %v14506_v10 }
  0x8b   : > { %9208 = vmatprep.subr.bf16.mxu1 %v14423_v51 }
  0x8c   : > { %9066 = vmatpush3.bf16.msk.msra.mxu0 %vm10456_vm2, %v14506_v10 }
  0x8d   : > { %9067 = vmatprep.subr.bf16.mxu0 %v14423_v51 }
  0x8e   : > { %9210 = vmatpush3.bf16.msk.msra.mxu1 %vm10482_vm3, %v14506_v10 }
  0x8f   : > { %9211 = vmatprep.subr.bf16.mxu1 %v14423_v51 }
  0x90   : > { %9069 = vmatpush3.bf16.msk.msra.mxu0 %vm10507_vm8, %v14506_v10 }
  0x91   : > { %9070 = vmatprep.subr.bf16.mxu0 %v14423_v51 }
  0x92   : > { %9213 = vmatpush3.bf16.msk.msra.mxu1 %vm10534_vm14, %v14506_v10 }
  0x93   : > { %9214 = vmatprep.subr.bf16.mxu1 %v14423_v51 }
  0x94   : > { %9072 = vmatpush3.bf16.msk.msra.mxu0 %vm14517_vm7, %v14506_v10 }
  0x95   : > { %9073 = vmatprep.subr.bf16.mxu0 %v14423_v51 }
  0x96   : > { %9216 = vmatpush3.bf16.msk.msra.mxu1 %vm14519_vm13, %v14506_v10  ;;  %vm14524_vm13 = vnez %v14523_v56  ;;  %v14564_v56 = vld [vmem:[#allocation21_spill] sm:$0xff] }
  0x97   : > { %9217 = vmatprep.subr.bf16.mxu1 %v14423_v51 }
  0x98   : > { %9075 = vmatpush3.bf16.msk.msra.mxu0 %vm10607_vm0, %v14506_v10 }
  0x99   : > { %9076 = vmatprep.subr.bf16.mxu0 %v14423_v51 }
  0x9a   : > { %9219 = vmatpush3.bf16.msk.msra.mxu1 %vm10626_vm9, %v14506_v10 }
  0x9b   : > { %9220 = vmatprep.subr.bf16.mxu1 %v14423_v51 }
  0x9c   : > { %9078 = vmatpush3.bf16.msk.msra.mxu0 %vm10664_vm11, %v14506_v10 }
  0x9d   : > { %9079 = vmatprep.subr.bf16.mxu0 %v14423_v51 }
  0x9e   : > { %9222 = vmatpush3.bf16.msk.msra.mxu1 %vm14524_vm13, %v14506_v10 }
  0x9f   : > { %9223 = vmatprep.subr.bf16.mxu1 %v14423_v51 }
  0xa0   : > { %9081 = vmatpush3.bf16.msk.msra.mxu0 %vm10712_vm15, %v14506_v10 }
  0xa1   : > { %9082 = vmatprep.subr.bf16.mxu0 %v14423_v51 }
  0xa2   : > { %9225 = vmatpush3.bf16.msk.msra.mxu1 %vm10731_vm4, %v14506_v10 }
  0xa3   : > { %9226 = vmatprep.subr.bf16.mxu1 %v14423_v51  ;;  %7444 = vmatmul.mubr.f32.vlgmr.msra.gmra.mrb[0].mxu0 %v14527_v0 }
  0xa4   : > { %9084 = vmatpush3.bf16.msra.mxu0 %v10878_v59  ;;  %7478 = vmatprep.mubr.msk.f32.mxu0 %vm14453_vm1, %v14503_v8  ;;  %v14531_v59 = vld [vmem:[#allocation40_spill] sm:$0xff] }
  0xa5   : > { %7654 = vmatmul.mubr.f32.vlgmr.msra.gmra.mrb[0].mxu1 %v14528_v38  ;;  %9085 = vmatprep.subr.bf16.mxu0 %v14423_v51 }
  0xa6   : > { %9228 = vmatpush3.bf16.msra.mxu1 %v10885_v16  ;;  %7688 = vmatprep.mubr.msk.f32.mxu1 %vm14453_vm1, %v14503_v8  ;;  %v11190_v16 = vld [vmem:[%s10300_s23 + $0x2] ss:$0 sm:$0xff] }
  0xa7   : > { %9229 = vmatprep.subr.bf16.mxu1 %v14423_v51 }
  0xa8   : > { %9087 = vmatpush3.bf16.msra.mxu0 %v10891_v53  ;;  %v11197_v53 = vld [vmem:[%s10300_s23 + $0x3] ss:$0 sm:$0xff] }
  0xa9   : > { %9088 = vmatprep.subr.bf16.mxu0 %v14423_v51 }
  0xaa   : > { %9231 = vmatpush3.bf16.msra.mxu1 %v10897_v58  ;;  %v14533_v58 = vld [vmem:[#allocation3_spill] sm:$0xff] }
  0xab   : > { %9232 = vmatprep.subr.bf16.mxu1 %v14423_v51 }
  0xac   : > { %9090 = vmatpush3.bf16.msra.mxu0 %v10903_v63  ;;  %v14534_v63 = vld [vmem:[#allocation4_spill] sm:$0xff] }
  0xad   : > { %9091 = vmatprep.subr.bf16.mxu0 %v14423_v51 }
  0xae   : > { %9234 = vmatpush3.bf16.msra.mxu1 %v10909_v55 }
  0xaf   : > { %9235 = vmatprep.subr.bf16.mxu1 %v14423_v51 }
  0xb0   : > { %9093 = vmatpush3.bf16.msra.mxu0 %v10915_v50 }
  0xb1   : > { %9094 = vmatprep.subr.bf16.mxu0 %v14423_v51 }
  0xb2   : > { %9237 = vmatpush3.bf16.msra.mxu1 %v10921_v31  ;;  %v12111_v31 = vld [vmem:[%s10300_s23 + $0x4] ss:$0 sm:$0xff] }
  0xb3   : > { %9238 = vmatprep.subr.bf16.mxu1 %v14423_v51 }
  0xb4   : > { %9096 = vmatpush3.bf16.msra.mxu0 %v14529_v15 }
  0xb5   : > { %9097 = vmatprep.subr.bf16.mxu0 %v14423_v51 }
  0xb6   : > { %9240 = vmatpush3.bf16.msra.mxu1 %v14530_v26  ;;  %v14565_v26 = vmov 0 }
  0xb7   : > { %9241 = vmatprep.subr.bf16.mxu1 %v14423_v51 }
  0xb8   : > { %9099 = vmatpush3.bf16.msra.mxu0 %v14531_v59 }
  0xb9   : > { %9100 = vmatprep.subr.bf16.mxu0 %v14423_v51 }
  0xba   : > { %9243 = vmatpush3.bf16.msra.mxu1 %v10946_v30  ;;  %v14538_v30 = vld [vmem:[#allocation6_spill] sm:$0xff] }
  0xbb   : > { %9244 = vmatprep.subr.bf16.mxu1 %v14423_v51 }
  0xbc   : > { %9102 = vmatpush3.bf16.msra.mxu0 %v10952_v54 }
  0xbd   : > { %9103 = vmatprep.subr.bf16.mxu0 %v14423_v51 }
  0xbe   : > { %9246 = vmatpush3.bf16.msra.mxu1 %v10958_v29  ;;  %v14542_v29 = vld [vmem:[#allocation11_spill] sm:$0xff] }
  0xbf   : > { %9247 = vmatprep.subr.bf16.mxu1 %v14423_v51 }
  0xc0   : > { %9105 = vmatpush3.bf16.msra.mxu0 %v10962_v42  ;;  %v14537_v42 = vld [vmem:[#allocation5_spill] sm:$0xff] }
  0xc1   : > { %9106 = vmatprep.subr.bf16.mxu0 %v14423_v51 }
  0xc2   : > { %9249 = vmatpush3.bf16.msra.mxu1 %v10964_v28  ;;  %v14544_v28 = vmov 0 }
  0xc3   : > { %9250 = vmatprep.subr.bf16.mxu1 %v14423_v51  ;;  %7479 = vmatmul.mubr.f32.vlgmr.msra.gmra.mrb[0].mxu0 %v10302_v6 }
  0xc4   : > { %9108 = vmatpush3.bf16.msk.msra.mxu0 %vm10329_vm5, %v14506_v10  ;;  %7513 = vmatprep.mubr.msk.f32.mxu0 %vm14453_vm1, %v14503_v8  ;;  %vm14532_vm5 = vnez %v14518_v13  ;;  %v14560_v13 = vmov 0 }
  0xc5   : > { %7689 = vmatmul.mubr.f32.vlgmr.msra.gmra.mrb[0].mxu1 %v14504_v9  ;;  %9109 = vmatprep.subr.bf16.mxu0 %v14423_v51 }
  0xc6   : > { %9252 = vmatpush3.bf16.msk.msra.mxu1 %vm10342_vm6, %v14506_v10  ;;  %7723 = vmatprep.mubr.msk.f32.mxu1 %vm14453_vm1, %v14503_v8  ;;  %vm1642_vm6 = vcmp.eq.s32.totalorder %v14534_v63, %v11190_v16 }
  0xc7   : > { %9253 = vmatprep.subr.bf16.mxu1 %v14423_v51  ;;  %v6088_v50 = vsel %vm1642_vm6, 1.0, %v14503_v8 }
  0xc8   : > { %9111 = vmatpush3.bf16.msk.msra.mxu0 %vm10367_vm10, %v14506_v10  ;;  %vm2346_vm10 = vcmp.eq.s32.totalorder %v14533_v58, %v11197_v53  ;;  %v11291_v7 = vsub.f32 %v6088_v50, %v6088_v50 }
  0xc9   : > { %9112 = vmatprep.subr.bf16.mxu0 %v14423_v51  ;;  %v6154_v54 = vsel %vm2346_vm10, 1.0, %v14503_v8 }
  0xca   : > { %9255 = vmatpush3.bf16.msk.msra.mxu1 %vm10394_vm12, %v14506_v10  ;;  %vm2347_vm12 = vcmp.eq.s32.totalorder %v14534_v63, %v11197_v53  ;;  %v11306_v18 = vsub.f32 %v6154_v54, %v6154_v54  ;;  %v11469_v54 = vand.u32 4294901760, %v6103_v12 }
  0xcb   : > { %9256 = vmatprep.subr.bf16.mxu1 %v14423_v51  ;;  %v6155_v43 = vsel %vm2347_vm12, 1.0, %v14503_v8 }
  0xcc   : > { %9114 = vmatpush3.bf16.msk.msra.mxu0 %vm10456_vm2, %v14506_v10  ;;  %v11308_v19 = vsub.f32 %v6155_v43, %v6155_v43 }
  0xcd   : > { %9115 = vmatprep.subr.bf16.mxu0 %v14423_v51 }
  0xce   : > { %9258 = vmatpush3.bf16.msk.msra.mxu1 %vm10482_vm3, %v14506_v10  ;;  %vm1643_vm3 = vcmp.eq.s32.totalorder %v14537_v42, %v11190_v16 }
  0xcf   : > { %9259 = vmatprep.subr.bf16.mxu1 %v14423_v51  ;;  %v6089_v23 = vsel %vm1643_vm3, 1.0, %v14503_v8 }
  0xd0   : > { %9117 = vmatpush3.bf16.msk.msra.mxu0 %vm10507_vm8, %v14506_v10  ;;  %vm1644_vm8 = vcmp.eq.s32.totalorder %v14538_v30, %v11190_v16  ;;  %v11311_v21 = vsub.f32 %v6089_v23, %v6089_v23 }
  0xd1   : > { %9118 = vmatprep.subr.bf16.mxu0 %v14423_v51  ;;  %v6090_v37 = vsel %vm1644_vm8, 1.0, %v14503_v8 }
  0xd2   : > { %9261 = vmatpush3.bf16.msk.msra.mxu1 %vm10534_vm14, %v14506_v10  ;;  %vm11232_vm14 = vmpackc.low %vm2347_vm12, %vm2346_vm10  ;;  %v11313_v22 = vsub.f32 %v6090_v37, %v6090_v37  ;;  %vm1647_vm10 = vcmp.eq.s32.totalorder %v14553_v44, %v11190_v16  ;;  %vm1648_vm12 = vcmp.eq.s32.totalorder %v14554_v2, %v11190_v16 }
  0xd3   : > { %9262 = vmatprep.subr.bf16.mxu1 %v14423_v51  ;;  %v14540_v20 = vsel %vm11232_vm14, 4294967295, %v14539_v20  ;;  %v6093_v48 = vsel %vm1647_vm10, 1.0, %v14503_v8  ;;  %v6094_v5 = vsel %vm1648_vm12, 1.0, %v14503_v8 }
  0xd4   : > { %9120 = vmatpush3.bf16.msk.msra.mxu0 %vm14517_vm7, %v14506_v10  ;;  %14541 = vst [vmem:[#allocation9_spill] sm:$0xff] %v14540_v20  ;;  %vm11273_vm7 = vmpackc.low %vm1644_vm8, %vm1643_vm3  ;;  %vm2352_vm3 = vcmp.eq.s32.totalorder %v14553_v44, %v11197_v53  ;;  %vm2353_vm8 = vcmp.eq.s32.totalorder %v14554_v2, %v11197_v53  ;;  %v11440_v35 = vsub.f32 %v6093_v48, %v6093_v48  ;;  %v14573_v48 = vld [vmem:[#allocation28_spill] sm:$0xff] }
  0xd5   : > { %9121 = vmatprep.subr.bf16.mxu0 %v14423_v51  ;;  %v14545_v28 = vsel %vm11273_vm7, 4294967295, %v14544_v28  ;;  %v6160_v52 = vsel %vm2352_vm3, 1.0, %v14503_v8  ;;  %v6161_v62 = vsel %vm2353_vm8, 1.0, %v14503_v8  ;;  %v11442_v0 = vsub.f32 %v6094_v5, %v6094_v5 }
  0xd6   : > { %9264 = vmatpush3.bf16.msk.msra.mxu1 %vm14532_vm5, %v14506_v10  ;;  %14546 = vst [vmem:[#allocation13_spill] sm:$0xff] %v14545_v28  ;;  %vm2351_vm5 = vcmp.eq.s32.totalorder %v14543_v17, %v11197_v53  ;;  %v11463_v59 = vsub.f32 %v6160_v52, %v6160_v52  ;;  %v14574_v52 = vmov 0  ;;  %v14586_v5 = vmov 0 }
  0xd7   : > { %9265 = vmatprep.subr.bf16.mxu1 %v14423_v51  ;;  %v14624_v28 = vand.u32 4294901760, %v11442_v0 }
  0xd8   : > { %9123 = vmatpush3.bf16.msk.msra.mxu0 %vm10607_vm0, %v14506_v10  ;;  %vm1641_vm0 = vcmp.eq.s32.totalorder %v14533_v58, %v11190_v16 }
  0xd9   : > { %9124 = vmatprep.subr.bf16.mxu0 %v14423_v51  ;;  %v6087_v55 = vsel %vm1641_vm0, 1.0, %v14503_v8  ;;  %vm11217_vm2 = vmpackc.low %vm1642_vm6, %vm1641_vm0 }
  0xda   : > { %9267 = vmatpush3.bf16.msk.msra.mxu1 %vm10626_vm9, %v14506_v10  ;;  %vm2348_vm9 = vcmp.eq.s32.totalorder %v14537_v42, %v11197_v53  ;;  %v11289_v39 = vsub.f32 %v6087_v55, %v6087_v55  ;;  %v11465_v55 = vsub.f32 %v6161_v62, %v6161_v62  ;;  %v14577_v62 = vld [vmem:[#allocation31_spill] sm:$0xff] }
  0xdb   : > { %9268 = vmatprep.subr.bf16.mxu1 %v14423_v51 }
  0xdc   : > { %9126 = vmatpush3.bf16.msk.msra.mxu0 %vm10664_vm11, %v14506_v10  ;;  %vm2349_vm11 = vcmp.eq.s32.totalorder %v14538_v30, %v11197_v53  ;;  %v14583_v44 = vand.u32 4294901760, %v11289_v39  ;;  %v14597_v30 = vld [vmem:[#allocation35_spill] sm:$0xff] }
  0xdd   : > { %9127 = vmatprep.subr.bf16.mxu0 %v14423_v51  ;;  %v6157_v4 = vsel %vm2349_vm11, 1.0, %v14503_v8  ;;  %vm11321_vm0 = vmpackc.low %vm2349_vm11, %vm2348_vm9  ;;  %vm14152_vm11 = vcmp.eq.s32.totalorder %v14558_v11, %v11190_v16 }
  0xde   : > { %9270 = vmatpush3.bf16.msk.msra.mxu1 %vm14524_vm13, %v14506_v10  ;;  %vm2350_vm13 = vcmp.eq.s32.totalorder %v14542_v29, %v11197_v53  ;;  %v14548_v45 = vsel %vm11321_vm0, 4294967295, %v14547_v45  ;;  %v11330_v47 = vsub.f32 %v6157_v4, %v6157_v4  ;;  %v6095_v33 = vsel %vm14152_vm11, 1.0, %v14503_v8 }
  0xdf   : > { %9271 = vmatprep.subr.bf16.mxu1 %v14423_v51  ;;  %v6158_v41 = vsel %vm2350_vm13, 1.0, %v14503_v8  ;;  %14549 = vst [vmem:[#allocation7_spill] sm:$0xff] %v14548_v45  ;;  %vm14153_vm11 = vcmp.eq.s32.totalorder %v14564_v56, %v11190_v16  ;;  %v11467_v50 = vsub.f32 %v6095_v33, %v6095_v33  ;;  %v14570_v4 = vmov 0 }
  0xe0   : > { %9129 = vmatpush3.bf16.msk.msra.mxu0 %vm10712_vm15, %v14506_v10  ;;  %vm1645_vm15 = vcmp.eq.s32.totalorder %v14542_v29, %v11190_v16  ;;  %v11347_v1 = vsub.f32 %v6158_v41, %v6158_v41  ;;  %v6098_v15 = vsel %vm14153_vm11, 1.0, %v14503_v8  ;;  %vm14157_vm11 = vcmp.eq.s32.totalorder %v14563_v34, %v11197_v53 }
  0xe1   : > { %9274 = vmatprep.subr.bf16.mxu0 %v14423_v51  ;;  %v6091_v14 = vsel %vm1645_vm15, 1.0, %v14503_v8  ;;  %v6164_v41 = vsel %vm14157_vm11, 1.0, %v14503_v8  ;;  %vm14579_vm11 = vcmp.eq.s32.totalorder %v14564_v56, %v11190_v16 }
  0xe2   : > { %9273 = vmatpush3.bf16.msk.msra.mxu1 %vm10731_vm4, %v14506_v10  ;;  %vm1646_vm4 = vcmp.eq.s32.totalorder %v14543_v17, %v11190_v16  ;;  %v11332_v25 = vsub.f32 %v6091_v14, %v6091_v14  ;;  %v1786_v17 = vsub.f32 %v11289_v39, %v14583_v44 }
  0xe3   : > { %7514 = vmatmul.mubr.f32.vlgmr.msra.gmra.mrb[0].mxu0 %v10302_v6  ;;  %9418 = vmatprep.subr.bf16.mxu1 %v14423_v51  ;;  %v6156_v6 = vsel %vm2348_vm9, 1.0, %v14503_v8  ;;  %v6092_v36 = vsel %vm1646_vm4, 1.0, %v14503_v8  ;;  %vm11343_vm6 = vmpackc.low %vm1646_vm4, %vm1645_vm15  ;;  %vm14151_vm15 = vcmp.eq.s32.totalorder %v14559_v32, %v11190_v16  ;;  %vm2354_vm4 = vcmp.eq.s32.totalorder %v14558_v11, %v11197_v53 }
  0xe4   : > { %9276 = vmatpush3.bf16.msk.msra.mxu0 %vm11217_vm2, %v14506_v10  ;;  %7758 = vmatprep.mubr.msk.f32.mxu0 %vm14453_vm1, %v14503_v8  ;;  %v11328_v46 = vsub.f32 %v6156_v6, %v6156_v6  ;;  %v11334_v24 = vsub.f32 %v6092_v36, %v6092_v36  ;;  %v14551_v27 = vsel %vm11343_vm6, 4294967295, %v14550_v27  ;;  %vm11377_vm9 = vmpackc.low %vm2351_vm5, %vm2350_vm13  ;;  %v6096_v57 = vsel %vm14151_vm15, 1.0, %v14503_v8 }
  0xe5   : > { %7724 = vmatmul.mubr.f32.vlgmr.msra.gmra.mrb[0].mxu1 %v14504_v9  ;;  %9277 = vmatprep.subr.bf16.mxu0 %v14423_v51  ;;  %v6159_v9 = vsel %vm2351_vm5, 1.0, %v14503_v8  ;;  %14552 = vst [vmem:[#allocation22_spill] sm:$0xff] %v14551_v27  ;;  %v14556_v3 = vsel %vm11377_vm9, 4294967295, %v14555_v3  ;;  %vm2355_vm13 = vcmp.eq.s32.totalorder %v14559_v32, %v11197_v53  ;;  %vm11418_vm5 = vmpackc.low %vm1648_vm12, %vm1647_vm10  ;;  %v6162_v60 = vsel %vm2354_vm4, 1.0, %v14503_v8 }
  0xe6   : > { %9420 = vmatpush3.bf16.msk.msra.mxu1 %vm11232_vm14, %v14506_v10  ;;  %7968 = vmatprep.mubr.msk.f32.mxu1 %vm14453_vm1, %v14503_v8  ;;  %v11349_v40 = vsub.f32 %v6159_v9, %v6159_v9  ;;  %14557 = vst [vmem:[#allocation8_spill] sm:$0xff] %v14556_v3  ;;  %v14561_v13 = vsel %vm11418_vm5, 4294967295, %v14560_v13  ;;  %v6163_v61 = vsel %vm2355_vm13, 1.0, %v14503_v8  ;;  %vm14154_vm15 = vcmp.eq.s32.totalorder %v14563_v34, %v11190_v16  ;;  %vm11459_vm10 = vmpackc.low %vm2353_vm8, %vm2352_vm3 }
  0xe7   : > { %9421 = vmatprep.subr.bf16.mxu1 %v14423_v51  ;;  %14562 = vst [vmem:[#allocation10_spill] sm:$0xff] %v14561_v13  ;;  %v6097_v38 = vsel %vm14154_vm15, 1.0, %v14503_v8  ;;  %v14566_v26 = vsel %vm11459_vm10, 4294967295, %v14565_v26  ;;  %v11474_v43 = vsub.f32 %v6096_v57, %v6096_v57  ;;  %v11476_v23 = vsub.f32 %v6162_v60, %v6162_v60 }
  0xe8   : > { %9279 = vmatpush3.bf16.msk.msra.mxu0 %vm11273_vm7, %v14506_v10  ;;  %14567 = vst [vmem:[#allocation14_spill] sm:$0xff] %v14566_v26  ;;  %v11478_v37 = vsub.f32 %v6163_v61, %v6163_v61  ;;  %v11480_v6 = vand.u32 4294901760, %v6170_v49  ;;  %vm14568_vm12 = vcmp.eq.s32.totalorder %v14558_v11, %v11190_v16  ;;  %vm14569_vm3 = vcmp.eq.s32.totalorder %v14559_v32, %v11190_v16 }
  0xe9   : > { %9280 = vmatprep.subr.bf16.mxu0 %v14423_v51  ;;  %vm11489_vm8 = vmpackc.low %vm14569_vm3, %vm14568_vm12  ;;  %v11493_v14 = vsub.f32 %v6097_v38, %v6097_v38  ;;  %v11495_v36 = vsub.f32 %v6098_v15, %v6098_v15  ;;  %vm14155_vm15 = vcmp.eq.s32.totalorder %v14564_v56, %v11197_v53  ;;  %vm14156_vm12 = vcmp.eq.s32.totalorder %v14573_v48, %v11190_v16 }
  0xea   : > { %9423 = vmatpush3.bf16.msk.msra.mxu1 %vm11321_vm0, %v14506_v10  ;;  %v14571_v4 = vsel %vm11489_vm8, 4294967295, %v14570_v4  ;;  %v6165_v9 = vsel %vm14155_vm15, 1.0, %v14503_v8  ;;  %vm11522_vm3 = vmpackc.low %vm2355_vm13, %vm2354_vm4  ;;  %vm1654_vm15 = vcmp.eq.s32.totalorder %v14577_v62, %v11190_v16  ;;  %v6099_v33 = vsel %vm14156_vm12, 1.0, %v14503_v8 }
  0xeb   : > { %9424 = vmatprep.subr.bf16.mxu1 %v14423_v51  ;;  %14572 = vst [vmem:[#allocation19_spill] sm:$0xff] %v14571_v4  ;;  %v14575_v52 = vsel %vm11522_vm3, 4294967295, %v14574_v52  ;;  %v11533_v57 = vsub.f32 %v6103_v12, %v11469_v54  ;;  %v6100_v61 = vsel %vm1654_vm15, 1.0, %v14503_v8  ;;  %vm14169_vm4 = vcmp.eq.s32.totalorder %v14573_v48, %v11197_v53 }
  0xec   : > { %9282 = vmatpush3.bf16.msk.msra.mxu0 %vm11343_vm6, %v14506_v10  ;;  %14576 = vst [vmem:[#allocation23_spill] sm:$0xff] %v14575_v52  ;;  %vm14165_vm13 = vcmp.eq.s32.totalorder %v14577_v62, %v11197_v53  ;;  %v11548_v12 = vsub.f32 %v6170_v49, %v11480_v6  ;;  %vm14578_vm12 = vcmp.eq.s32.totalorder %v14563_v34, %v11190_v16  ;;  %v14580_v38 = vmov 0 }
  0xed   : > { %9283 = vmatprep.subr.bf16.mxu0 %v14423_v51  ;;  %v6166_v15 = vsel %vm14169_vm4, 1.0, %v14503_v8  ;;  %v6167_v49 = vsel %vm14165_vm13, 1.0, %v14503_v8  ;;  %v11574_v32 = vsub.f32 %v6164_v41, %v6164_v41  ;;  %v11576_v11 = vsub.f32 %v6165_v9, %v6165_v9 }
  0xee   : > { %9426 = vmatpush3.bf16.msk.msra.mxu1 %vm11377_vm9, %v14506_v10  ;;  %v11578_v2 = vsub.f32 %v6099_v33, %v6099_v33  ;;  %v14589_v9 = vand.u32 4294901760, %v11291_v7  ;;  %v11607_v29 = vsub.f32 %v6167_v49, %v6167_v49  ;;  %v14596_v41 = vand.u32 4294901760, %v11308_v19 }
  0xef   : > { %9427 = vmatprep.subr.bf16.mxu1 %v14423_v51  ;;  %v1787_v42 = vand.u32 4294901760, %v1786_v17  ;;  %vm14598_vm4 = vcmp.eq.s32.totalorder %v14573_v48, %v11197_v53  ;;  %v14604_v17 = vand.u32 4294901760, %v11311_v21  ;;  %v14620_v3 = vand.u32 4294901760, %v11334_v24 }
  0xf0   : > { %9285 = vmatpush3.bf16.msk.msra.mxu0 %vm11418_vm5, %v14506_v10  ;;  %v1793_v33 = vsub.f32 %v11291_v7, %v14589_v9  ;;  %v14591_v9 = vmov 0  ;;  %v2498_v60 = vsub.f32 %v11308_v19, %v14596_v41  ;;  %v14600_v41 = vmov 0 }
  0xf1   : > { %9286 = vmatprep.subr.bf16.mxu0 %v14423_v51  ;;  %v1800_v63 = vsub.f32 %v11311_v21, %v14604_v17  ;;  %v1821_v27 = vsub.f32 %v11334_v24, %v14620_v3  ;;  %v14622_v3 = vand.u32 4294901760, %v11349_v40 }
  0xf2   : > { %9429 = vmatpush3.bf16.msk.msra.mxu1 %vm11459_vm10, %v14506_v10  ;;  %v1794_v58 = vand.u32 4294901760, %v1793_v33 }
  0xf3   : > { %9430 = vmatprep.subr.bf16.mxu1 %v14423_v51  ;;  %v1801_v26 = vand.u32 4294901760, %v1800_v63  ;;  %v2526_v45 = vsub.f32 %v11349_v40, %v14622_v3 }
  0xf4   : > { %9288 = vmatpush3.bf16.msk.msra.mxu0 %vm11489_vm8, %v14506_v10  ;;  %vm11557_vm8 = vmpackc.low %vm14579_vm11, %vm14578_vm12  ;;  %vm14584_vm11 = vcmp.eq.s32.totalorder %v14563_v34, %v11197_v53  ;;  %vm14585_vm12 = vcmp.eq.s32.totalorder %v14564_v56, %v11197_v53  ;;  %v11603_v34 = vsub.f32 %v6100_v61, %v6100_v61  ;;  %v11605_v56 = vsub.f32 %v6166_v15, %v6166_v15  ;;  %v14594_v61 = vld [vmem:[#allocation32_spill] sm:$0xff] }
  0xf5   : > { %9289 = vmatprep.subr.bf16.mxu0 %v14423_v51  ;;  %v14581_v38 = vsel %vm11557_vm8, 4294967295, %v14580_v38  ;;  %vm11590_vm13 = vmpackc.low %vm14585_vm12, %vm14584_vm11  ;;  %vm14590_vm11 = vcmp.eq.s32.totalorder %v14573_v48, %v11190_v16  ;;  %v14595_v15 = vand.u32 4294901760, %v11306_v18  ;;  %v9299_v4 = vpack.c.bf16 %v1794_v58, %v1787_v42 }
  0xf6   : > { %14582 = vst [vmem:[#allocation24_spill] sm:$0xff] %v14581_v38  ;;  %9432 = vmatpush3.bf16.msk.msra.mxu1 %vm11522_vm3, %v14506_v10  ;;  %v14587_v5 = vsel %vm11590_vm13, 4294967295, %v14586_v5  ;;  %vm11617_vm12 = vmpackc.low %vm1654_vm15, %vm14590_vm11  ;;  %vm1656_vm15 = vcmp.eq.s32.totalorder %v14597_v30, %v11190_v16 }
  0xf7   : > { %9433 = vmatprep.subr.bf16.mxu1 %v14423_v51  ;;  %14588 = vst [vmem:[#allocation25_spill] sm:$0xff] %v14587_v5  ;;  %v14592_v9 = vsel %vm11617_vm12, 4294967295, %v14591_v9  ;;  %v2491_v49 = vsub.f32 %v11306_v18, %v14595_v15  ;;  %v14603_v15 = vand.u32 4294901760, %v11533_v57  ;;  %v14605_v5 = vand.u32 4294901760, %v11313_v22 }
  0xf8   : > { %9291 = vmatpush3.bf16.msk.msra.mxu0 %vm11557_vm8, %v14506_v10  ;;  %14593 = vst [vmem:[#allocation26_spill] sm:$0xff] %v14592_v9  ;;  %vm14599_vm8 = vcmp.eq.s32.totalorder %v14577_v62, %v11197_v53  ;;  %v14606_v62 = vand.u32 4294901760, %v11548_v12  ;;  %v2499_v9 = vand.u32 4294901760, %v2498_v60  ;;  %v6102_v60 = vsel %vm1656_vm15, 1.0, %v14503_v8 }
  0xf9   : > { %9292 = vmatprep.subr.bf16.mxu0 %v14423_v51  ;;  %vm11645_vm3 = vmpackc.low %vm14599_vm8, %vm14598_vm4  ;;  %v1775_v44 = vsub.f32 %v11533_v57, %v14603_v15  ;;  %v1807_v48 = vsub.f32 %v11313_v22, %v14605_v5  ;;  %vm14607_vm4 = vcmp.eq.s32.totalorder %v14594_v61, %v11190_v16  ;;  %v14608_v5 = vmov 0 }
  0xfa   : > { %9435 = vmatpush3.bf16.msk.msra.mxu1 %vm11590_vm13, %v14506_v10  ;;  %v14601_v41 = vsel %vm11645_vm3, 4294967295, %v14600_v41  ;;  %v2480_v15 = vsub.f32 %v11548_v12, %v14606_v62  ;;  %vm11675_vm11 = vmpackc.low %vm1656_vm15, %vm14607_vm4  ;;  %v2492_v17 = vand.u32 4294901760, %v2491_v49  ;;  %v14611_v62 = vand.u32 4294901760, %v11328_v46 }
  0xfb   : > { %9436 = vmatprep.subr.bf16.mxu1 %v14423_v51  ;;  %14602 = vst [vmem:[#allocation27_spill] sm:$0xff] %v14601_v41  ;;  %v14609_v5 = vsel %vm11675_vm11, 4294967295, %v14608_v5  ;;  %vm14612_vm8 = vmmov %vm14607_vm4  ;;  %v14613_v49 = vand.u32 4294901760, %v11330_v47  ;;  %vm14614_vm4 = vcmp.eq.s32.totalorder %v14594_v61, %v11197_v53  ;;  %v14616_v41 = vmov 0 }
  0xfc   : > { %9294 = vmatpush3.bf16.msk.msra.mxu0 %vm11617_vm12, %v14506_v10  ;;  %14610 = vst [vmem:[#allocation29_spill] sm:$0xff] %v14609_v5  ;;  %v2505_v33 = vsub.f32 %v11328_v46, %v14611_v62  ;;  %v6101_v52 = vsel %vm14612_vm8, 1.0, %v14503_v8  ;;  %v1776_v16 = vand.u32 4294901760, %v1775_v44  ;;  %v1808_v13 = vand.u32 4294901760, %v1807_v48 }
  0xfd   : > { %9295 = vmatprep.subr.bf16.mxu0 %v14423_v51  ;;  %v2512_v62 = vsub.f32 %v11330_v47, %v14613_v49  ;;  %v14619_v49 = vand.u32 4294901760, %v11332_v25  ;;  %v2481_v58 = vand.u32 4294901760, %v2480_v15  ;;  %v9443_v63 = vpack.c.bf16 %v2499_v9, %v2492_v17 }
  0xfe   : > { %9438 = vmatpush3.bf16.msk.msra.mxu1 %vm11645_vm3, %v14506_v10  ;;  %vm14615_vm3 = vcmp.eq.s32.totalorder %v14597_v30, %v11197_v53  ;;  %v2506_v42 = vand.u32 4294901760, %v2505_v33  ;;  %v14621_v48 = vand.u32 4294901760, %v11347_v1  ;;  %v14210_v5 = vand.u32 4294901760, %v11465_v55 }
  0xff   : > { %9439 = vmatprep.subr.bf16.mxu1 %v14423_v51  ;;  %vm11705_vm8 = vmpackc.low %vm14615_vm3, %vm14614_vm4  ;;  %v1814_v38 = vsub.f32 %v11332_v25, %v14619_v49  ;;  %v2513_v49 = vand.u32 4294901760, %v2512_v62  ;;  %v11732_v15 = vsub.f32 %v6101_v52, %v6101_v52  ;;  %v9302_v9 = vpack.c.bf16 %v1808_v13, %v1801_v26 }
 0x100   : > { %v14617_v41 = vsel %vm11705_vm8, 4294967295, %v14616_v41  ;;  %9297 = vmatpush3.bf16.msk.msra.mxu0 %vm11675_vm11, %v14506_v10  ;;  %v2519_v44 = vsub.f32 %v11347_v1, %v14621_v48  ;;  %v14211_v33 = vand.u32 4294901760, %v11467_v50  ;;  %v14212_v17 = vand.u32 4294901760, %v11474_v43  ;;  %vm14626_vm3 = vmmov %vm14614_vm4 }
 0x101   : > { %14618 = vst [vmem:[#allocation30_spill] sm:$0xff] %v14617_v41  ;;  %9298 = vmatprep.subr.bf16.mxu0 %v14423_v51  ;;  %v1815_v62 = vand.u32 4294901760, %v1814_v38  ;;  %v1822_v48 = vand.u32 4294901760, %v1821_v27  ;;  %v14623_v41 = vand.u32 4294901760, %v11440_v35  ;;  %v1835_v52 = vsub.f32 %v11442_v0, %v14624_v28 }
 0x102   : > { %9441 = vmatpush3.bf16.msk.msra.mxu1 %vm11705_vm8, %v14506_v10  ;;  %v2520_v13 = vand.u32 4294901760, %v2519_v44  ;;  %v14213_v26 = vand.u32 4294901760, %v11476_v23  ;;  %v14215_v27 = vand.u32 4294901760, %v11478_v37  ;;  %v2527_v38 = vand.u32 4294901760, %v2526_v45 }
 0x103   : > { %9442 = vmatprep.subr.bf16.mxu1 %v14423_v51  ;;  %7759 = vmatmul.mubr.f32.vlgmr.msra.gmra.mrb[2].mxu0 %v1776_v16  ;;  %v1828_v3 = vsub.f32 %v11440_v35, %v14623_v41  ;;  %v11745_v16 = vsub.f32 %v6102_v60, %v6102_v60  ;;  %v14625_v41 = vand.u32 4294901760, %v11463_v59  ;;  %v2540_v60 = vsub.f32 %v11465_v55, %v14210_v5 }
 0x104   : > { %9300 = vmatpush3.bf16.msra.mxu0 %v9299_v4  ;;  %7793 = vmatprep.mubr.msk.f32.mxu0 %vm14453_vm1, %v14503_v8  ;;  %v9446_v4 = vpack.c.bf16 %v2513_v49, %v2506_v42  ;;  %v1849_v45 = vsub.f32 %v11474_v43, %v14212_v17  ;;  %v6168_v44 = vsel %vm14626_vm3, 1.0, %v14503_v8  ;;  %v9305_v49 = vpack.c.bf16 %v1822_v48, %v1815_v62 }
 0x105   : > { %7969 = vmatmul.mubr.f32.vlgmr.msra.gmra.mrb[2].mxu1 %v2481_v58  ;;  %9301 = vmatprep.subr.bf16.mxu0 %v14423_v51  ;;  %v2533_v28 = vsub.f32 %v11463_v59, %v14625_v41  ;;  %v1842_v58 = vsub.f32 %v11467_v50, %v14211_v33  ;;  %v1829_v41 = vand.u32 4294901760, %v1828_v3  ;;  %v1836_v5 = vand.u32 4294901760, %v1835_v52 }
 0x106   : > { %9444 = vmatpush3.bf16.msra.mxu1 %v9443_v63  ;;  %8003 = vmatprep.mubr.msk.f32.mxu1 %vm14453_vm1, %v14503_v8  ;;  %v2547_v33 = vsub.f32 %v11476_v23, %v14213_v26  ;;  %v2554_v17 = vsub.f32 %v11478_v37, %v14215_v27  ;;  %vm14627_vm15 = vcmp.eq.s32.totalorder %v14597_v30, %v11197_v53  ;;  %v2541_v3 = vand.u32 4294901760, %v2540_v60 }
 0x107   : > { %9445 = vmatprep.subr.bf16.mxu1 %v14423_v51  ;;  %v9449_v62 = vpack.c.bf16 %v2527_v38, %v2520_v13  ;;  %v2534_v48 = vand.u32 4294901760, %v2533_v28  ;;  %v1843_v52 = vand.u32 4294901760, %v1842_v58  ;;  %v1850_v26 = vand.u32 4294901760, %v1849_v45 }
 0x108   : > { %9303 = vmatpush3.bf16.msra.mxu0 %v9302_v9  ;;  %v6169_v9 = vsel %vm14627_vm15, 1.0, %v14503_v8  ;;  %v14628_v61 = vand.u32 4294901760, %v11493_v14  ;;  %v14629_v42 = vand.u32 4294901760, %v11495_v36  ;;  %v11791_v20 = vsub.f32 %v6168_v44, %v6168_v44 }
 0x109   : > { %9304 = vmatprep.subr.bf16.mxu0 %v14423_v51  ;;  %v9308_v53 = vpack.c.bf16 %v1836_v5, %v1829_v41  ;;  %v1869_v13 = vand.u32 4294901760, %v11578_v2  ;;  %v2548_v38 = vand.u32 4294901760, %v2547_v33  ;;  %v2555_v28 = vand.u32 4294901760, %v2554_v17 }
 0x10a   : > { %9447 = vmatpush3.bf16.msra.mxu1 %v9446_v4  ;;  %v1856_v27 = vsub.f32 %v11493_v14, %v14628_v61  ;;  %v1863_v63 = vsub.f32 %v11495_v36, %v14629_v42  ;;  %v14218_v4 = vand.u32 4294901760, %v11603_v34  ;;  %v14630_v60 = vand.u32 4294901760, %v11574_v32 }
 0x10b   : > { %9448 = vmatprep.subr.bf16.mxu1 %v14423_v51  ;;  %v14631_v58 = vand.u32 4294901760, %v11576_v11  ;;  %v11802_v42 = vsub.f32 %v6169_v9, %v6169_v9  ;;  %v9452_v5 = vpack.c.bf16 %v2541_v3, %v2534_v48  ;;  %v14220_v44 = vand.u32 4294901760, %v11605_v56 }
 0x10c   : > { %9306 = vmatpush3.bf16.msra.mxu0 %v9305_v49  ;;  %v2561_v61 = vsub.f32 %v11574_v32, %v14630_v60  ;;  %v14219_v49 = vand.u32 4294901760, %v11607_v29  ;;  %v9311_v33 = vpack.c.bf16 %v1850_v26, %v1843_v52  ;;  %v1857_v17 = vand.u32 4294901760, %v1856_v27 }
 0x10d   : > { %9307 = vmatprep.subr.bf16.mxu0 %v14423_v51  ;;  %v2568_v45 = vsub.f32 %v11576_v11, %v14631_v58  ;;  %v1864_v41 = vand.u32 4294901760, %v1863_v63  ;;  %v1870_v60 = vsub.f32 %v11578_v2, %v1869_v13  ;;  %v1877_v9 = vsub.f32 %v11603_v34, %v14218_v4 }
 0x10e   : > { %9450 = vmatpush3.bf16.msra.mxu1 %v9449_v62  ;;  %v14224_v62 = vand.u32 4294901760, %v11732_v15  ;;  %v14223_v48 = vand.u32 4294901760, %v11745_v16  ;;  %v9455_v3 = vpack.c.bf16 %v2555_v28, %v2548_v38  ;;  %v2562_v58 = vand.u32 4294901760, %v2561_v61 }
 0x10f   : > { %9451 = vmatprep.subr.bf16.mxu1 %v14423_v51  ;;  %v2569_v26 = vand.u32 4294901760, %v2568_v45  ;;  %v2575_v27 = vsub.f32 %v11605_v56, %v14220_v44  ;;  %v2582_v63 = vsub.f32 %v11607_v29, %v14219_v49  ;;  %v14222_v52 = vand.u32 4294901760, %v11791_v20 }
 0x110   : > { %9309 = vmatpush3.bf16.msra.mxu0 %v9308_v53  ;;  %v14221_v53 = vand.u32 4294901760, %v11802_v42  ;;  %v9314_v4 = vpack.c.bf16 %v1864_v41, %v1857_v17  ;;  %v1871_v38 = vand.u32 4294901760, %v1870_v60  ;;  %v1878_v28 = vand.u32 4294901760, %v1877_v9 }
 0x111   : > { %9310 = vmatprep.subr.bf16.mxu0 %v14423_v51  ;;  %v1884_v61 = vsub.f32 %v11732_v15, %v14224_v62  ;;  %v1891_v45 = vsub.f32 %v11745_v16, %v14223_v48  ;;  %v2576_v49 = vand.u32 4294901760, %v2575_v27  ;;  %v2583_v44 = vand.u32 4294901760, %v2582_v63 }
 0x112   : > { %9453 = vmatpush3.bf16.msra.mxu1 %v9452_v5  ;;  %v9458_v5 = vpack.c.bf16 %v2569_v26, %v2562_v58  ;;  %v2596_v17 = vsub.f32 %v11802_v42, %v14221_v53  ;;  %v9317_v41 = vpack.c.bf16 %v1878_v28, %v1871_v38  ;;  %v9470_v38 = vpack.c.bf16 %v11330_v47, %v11328_v46 }
 0x113   : > { %9454 = vmatprep.subr.bf16.mxu1 %v14423_v51  ;;  %v1885_v60 = vand.u32 4294901760, %v1884_v61  ;;  %v1892_v9 = vand.u32 4294901760, %v1891_v45  ;;  %v9329_v28 = vpack.c.bf16 %v11334_v24, %v11332_v25  ;;  %v9473_v61 = vpack.c.bf16 %v11349_v40, %v11347_v1 }
 0x114   : > { %9312 = vmatpush3.bf16.msra.mxu0 %v9311_v33  ;;  %v2589_v33 = vsub.f32 %v11791_v20, %v14222_v52  ;;  %v2597_v26 = vand.u32 4294901760, %v2596_v17  ;;  %v9332_v45 = vpack.c.bf16 %v11442_v0, %v11440_v35  ;;  %v9479_v17 = vpack.c.bf16 %v11478_v37, %v11476_v23 }
 0x115   : > { %9313 = vmatprep.subr.bf16.mxu0 %v14423_v51  ;;  %v9320_v27 = vpack.c.bf16 %v1892_v9, %v1885_v60  ;;  %v9482_v60 = vpack.c.bf16 %v11576_v11, %v11574_v32  ;;  %v9341_v9 = vpack.c.bf16 %v11603_v34, %v11578_v2  ;;  %v14653_v53 = vand.u32 4294901760, %v11306_v18 }
 0x116   : > { %9456 = vmatpush3.bf16.msra.mxu1 %v9455_v3  ;;  %v9461_v3 = vpack.c.bf16 %v2583_v44, %v2576_v49  ;;  %v2590_v58 = vand.u32 4294901760, %v2589_v33  ;;  %v9467_v44 = vpack.c.bf16 %v11308_v19, %v11306_v18  ;;  %v9326_v49 = vpack.c.bf16 %v11313_v22, %v11311_v21 }
 0x117   : > { %9457 = vmatprep.subr.bf16.mxu1 %v14423_v51  ;;  %v9335_v33 = vpack.c.bf16 %v11474_v43, %v11467_v50  ;;  %v14654_v52 = vand.u32 4294901760, %v11308_v19  ;;  %v14655_v62 = vand.u32 4294901760, %v11533_v57  ;;  %v14659_v18 = vand.u32 4294901760, %v11328_v46 }
 0x118   : > { %9315 = vmatpush3.bf16.msra.mxu0 %v9314_v4  ;;  %v9464_v63 = vpack.c.bf16 %v2597_v26, %v2590_v58  ;;  %v9323_v4 = vpack.c.bf16 %v11291_v7, %v11289_v39  ;;  %v9344_v58 = vpack.c.bf16 %v11745_v16, %v11732_v15  ;;  %v9488_v26 = vpack.c.bf16 %v11802_v42, %v11791_v20 }
 0x119   : > { %9316 = vmatprep.subr.bf16.mxu0 %v14423_v51  ;;  %v9515_v48 = vpack.c.bf16 %v14654_v52, %v14653_v53  ;;  %v14660_v19 = vand.u32 4294901760, %v11330_v47  ;;  %v14664_v46 = vand.u32 4294901760, %v11349_v40  ;;  %v14666_v52 = vand.u32 4294901760, %v11442_v0 }
 0x11a   : > { %9459 = vmatpush3.bf16.msra.mxu1 %v9458_v5  ;;  %v9476_v5 = vpack.c.bf16 %v11465_v55, %v11463_v59  ;;  %v14670_v40 = vand.u32 4294901760, %v11474_v43  ;;  %v14672_v0 = vand.u32 4294901760, %v11478_v37  ;;  %v14676_v43 = vand.u32 4294901760, %v11576_v11 }
 0x11b   : > { %9460 = vmatprep.subr.bf16.mxu1 %v14423_v51  ;;  %v14680_v11 = vand.u32 4294901760, %v11732_v15  ;;  %v14682_v2 = vand.u32 4294901760, %v11791_v20  ;;  %v12115_v20 = vld [vmem:[%s10300_s23 + $0x5] ss:$0 sm:$0xff] }
 0x11c   : > { %9318 = vmatpush3.bf16.msra.mxu0 %v9317_v41  ;;  %v9338_v41 = vpack.c.bf16 %v11495_v36, %v11493_v14 }
 0x11d   : > { %9319 = vmatprep.subr.bf16.mxu0 %v14423_v51 }
 0x11e   : > { %9462 = vmatpush3.bf16.msra.mxu1 %v9461_v3  ;;  %v9485_v3 = vpack.c.bf16 %v11607_v29, %v11605_v56 }
 0x11f   : > { %9463 = vmatprep.subr.bf16.mxu1 %v14423_v51 }
 0x120   : > { %9321 = vmatpush3.bf16.msra.mxu0 %v9320_v27 }
 0x121   : > { %9322 = vmatprep.subr.bf16.mxu0 %v14423_v51 }
 0x122   : > { %9465 = vmatpush3.bf16.msra.mxu1 %v9464_v63  ;;  %v14687_v63 = vld [vmem:[#allocation5_spill] sm:$0xff] }
 0x123   : > { %9466 = vmatprep.subr.bf16.mxu1 %v14423_v51  ;;  %7794 = vmatmul.mubr.f32.vlgmr.msra.gmra.mrb[2].mxu0 %v11469_v54 }
 0x124   : > { %9324 = vmatpush3.bf16.msra.mxu0 %v9323_v4  ;;  %7828 = vmatprep.mubr.msk.f32.mxu0 %vm14453_vm1, %v14503_v8  ;;  %v14688_v4 = vld [vmem:[#allocation6_spill] sm:$0xff] }
 0x125   : > { %8004 = vmatmul.mubr.f32.vlgmr.msra.gmra.mrb[2].mxu1 %v11480_v6  ;;  %9325 = vmatprep.subr.bf16.mxu0 %v14423_v51 }
 0x126   : > { %9468 = vmatpush3.bf16.msra.mxu1 %v9467_v44  ;;  %8038 = vmatprep.mubr.msk.f32.mxu1 %vm14453_vm1, %v14503_v8 }
 0x127   : > { %9469 = vmatprep.subr.bf16.mxu1 %v14423_v51 }
 0x128   : > { %9327 = vmatpush3.bf16.msra.mxu0 %v9326_v49 }
 0x129   : > { %9328 = vmatprep.subr.bf16.mxu0 %v14423_v51 }
 0x12a   : > { %9471 = vmatpush3.bf16.msra.mxu1 %v9470_v38  ;;  %v13070_v38 = vld [vmem:[%s10300_s23 + $0x6] ss:$0 sm:$0xff] }
 0x12b   : > { %9472 = vmatprep.subr.bf16.mxu1 %v14423_v51 }
 0x12c   : > { %9330 = vmatpush3.bf16.msra.mxu0 %v9329_v28 }
 0x12d   : > { %9331 = vmatprep.subr.bf16.mxu0 %v14423_v51 }
 0x12e   : > { %9474 = vmatpush3.bf16.msra.mxu1 %v9473_v61  ;;  %v14639_v61 = vld [vmem:[#allocation19_spill] sm:$0xff] }
 0x12f   : > { %9475 = vmatprep.subr.bf16.mxu1 %v14423_v51  ;;  %vm14640_vm4 = vnez %v14639_v61 }
 0x130   : > { %9333 = vmatpush3.bf16.msra.mxu0 %v9332_v45  ;;  %v14641_v45 = vld [vmem:[#allocation23_spill] sm:$0xff] }
 0x131   : > { %9334 = vmatprep.subr.bf16.mxu0 %v14423_v51  ;;  %vm14642_vm3 = vnez %v14641_v45 }
 0x132   : > { %9477 = vmatpush3.bf16.msra.mxu1 %v9476_v5  ;;  %v14643_v5 = vld [vmem:[#allocation24_spill] sm:$0xff] }
 0x133   : > { %9478 = vmatprep.subr.bf16.mxu1 %v14423_v51  ;;  %vm14644_vm15 = vnez %v14643_v5 }
 0x134   : > { %9336 = vmatpush3.bf16.msra.mxu0 %v9335_v33 }
 0x135   : > { %9337 = vmatprep.subr.bf16.mxu0 %v14423_v51 }
 0x136   : > { %9480 = vmatpush3.bf16.msra.mxu1 %v9479_v17  ;;  %v14691_v17 = vmov 0 }
 0x137   : > { %9481 = vmatprep.subr.bf16.mxu1 %v14423_v51 }
 0x138   : > { %9339 = vmatpush3.bf16.msra.mxu0 %v9338_v41  ;;  %v14647_v41 = vld [vmem:[#allocation27_spill] sm:$0xff] }
 0x139   : > { %9340 = vmatprep.subr.bf16.mxu0 %v14423_v51 }
 0x13a   : > { %9483 = vmatpush3.bf16.msra.mxu1 %v9482_v60 }
 0x13b   : > { %9484 = vmatprep.subr.bf16.mxu1 %v14423_v51 }
 0x13c   : > { %9342 = vmatpush3.bf16.msra.mxu0 %v9341_v9  ;;  %v14650_v9 = vand.u32 4294901760, %v11289_v39  ;;  %v14656_v39 = vand.u32 4294901760, %v11311_v21  ;;  %v14661_v21 = vand.u32 4294901760, %v11332_v25  ;;  %v14667_v25 = vand.u32 4294901760, %v11463_v59 }
 0x13d   : > { %9343 = vmatprep.subr.bf16.mxu0 %v14423_v51  ;;  %v14673_v59 = vand.u32 4294901760, %v11493_v14  ;;  %v14678_v14 = vand.u32 4294901760, %v11605_v56  ;;  %v14686_v56 = vld [vmem:[#allocation4_spill] sm:$0xff] }
 0x13e   : > { %9486 = vmatpush3.bf16.msra.mxu1 %v9485_v3  ;;  %v14651_v3 = vand.u32 4294901760, %v11291_v7  ;;  %v14657_v7 = vand.u32 4294901760, %v11313_v22  ;;  %v14662_v22 = vand.u32 4294901760, %v11334_v24  ;;  %v14668_v24 = vand.u32 4294901760, %v11465_v55 }
 0x13f   : > { %9487 = vmatprep.subr.bf16.mxu1 %v14423_v51  ;;  %v14674_v55 = vand.u32 4294901760, %v11495_v36  ;;  %v14679_v36 = vand.u32 4294901760, %v11607_v29  ;;  %v14685_v29 = vld [vmem:[#allocation3_spill] sm:$0xff] }
 0x140   : > { %9345 = vmatpush3.bf16.msra.mxu0 %v9344_v58  ;;  %v9371_v58 = vpack.c.bf16 %v14651_v3, %v14650_v9  ;;  %v9374_v9 = vpack.c.bf16 %v14657_v7, %v14656_v39  ;;  %v14658_v3 = vand.u32 4294901760, %v11548_v12 }
 0x141   : > { %9346 = vmatprep.subr.bf16.mxu0 %v14423_v51 }
 0x142   : > { %9489 = vmatpush3.bf16.msra.mxu1 %v9488_v26 }
 0x143   : > { %9490 = vmatprep.subr.bf16.mxu1 %v14423_v51  ;;  %7829 = vmatmul.mubr.f32.vlgmr.msra.gmra.mrb[2].mxu0 %v11533_v57  ;;  %v9518_v57 = vpack.c.bf16 %v14660_v19, %v14659_v18  ;;  %v9533_v18 = vpack.c.bf16 %v14679_v36, %v14678_v14 }
 0x144   : > { %9348 = vmatpush3.bf16.msk.msra.mxu0 %vm11217_vm2, %v14506_v10  ;;  %7863 = vmatprep.mubr.msk.f32.mxu0 %vm14453_vm1, %v14503_v8 }
 0x145   : > { %8039 = vmatmul.mubr.f32.vlgmr.msra.gmra.mrb[2].mxu1 %v11548_v12  ;;  %9349 = vmatprep.subr.bf16.mxu0 %v14423_v51  ;;  %v9377_v12 = vpack.c.bf16 %v14662_v22, %v14661_v21  ;;  %v14694_v21 = vld [vmem:[#allocation11_spill] sm:$0xff]  ;;  %v14695_v22 = vmov 0 }
 0x146   : > { %9492 = vmatpush3.bf16.msk.msra.mxu1 %vm11232_vm14, %v14506_v10  ;;  %8073 = vmatprep.mubr.msk.f32.mxu1 %vm14453_vm1, %v14503_v8 }
 0x147   : > { %9493 = vmatprep.subr.bf16.mxu1 %v14423_v51 }
 0x148   : > { %9351 = vmatpush3.bf16.msk.msra.mxu0 %vm11273_vm7, %v14506_v10 }
 0x149   : > { %9352 = vmatprep.subr.bf16.mxu0 %v14423_v51 }
 0x14a   : > { %9495 = vmatpush3.bf16.msk.msra.mxu1 %vm11321_vm0, %v14506_v10 }
 0x14b   : > { %9496 = vmatprep.subr.bf16.mxu1 %v14423_v51 }
 0x14c   : > { %9354 = vmatpush3.bf16.msk.msra.mxu0 %vm11343_vm6, %v14506_v10 }
 0x14d   : > { %9355 = vmatprep.subr.bf16.mxu0 %v14423_v51 }
 0x14e   : > { %9498 = vmatpush3.bf16.msk.msra.mxu1 %vm11377_vm9, %v14506_v10 }
 0x14f   : > { %9499 = vmatprep.subr.bf16.mxu1 %v14423_v51 }
 0x150   : > { %9357 = vmatpush3.bf16.msk.msra.mxu0 %vm11418_vm5, %v14506_v10 }
 0x151   : > { %9358 = vmatprep.subr.bf16.mxu0 %v14423_v51 }
 0x152   : > { %9501 = vmatpush3.bf16.msk.msra.mxu1 %vm11459_vm10, %v14506_v10 }
 0x153   : > { %9502 = vmatprep.subr.bf16.mxu1 %v14423_v51 }
 0x154   : > { %9360 = vmatpush3.bf16.msk.msra.mxu0 %vm14640_vm4, %v14506_v10 }
 0x155   : > { %9361 = vmatprep.subr.bf16.mxu0 %v14423_v51 }
 0x156   : > { %9504 = vmatpush3.bf16.msk.msra.mxu1 %vm14642_vm3, %v14506_v10  ;;  %vm14648_vm3 = vnez %v14647_v41 }
 0x157   : > { %9505 = vmatprep.subr.bf16.mxu1 %v14423_v51 }
 0x158   : > { %9363 = vmatpush3.bf16.msk.msra.mxu0 %vm14644_vm15, %v14506_v10 }
 0x159   : > { %9364 = vmatprep.subr.bf16.mxu0 %v14423_v51 }
 0x15a   : > { %9507 = vmatpush3.bf16.msk.msra.mxu1 %vm11590_vm13, %v14506_v10 }
 0x15b   : > { %9508 = vmatprep.subr.bf16.mxu1 %v14423_v51 }
 0x15c   : > { %9366 = vmatpush3.bf16.msk.msra.mxu0 %vm11617_vm12, %v14506_v10 }
 0x15d   : > { %9367 = vmatprep.subr.bf16.mxu0 %v14423_v51 }
 0x15e   : > { %9510 = vmatpush3.bf16.msk.msra.mxu1 %vm14648_vm3, %v14506_v10 }
 0x15f   : > { %9511 = vmatprep.subr.bf16.mxu1 %v14423_v51 }
 0x160   : > { %9369 = vmatpush3.bf16.msk.msra.mxu0 %vm11675_vm11, %v14506_v10 }
 0x161   : > { %9370 = vmatprep.subr.bf16.mxu0 %v14423_v51 }
 0x162   : > { %9513 = vmatpush3.bf16.msk.msra.mxu1 %vm11705_vm8, %v14506_v10 }
 0x163   : > { %9514 = vmatprep.subr.bf16.mxu1 %v14423_v51  ;;  %7864 = vmatmul.mubr.f32.vlgmr.msra.gmra.mrb[2].mxu0 %v14655_v62  ;;  %v14663_v62 = vand.u32 4294901760, %v11347_v1  ;;  %v14669_v1 = vand.u32 4294901760, %v11467_v50  ;;  %v14675_v50 = vand.u32 4294901760, %v11574_v32  ;;  %v14681_v32 = vand.u32 4294901760, %v11745_v16 }
 0x164   : > { %9372 = vmatpush3.bf16.msra.mxu0 %v9371_v58  ;;  %7898 = vmatprep.mubr.msk.f32.mxu0 %vm14453_vm1, %v14503_v8  ;;  %v9524_v58 = vpack.c.bf16 %v14668_v24, %v14667_v25 }
 0x165   : > { %8074 = vmatmul.mubr.f32.vlgmr.msra.gmra.mrb[2].mxu1 %v14658_v3  ;;  %9373 = vmatprep.subr.bf16.mxu0 %v14423_v51  ;;  %v9521_v47 = vpack.c.bf16 %v14664_v46, %v14663_v62  ;;  %v9383_v39 = vpack.c.bf16 %v14670_v40, %v14669_v1  ;;  %v9530_v3 = vpack.c.bf16 %v14676_v43, %v14675_v50  ;;  %v14704_v40 = vmov 0 }
 0x166   : > { %9516 = vmatpush3.bf16.msra.mxu1 %v9515_v48  ;;  %8108 = vmatprep.mubr.msk.f32.mxu1 %vm14453_vm1, %v14503_v8  ;;  %v14665_v48 = vand.u32 4294901760, %v11440_v35  ;;  %v14671_v35 = vand.u32 4294901760, %v11476_v23  ;;  %v14677_v23 = vand.u32 4294901760, %v11603_v34  ;;  %v9392_v19 = vpack.c.bf16 %v14681_v32, %v14680_v11  ;;  %v6237_v11 = vld [vmem:[%s14055_s2 + $0x20] sm:$0xff] }
 0x167   : > { %9517 = vmatprep.subr.bf16.mxu1 %v14423_v51  ;;  %v14683_v34 = vand.u32 4294901760, %v11802_v42  ;;  %v14709_v43 = vmov 0  ;;  %v14712_v32 = vmov 0 }
 0x168   : > { %9375 = vmatpush3.bf16.msra.mxu0 %v9374_v9  ;;  %v9380_v53 = vpack.c.bf16 %v14666_v52, %v14665_v48  ;;  %v9527_v7 = vpack.c.bf16 %v14672_v0, %v14671_v35  ;;  %v9386_v9 = vpack.c.bf16 %v14674_v55, %v14673_v59  ;;  %v9389_v37 = vpack.c.bf16 %v14677_v23, %v1869_v13  ;;  %v14702_v52 = vld [vmem:[#allocation15_spill] sm:$0xff]  ;;  %v14708_v35 = vld [vmem:[#allocation18_spill] sm:$0xff] }
 0x169   : > { %9376 = vmatprep.subr.bf16.mxu0 %v14423_v51  ;;  %v9536_v13 = vpack.c.bf16 %v14683_v34, %v14682_v2  ;;  %v14699_v48 = vmov 0 }
 0x16a   : > { %9519 = vmatpush3.bf16.msra.mxu1 %v9518_v57 }
 0x16b   : > { %9520 = vmatprep.subr.bf16.mxu1 %v14423_v51 }
 0x16c   : > { %9378 = vmatpush3.bf16.msra.mxu0 %v9377_v12  ;;  %v14698_v12 = vld [vmem:[#allocation12_spill] sm:$0xff] }
 0x16d   : > { %9379 = vmatprep.subr.bf16.mxu0 %v14423_v51 }
 0x16e   : > { %9522 = vmatpush3.bf16.msra.mxu1 %v9521_v47 }
 0x16f   : > { %9523 = vmatprep.subr.bf16.mxu1 %v14423_v51 }
 0x170   : > { %9381 = vmatpush3.bf16.msra.mxu0 %v9380_v53  ;;  %v14703_v53 = vld [vmem:[#allocation16_spill] sm:$0xff] }
 0x171   : > { %9382 = vmatprep.subr.bf16.mxu0 %v14423_v51 }
 0x172   : > { %9525 = vmatpush3.bf16.msra.mxu1 %v9524_v58 }
 0x173   : > { %9526 = vmatprep.subr.bf16.mxu1 %v14423_v51 }
 0x174   : > { %9384 = vmatpush3.bf16.msra.mxu0 %v9383_v39  ;;  %v14707_v39 = vld [vmem:[#allocation17_spill] sm:$0xff] }
 0x175   : > { %9385 = vmatprep.subr.bf16.mxu0 %v14423_v51 }
 0x176   : > { %9528 = vmatpush3.bf16.msra.mxu1 %v9527_v7 }
 0x177   : > { %9529 = vmatprep.subr.bf16.mxu1 %v14423_v51 }
 0x178   : > { %9387 = vmatpush3.bf16.msra.mxu0 %v9386_v9 }
 0x179   : > { %9388 = vmatprep.subr.bf16.mxu0 %v14423_v51 }
 0x17a   : > { %9531 = vmatpush3.bf16.msra.mxu1 %v9530_v3 }
 0x17b   : > { %9532 = vmatprep.subr.bf16.mxu1 %v14423_v51 }
 0x17c   : > { %9390 = vmatpush3.bf16.msra.mxu0 %v9389_v37 }
 0x17d   : > { %9391 = vmatprep.subr.bf16.mxu0 %v14423_v51 }
 0x17e   : > { %9534 = vmatpush3.bf16.msra.mxu1 %v9533_v18 }
 0x17f   : > { %9535 = vmatprep.subr.bf16.mxu1 %v14423_v51 }
 0x180   : > { %9393 = vmatpush3.bf16.msra.mxu0 %v9392_v19 }
 0x181   : > { %9394 = vmatprep.subr.bf16.mxu0 %v14423_v51 }
 0x182   : > { %9537 = vmatpush3.bf16.msra.mxu1 %v9536_v13 }
 0x183   : > { %9538 = vmatprep.subr.bf16.mxu1 %v14423_v51  ;;  %7899 = vmatmul.mubr.f32.vlgmr.msra.gmra.mrb[2].mxu0 %v11469_v54 }
 0x184   : > { %9396 = vmatpush3.bf16.msk.msra.mxu0 %vm11217_vm2, %v14506_v10  ;;  %7933 = vmatprep.mubr.msk.f32.mxu0 %vm14453_vm1, %v14503_v8  ;;  %vm14684_vm2 = vnez %v14641_v45 }
 0x185   : > { %8109 = vmatmul.mubr.f32.vlgmr.msra.gmra.mrb[2].mxu1 %v11480_v6  ;;  %9397 = vmatprep.subr.bf16.mxu0 %v14423_v51 }
 0x186   : > { %9540 = vmatpush3.bf16.msk.msra.mxu1 %vm11232_vm14, %v14506_v10  ;;  %8143 = vmatprep.mubr.msk.f32.mxu1 %vm14453_vm1, %v14503_v8  ;;  %vm3051_vm14 = vcmp.eq.s32.totalorder %v14685_v29, %v12111_v31 }
 0x187   : > { %9541 = vmatprep.subr.bf16.mxu1 %v14423_v51  ;;  %v6221_v15 = vsel %vm3051_vm14, 1.0, %v14503_v8 }
 0x188   : > { %9399 = vmatpush3.bf16.msk.msra.mxu0 %vm11273_vm7, %v14506_v10  ;;  %vm3052_vm7 = vcmp.eq.s32.totalorder %v14686_v56, %v12111_v31  ;;  %v12190_v45 = vsub.f32 %v6221_v15, %v6221_v15  ;;  %v6304_v15 = vld [vmem:[%s14055_s2 + $0x28] sm:$0xff] }
 0x189   : > { %9400 = vmatprep.subr.bf16.mxu0 %v14423_v51  ;;  %v6222_v16 = vsel %vm3052_vm7, 1.0, %v14503_v8 }
 0x18a   : > { %9543 = vmatpush3.bf16.msk.msra.mxu1 %vm11321_vm0, %v14506_v10  ;;  %vm3756_vm0 = vcmp.eq.s32.totalorder %v14685_v29, %v12115_v20  ;;  %v12192_v5 = vsub.f32 %v6222_v16, %v6222_v16  ;;  %v14715_v16 = vld [vmem:[#allocation20_spill] sm:$0xff] }
 0x18b   : > { %9544 = vmatprep.subr.bf16.mxu1 %v14423_v51  ;;  %v6288_v42 = vsel %vm3756_vm0, 1.0, %v14503_v8 }
 0x18c   : > { %9402 = vmatpush3.bf16.msk.msra.mxu0 %vm11343_vm6, %v14506_v10  ;;  %vm3757_vm6 = vcmp.eq.s32.totalorder %v14686_v56, %v12115_v20  ;;  %v12194_v33 = vsub.f32 %v6288_v42, %v6288_v42  ;;  %v14716_v42 = vld [vmem:[#allocation21_spill] sm:$0xff] }
 0x18d   : > { %9403 = vmatprep.subr.bf16.mxu0 %v14423_v51  ;;  %v6289_v27 = vsel %vm3757_vm6, 1.0, %v14503_v8 }
 0x18e   : > { %9546 = vmatpush3.bf16.msk.msra.mxu1 %vm11377_vm9, %v14506_v10  ;;  %vm3053_vm9 = vcmp.eq.s32.totalorder %v14687_v63, %v12111_v31  ;;  %v12208_v41 = vsub.f32 %v6289_v27, %v6289_v27  ;;  %v14719_v27 = vmov 0 }
 0x18f   : > { %9547 = vmatprep.subr.bf16.mxu1 %v14423_v51  ;;  %v6223_v44 = vsel %vm3053_vm9, 1.0, %v14503_v8 }
 0x190   : > { %9405 = vmatpush3.bf16.msk.msra.mxu0 %vm11418_vm5, %v14506_v10  ;;  %vm3054_vm5 = vcmp.eq.s32.totalorder %v14688_v4, %v12111_v31  ;;  %v12210_v60 = vsub.f32 %v6223_v44, %v6223_v44  ;;  %v14722_v44 = vld [vmem:[#allocation28_spill] sm:$0xff] }
 0x191   : > { %9406 = vmatprep.subr.bf16.mxu0 %v14423_v51  ;;  %v6224_v49 = vsel %vm3054_vm5, 1.0, %v14503_v8 }
 0x192   : > { %9549 = vmatpush3.bf16.msk.msra.mxu1 %vm11459_vm10, %v14506_v10  ;;  %vm3758_vm10 = vcmp.eq.s32.totalorder %v14687_v63, %v12115_v20  ;;  %v12212_v26 = vsub.f32 %v6224_v49, %v6224_v49  ;;  %v14723_v49 = vld [vmem:[#allocation31_spill] sm:$0xff]  ;;  %v14742_v63 = vand.u32 4294901760, %v12190_v45 }
 0x193   : > { %9550 = vmatprep.subr.bf16.mxu1 %v14423_v51  ;;  %v6290_v28 = vsel %vm3758_vm10, 1.0, %v14503_v8 }
 0x194   : > { %9408 = vmatpush3.bf16.msk.msra.mxu0 %vm14640_vm4, %v14506_v10  ;;  %vm12233_vm4 = vmpackc.low %vm3054_vm5, %vm3053_vm9  ;;  %vm14225_vm9 = vcmp.eq.s32.totalorder %v14703_v53, %v12115_v20 }
 0x195   : > { %9409 = vmatprep.subr.bf16.mxu0 %v14423_v51  ;;  %v14696_v22 = vsel %vm12233_vm4, 4294967295, %v14695_v22  ;;  %v6295_v1 = vsel %vm14225_vm9, 1.0, %v14503_v8  ;;  %vm14228_vm9 = vcmp.eq.s32.totalorder %v14707_v39, %v12115_v20 }
 0x196   : > { %9552 = vmatpush3.bf16.msk.msra.mxu1 %vm14684_vm2, %v14506_v10  ;;  %14697 = vst [vmem:[#allocation34_spill] sm:$0xff] %v14696_v22  ;;  %vm3761_vm2 = vcmp.eq.s32.totalorder %v14698_v12, %v12115_v20  ;;  %v6296_v59 = vsel %vm14228_vm9, 1.0, %v14503_v8  ;;  %v12368_v18 = vsub.f32 %v6295_v1, %v6295_v1  ;;  %vm14718_vm9 = vcmp.eq.s32.totalorder %v14703_v53, %v12115_v20 }
 0x197   : > { %9553 = vmatprep.subr.bf16.mxu1 %v14423_v51  ;;  %v6293_v47 = vsel %vm3761_vm2, 1.0, %v14503_v8  ;;  %v12388_v34 = vsub.f32 %v6296_v59, %v6296_v59 }
 0x198   : > { %9411 = vmatpush3.bf16.msk.msra.mxu0 %vm14644_vm15, %v14506_v10  ;;  %vm3760_vm15 = vcmp.eq.s32.totalorder %v14694_v21, %v12115_v20  ;;  %v12357_v23 = vsub.f32 %v6293_v47, %v6293_v47  ;;  %v14727_v47 = vmov 0 }
 0x199   : > { %9412 = vmatprep.subr.bf16.mxu0 %v14423_v51  ;;  %v6292_v46 = vsel %vm3760_vm15, 1.0, %v14503_v8 }
 0x19a   : > { %9555 = vmatpush3.bf16.msk.msra.mxu1 %vm11590_vm13, %v14506_v10  ;;  %vm3759_vm13 = vcmp.eq.s32.totalorder %v14688_v4, %v12115_v20  ;;  %v12355_v3 = vsub.f32 %v6292_v46, %v6292_v46  ;;  %v12440_v46 = vand.u32 4294901760, %v6304_v15  ;;  %v14741_v4 = vld [vmem:[#allocation32_spill] sm:$0xff] }
 0x19b   : > { %9556 = vmatprep.subr.bf16.mxu1 %v14423_v51  ;;  %v6291_v61 = vsel %vm3759_vm13, 1.0, %v14503_v8 }
 0x19c   : > { %9414 = vmatpush3.bf16.msk.msra.mxu0 %vm11617_vm12, %v14506_v10  ;;  %vm12175_vm12 = vmpackc.low %vm3052_vm7, %vm3051_vm14  ;;  %v12219_v57 = vsub.f32 %v6291_v61, %v6291_v61  ;;  %vm3057_vm7 = vcmp.eq.s32.totalorder %v14702_v52, %v12111_v31 }
 0x19d   : > { %9415 = vmatprep.subr.bf16.mxu0 %v14423_v51  ;;  %vm12271_vm14 = vmpackc.low %vm3759_vm13, %vm3758_vm10  ;;  %v6227_v25 = vsel %vm3057_vm7, 1.0, %v14503_v8  ;;  %vm14230_vm10 = vcmp.eq.s32.totalorder %v14707_v39, %v12111_v31  ;;  %vm14229_vm13 = vcmp.eq.s32.totalorder %v14708_v35, %v12111_v31 }
 0x19e   : > { %9558 = vmatpush3.bf16.msk.msra.mxu1 %vm14648_vm3, %v14506_v10  ;;  %vm3056_vm3 = vcmp.eq.s32.totalorder %v14698_v12, %v12111_v31  ;;  %v14700_v48 = vsel %vm12271_vm14, 4294967295, %v14699_v48  ;;  %v6229_v0 = vsel %vm14230_vm10, 1.0, %v14503_v8  ;;  %v6230_v7 = vsel %vm14229_vm13, 1.0, %v14503_v8 }
 0x19f   : > { %9559 = vmatprep.subr.bf16.mxu1 %v14423_v51  ;;  %v6226_v62 = vsel %vm3056_vm3, 1.0, %v14503_v8  ;;  %14701 = vst [vmem:[#allocation36_spill] sm:$0xff] %v14700_v48  ;;  %v12362_v37 = vsub.f32 %v6227_v25, %v6227_v25  ;;  %v12384_v19 = vsub.f32 %v6229_v0, %v6229_v0  ;;  %v12386_v2 = vsub.f32 %v6230_v7, %v6230_v7  ;;  %v6018_v7 = vld [vmem:[%s12458_s10] ss:$0 sm:$0xff] }
 0x1a0   : > { %9417 = vmatpush3.bf16.msk.msra.mxu0 %vm11675_vm11, %v14506_v10  ;;  %vm12204_vm11 = vmpackc.low %vm3757_vm6, %vm3756_vm0  ;;  %vm3058_vm0 = vcmp.eq.s32.totalorder %v14703_v53, %v12111_v31  ;;  %vm14226_vm6 = vcmp.eq.s32.totalorder %v14702_v52, %v12115_v20  ;;  %v12343_v50 = vsub.f32 %v6226_v62, %v6226_v62  ;;  %vm14233_vm10 = vcmp.eq.s32.totalorder %v14722_v44, %v12111_v31 }
 0x1a1   : > { %9562 = vmatprep.subr.bf16.mxu0 %v14423_v51  ;;  %v14692_v17 = vsel %vm12204_vm11, 4294967295, %v14691_v17  ;;  %v6228_v24 = vsel %vm3058_vm0, 1.0, %v14503_v8  ;;  %v6294_v58 = vsel %vm14226_vm6, 1.0, %v14503_v8  ;;  %vm14227_vm6 = vcmp.eq.s32.totalorder %v14708_v35, %v12115_v20 }
 0x1a2   : > { %9561 = vmatpush3.bf16.msk.msra.mxu1 %vm11705_vm8, %v14506_v10  ;;  %14693 = vst [vmem:[#allocation33_spill] sm:$0xff] %v14692_v17  ;;  %vm3055_vm8 = vcmp.eq.s32.totalorder %v14694_v21, %v12111_v31  ;;  %v6297_v55 = vsel %vm14227_vm6, 1.0, %v14503_v8  ;;  %v12364_v14 = vsub.f32 %v6228_v24, %v6228_v24  ;;  %v12366_v36 = vsub.f32 %v6294_v58, %v6294_v58  ;;  %v6085_v21 = vld [vmem:[%s12458_s10 + $0x1] ss:$0 sm:$0xff] }
 0x1a3   : > { %7934 = vmatmul.mubr.f32.vlgmr.msra.gmra.mrb[2].mxu0 %v11469_v54  ;;  %9706 = vmatprep.subr.bf16.mxu1 %v14423_v51  ;;  %v12217_v54 = vsub.f32 %v6290_v28, %v6290_v28  ;;  %vm12309_vm5 = vmpackc.low %vm3056_vm3, %vm3055_vm8  ;;  %v12390_v13 = vsub.f32 %v6297_v55, %v6297_v55  ;;  %vm14717_vm6 = vcmp.eq.s32.totalorder %v14702_v52, %v12115_v20  ;;  %v12423_v28 = vand.u32 4294901760, %v6237_v11 }
 0x1a4   : > { %9564 = vmatpush3.bf16.msk.msra.mxu0 %vm12175_vm12, %v14506_v10  ;;  %8178 = vmatprep.mubr.msk.f32.mxu0 %vm14453_vm1, %v14503_v8  ;;  %v14705_v40 = vsel %vm12309_vm5, 4294967295, %v14704_v40  ;;  %vm12380_vm3 = vmpackc.low %vm3058_vm0, %vm3057_vm7  ;;  %vm14232_vm7 = vcmp.eq.s32.totalorder %v14723_v49, %v12111_v31  ;;  %v6233_v24 = vsel %vm14233_vm10, 1.0, %v14503_v8  ;;  %v14734_v55 = vmov 0 }
 0x1a5   : > { %8144 = vmatmul.mubr.f32.vlgmr.msra.gmra.mrb[2].mxu1 %v11480_v6  ;;  %9565 = vmatprep.subr.bf16.mxu0 %v14423_v51  ;;  %v6225_v6 = vsel %vm3055_vm8, 1.0, %v14503_v8  ;;  %14706 = vst [vmem:[#allocation37_spill] sm:$0xff] %v14705_v40  ;;  %vm12351_vm8 = vmpackc.low %vm3761_vm2, %vm3760_vm15  ;;  %v14713_v32 = vsel %vm12380_vm3, 4294967295, %v14712_v32  ;;  %vm14231_vm15 = vcmp.eq.s32.totalorder %v14715_v16, %v12111_v31  ;;  %vm3062_vm2 = vcmp.eq.s32.totalorder %v14716_v42, %v12111_v31 }
 0x1a6   : > { %9708 = vmatpush3.bf16.msk.msra.mxu1 %vm12204_vm11, %v14506_v10  ;;  %8388 = vmatprep.mubr.msk.f32.mxu1 %vm14453_vm1, %v14503_v8  ;;  %v12341_v9 = vsub.f32 %v6225_v6, %v6225_v6  ;;  %v14710_v43 = vsel %vm12351_vm8, 4294967295, %v14709_v43  ;;  %14714 = vst [vmem:[#allocation39_spill] sm:$0xff] %v14713_v32  ;;  %vm12413_vm13 = vmpackc.low %vm14718_vm9, %vm14717_vm6  ;;  %v6231_v61 = vsel %vm14231_vm15, 1.0, %v14503_v8  ;;  %v6232_v6 = vsel %vm3062_vm2, 1.0, %v14503_v8 }
 0x1a7   : > { %9709 = vmatprep.subr.bf16.mxu1 %v14423_v51  ;;  %14711 = vst [vmem:[#allocation38_spill] sm:$0xff] %v14710_v43  ;;  %v14720_v27 = vsel %vm12413_vm13, 4294967295, %v14719_v27  ;;  %vm14724_vm6 = vcmp.eq.s32.totalorder %v14715_v16, %v12115_v20  ;;  %vm14725_vm9 = vcmp.eq.s32.totalorder %v14707_v39, %v12111_v31  ;;  %vm14726_vm15 = vcmp.eq.s32.totalorder %v14708_v35, %v12111_v31 }
 0x1a8   : > { %9567 = vmatpush3.bf16.msk.msra.mxu0 %vm12233_vm4, %v14506_v10  ;;  %14721 = vst [vmem:[#allocation40_spill] sm:$0xff] %v14720_v27  ;;  %v6298_v62 = vsel %vm14724_vm6, 1.0, %v14503_v8  ;;  %vm12449_vm0 = vmpackc.low %vm14726_vm15, %vm14725_vm9  ;;  %vm14730_vm6 = vcmp.eq.s32.totalorder %v14716_v42, %v12115_v20  ;;  %v6234_v58 = vsel %vm14232_vm7, 1.0, %v14503_v8  ;;  %vm14246_vm15 = vcmp.eq.s32.totalorder %v14723_v49, %v12115_v20 }
 0x1a9   : > { %9568 = vmatprep.subr.bf16.mxu0 %v14423_v51  ;;  %v14728_v47 = vsel %vm12449_vm0, 4294967295, %v14727_v47  ;;  %v6299_v25 = vsel %vm14730_vm6, 1.0, %v14503_v8  ;;  %vm14731_vm9 = vcmp.eq.s32.totalorder %v14722_v44, %v12115_v20  ;;  %v6301_v0 = vsel %vm14246_vm15, 1.0, %v14503_v8 }
 0x1aa   : > { %9711 = vmatpush3.bf16.msk.msra.mxu1 %vm12271_vm14, %v14506_v10  ;;  %14729 = vst [vmem:[#allocation9_spill] sm:$0xff] %v14728_v47  ;;  %v6300_v1 = vsel %vm14731_vm9, 1.0, %v14503_v8  ;;  %vm14732_vm6 = vcmp.eq.s32.totalorder %v14707_v39, %v12115_v20  ;;  %vm14733_vm7 = vcmp.eq.s32.totalorder %v14708_v35, %v12115_v20  ;;  %v12498_v53 = vsub.f32 %v6231_v61, %v6231_v61 }
 0x1ab   : > { %9712 = vmatprep.subr.bf16.mxu1 %v14423_v51  ;;  %vm12494_vm10 = vmpackc.low %vm14733_vm7, %vm14732_vm6  ;;  %v12500_v52 = vsub.f32 %v6232_v6, %v6232_v6  ;;  %v12502_v12 = vsub.f32 %v6298_v62, %v6298_v62  ;;  %v12505_v59 = vsub.f32 %v6237_v11, %v12423_v28  ;;  %v12511_v35 = vsub.f32 %v6299_v25, %v6299_v25 }
 0x1ac   : > { %9570 = vmatpush3.bf16.msk.msra.mxu0 %vm12309_vm5, %v14506_v10  ;;  %v14735_v55 = vsel %vm12494_vm10, 4294967295, %v14734_v55  ;;  %v12514_v39 = vsub.f32 %v6304_v15, %v12440_v46  ;;  %vm14737_vm7 = vcmp.eq.s32.totalorder %v14715_v16, %v12111_v31  ;;  %v14738_v11 = vmov 0 }
 0x1ad   : > { %9571 = vmatprep.subr.bf16.mxu0 %v14423_v51  ;;  %14736 = vst [vmem:[#allocation13_spill] sm:$0xff] %v14735_v55  ;;  %vm12525_vm9 = vmpackc.low %vm3062_vm2, %vm14737_vm7  ;;  %v12529_v62 = vsub.f32 %v6233_v24, %v6233_v24  ;;  %v12531_v15 = vsub.f32 %v6234_v58, %v6234_v58  ;;  %v12533_v25 = vsub.f32 %v6300_v1, %v6300_v1  ;;  %v14743_v58 = vand.u32 4294901760, %v12192_v5 }
 0x1ae   : > { %9714 = vmatpush3.bf16.msk.msra.mxu1 %vm12351_vm8, %v14506_v10  ;;  %v14739_v11 = vsel %vm12525_vm9, 4294967295, %v14738_v11  ;;  %v12535_v61 = vsub.f32 %v6301_v0, %v6301_v0  ;;  %v3196_v24 = vsub.f32 %v12190_v45, %v14742_v63  ;;  %vm14744_vm6 = vcmp.eq.s32.totalorder %v14715_v16, %v12115_v20 }
 0x1af   : > { %9715 = vmatprep.subr.bf16.mxu1 %v14423_v51  ;;  %14740 = vst [vmem:[#allocation7_spill] sm:$0xff] %v14739_v11  ;;  %v3203_v1 = vsub.f32 %v12192_v5, %v14743_v58  ;;  %vm14745_vm7 = vcmp.eq.s32.totalorder %v14716_v42, %v12115_v20  ;;  %v14746_v55 = vmov 0  ;;  %v14749_v58 = vand.u32 4294901760, %v12194_v33 }
 0x1b0   : > { %9573 = vmatpush3.bf16.msk.msra.mxu0 %vm12380_vm3, %v14506_v10  ;;  %vm12557_vm2 = vmpackc.low %vm14745_vm7, %vm14744_vm6  ;;  %v14750_v42 = vand.u32 4294901760, %v12208_v41  ;;  %vm14751_vm6 = vcmp.eq.s32.totalorder %v14722_v44, %v12111_v31  ;;  %vm14752_vm7 = vcmp.eq.s32.totalorder %v14723_v49, %v12111_v31  ;;  %v14760_v11 = vmov 0 }
 0x1b1   : > { %9574 = vmatprep.subr.bf16.mxu0 %v14423_v51  ;;  %v14747_v55 = vsel %vm12557_vm2, 4294967295, %v14746_v55  ;;  %v3901_v0 = vsub.f32 %v12194_v33, %v14749_v58  ;;  %v14780_v43 = vand.u32 4294901760, %v12343_v50  ;;  %v14784_v22 = vand.u32 4294901760, %v12364_v14 }
 0x1b2   : > { %9717 = vmatpush3.bf16.msk.msra.mxu1 %vm12413_vm13, %v14506_v10  ;;  %14748 = vst [vmem:[#allocation22_spill] sm:$0xff] %v14747_v55  ;;  %v3908_v63 = vsub.f32 %v12208_v41, %v14750_v42  ;;  %v3204_v42 = vand.u32 4294901760, %v3203_v1 }
 0x1b3   : > { %9718 = vmatprep.subr.bf16.mxu1 %v14423_v51  ;;  %v3231_v40 = vsub.f32 %v12343_v50, %v14780_v43  ;;  %v14782_v43 = vand.u32 4294901760, %v12357_v23 }
 0x1b4   : > { %9576 = vmatpush3.bf16.msk.msra.mxu0 %vm12449_vm0, %v14506_v10  ;;  %v3909_v58 = vand.u32 4294901760, %v3908_v63 }
 0x1b5   : > { %9577 = vmatprep.subr.bf16.mxu0 %v14423_v51  ;;  %v3936_v48 = vsub.f32 %v12357_v23, %v14782_v43  ;;  %v14783_v43 = vand.u32 4294901760, %v12362_v37 }
 0x1b6   : > { %9720 = vmatpush3.bf16.msk.msra.mxu1 %vm12494_vm10, %v14506_v10  ;;  %v918_v6 = vpop.f32.mrb[0].mxu0  ;;  %vm12584_vm10 = vmpackc.low %vm14752_vm7, %vm14751_vm6  ;;  %vm14758_vm6 = vcmp.eq.s32.totalorder %v14722_v44, %v12115_v20  ;;  %vm14759_vm7 = vcmp.eq.s32.totalorder %v14723_v49, %v12115_v20 }
 0x1b7   : > { %v926_v56 = vmul.f32 %v6018_v7, %v918_v6  ;;  %v7515_v29 = vpop.f32.mrb[1].mxu0  ;;  %9721 = vmatprep.subr.bf16.mxu1 %v14423_v51  ;;  %v14753_v6 = vmov 0 }
 0x1b8   : > { %v1623_v29 = vpop.f32.mrb[0].mxu1  ;;  %9579 = vmatpush3.bf16.msk.msra.mxu0 %vm12525_vm9, %v14506_v10  ;;  %v14754_v6 = vsel %vm12584_vm10, 4294967295, %v14753_v6 }
 0x1b9   : > { %v928_v16 = vmul.f32 %v926_v56, %v926_v56  ;;  %v1631_v7 = vmul.f32 %v6085_v21, %v1623_v29  ;;  %v7725_v47 = vpop.f32.mrb[1].mxu1  ;;  %9580 = vmatprep.subr.bf16.mxu0 %v14423_v51  ;;  %14755 = vst [vmem:[#allocation8_spill] sm:$0xff] %v14754_v6  ;;  %v3197_v21 = vand.u32 4294901760, %v3196_v24  ;;  %v14763_v24 = vand.u32 4294901760, %v12505_v59 }
 0x1ba   : > { %9723 = vmatpush3.bf16.msk.msra.mxu1 %vm12557_vm2, %v14506_v10  ;;  %v14756_v47 = vand.u32 4294901760, %v12210_v60  ;;  %vm12607_vm2 = vmpackc.low %vm14759_vm7, %vm14758_vm6  ;;  %vm14766_vm6 = vcmp.eq.s32.totalorder %v14741_v4, %v12111_v31  ;;  %vm14767_vm7 = vcmp.eq.s32.totalorder %v14597_v30, %v12111_v31 }
 0x1bb   : > { %v12598_v27 = vadd.f32 %v1631_v7, %v926_v56  ;;  %v1633_v32 = vmul.f32 %v1631_v7, %v1631_v7  ;;  %9724 = vmatprep.subr.bf16.mxu1 %v14423_v51  ;;  %v14761_v11 = vsel %vm12607_vm2, 4294967295, %v14760_v11  ;;  %v3185_v1 = vsub.f32 %v12505_v59, %v14763_v24  ;;  %vm12631_vm15 = vmpackc.low %vm14767_vm7, %vm14766_vm6 }
 0x1bc   : > { %v3210_v29 = vsub.f32 %v12210_v60, %v14756_v47  ;;  %14762 = vst [vmem:[#allocation14_spill] sm:$0xff] %v14761_v11  ;;  %v14764_v56 = vand.u32 4294901760, %v12212_v26  ;;  %9582 = vmatpush3.bf16.msk.msra.mxu0 %vm12584_vm10, %v14506_v10  ;;  %v3902_v47 = vand.u32 4294901760, %v3901_v0  ;;  %v14768_v24 = vmov 0 }
 0x1bd   : > { %14757 = vst [vmem:[#allocation10_spill] sm:$0xff] %v12598_v27  ;;  %v12622_v44 = vadd.f32 %v1633_v32, %v928_v16  ;;  %9583 = vmatprep.subr.bf16.mxu0 %v14423_v51  ;;  %v14769_v24 = vsel %vm12631_vm15, 4294967295, %v14768_v24  ;;  %v14771_v0 = vand.u32 4294901760, %v12514_v39  ;;  %v14773_v16 = vand.u32 4294901760, %v12219_v57 }
 0x1be   : > { %v3217_v7 = vsub.f32 %v12212_v26, %v14764_v56  ;;  %14770 = vst [vmem:[#allocation23_spill] sm:$0xff] %v14769_v24  ;;  %v14772_v56 = vand.u32 4294901760, %v12217_v54  ;;  %9726 = vmatpush3.bf16.msk.msra.mxu1 %vm12607_vm2, %v14506_v10  ;;  %v6235_v27 = vsel %vm14766_vm6, 1.0, %v14503_v8  ;;  %vm14774_vm10 = vcmp.eq.s32.totalorder %v14741_v4, %v12115_v20 }
 0x1bf   : > { %14765 = vst [vmem:[#allocation19_spill] sm:$0xff] %v12622_v44  ;;  %v3890_v63 = vsub.f32 %v12514_v39, %v14771_v0  ;;  %v3922_v49 = vsub.f32 %v12219_v57, %v14773_v16  ;;  %v6236_v0 = vsel %vm14767_vm7, 1.0, %v14503_v8  ;;  %9727 = vmatprep.subr.bf16.mxu1 %v14423_v51  ;;  %vm14775_vm2 = vcmp.eq.s32.totalorder %v14597_v30, %v12115_v20 }
 0x1c0   : > { %v3915_v32 = vsub.f32 %v12217_v54, %v14772_v56  ;;  %vm12664_vm9 = vmpackc.low %vm14775_vm2, %vm14774_vm10  ;;  %v14776_v16 = vmov 0  ;;  %v3186_v11 = vand.u32 4294901760, %v3185_v1  ;;  %v9587_v6 = vpack.c.bf16 %v3204_v42, %v3197_v21  ;;  %9585 = vmatpush3.bf16.msk.msra.mxu0 %vm12631_vm15, %v14506_v10 }
 0x1c1   : > { %v14777_v16 = vsel %vm12664_vm9, 4294967295, %v14776_v16  ;;  %v3211_v31 = vand.u32 4294901760, %v3210_v29  ;;  %v3218_v55 = vand.u32 4294901760, %v3217_v7  ;;  %v14779_v44 = vand.u32 4294901760, %v12341_v9  ;;  %9586 = vmatprep.subr.bf16.mxu0 %v14423_v51 }
 0x1c2   : > { %14778 = vst [vmem:[#allocation24_spill] sm:$0xff] %v14777_v16  ;;  %v3891_v21 = vand.u32 4294901760, %v3890_v63  ;;  %v9731_v42 = vpack.c.bf16 %v3909_v58, %v3902_v47  ;;  %v3916_v29 = vand.u32 4294901760, %v3915_v32  ;;  %v3923_v1 = vand.u32 4294901760, %v3922_v49  ;;  %9729 = vmatpush3.bf16.msk.msra.mxu1 %vm12664_vm9, %v14506_v10 }
 0x1c3   : > { %v3224_v56 = vsub.f32 %v12341_v9, %v14779_v44  ;;  %v14781_v44 = vand.u32 4294901760, %v12355_v3  ;;  %v6302_v49 = vsel %vm14774_vm10, 1.0, %v14503_v8  ;;  %9730 = vmatprep.subr.bf16.mxu1 %v14423_v51  ;;  %8179 = vmatmul.mubr.f32.vlgmr.msra.gmra.mrb[4].mxu0 %v3186_v11  ;;  %v9590_v58 = vpack.c.bf16 %v3218_v55, %v3211_v31 }
 0x1c4   : > { %v14286_v47 = vand.u32 4294901760, %v12384_v19  ;;  %9588 = vmatpush3.bf16.msra.mxu0 %v9587_v6  ;;  %v3238_v24 = vsub.f32 %v12362_v37, %v14783_v43  ;;  %v3245_v4 = vsub.f32 %v12364_v14, %v14784_v22  ;;  %8213 = vmatprep.mubr.msk.f32.mxu0 %vm14453_vm1, %v14503_v8  ;;  %v6303_v55 = vsel %vm14775_vm2, 1.0, %v14503_v8 }
 0x1c5   : > { %v3929_v7 = vsub.f32 %v12355_v3, %v14781_v44  ;;  %v3225_v32 = vand.u32 4294901760, %v3224_v56  ;;  %v3232_v44 = vand.u32 4294901760, %v3231_v40  ;;  %8389 = vmatmul.mubr.f32.vlgmr.msra.gmra.mrb[4].mxu1 %v3891_v21  ;;  %9589 = vmatprep.subr.bf16.mxu0 %v14423_v51  ;;  %v9734_v40 = vpack.c.bf16 %v3923_v1, %v3916_v29 }
 0x1c6   : > { %v14288_v11 = vand.u32 4294901760, %v12388_v34  ;;  %9732 = vmatpush3.bf16.msra.mxu1 %v9731_v42  ;;  %v3937_v31 = vand.u32 4294901760, %v3936_v48  ;;  %v14785_v22 = vand.u32 4294901760, %v12366_v36  ;;  %v14786_v63 = vand.u32 4294901760, %v12368_v18  ;;  %8423 = vmatprep.mubr.msk.f32.mxu1 %vm14453_vm1, %v14503_v8 }
 0x1c7   : > { %v3930_v56 = vand.u32 4294901760, %v3929_v7  ;;  %9733 = vmatprep.subr.bf16.mxu1 %v14423_v51  ;;  %v3252_v21 = vsub.f32 %v12384_v19, %v14286_v47  ;;  %v14787_v42 = vand.u32 4294901760, %v12386_v2  ;;  %v12730_v7 = vsub.f32 %v6235_v27, %v6235_v27 }
 0x1c8   : > { %v3943_v43 = vsub.f32 %v12366_v36, %v14785_v22  ;;  %v3950_v20 = vsub.f32 %v12368_v18, %v14786_v63  ;;  %9591 = vmatpush3.bf16.msra.mxu0 %v9590_v58  ;;  %v9593_v63 = vpack.c.bf16 %v3232_v44, %v3225_v32  ;;  %v3239_v22 = vand.u32 4294901760, %v3238_v24 }
 0x1c9   : > { %v3259_v48 = vsub.f32 %v12386_v2, %v14787_v42  ;;  %v3246_v6 = vand.u32 4294901760, %v3245_v4  ;;  %9592 = vmatprep.subr.bf16.mxu0 %v14423_v51  ;;  %v3957_v47 = vsub.f32 %v12388_v34, %v14288_v11  ;;  %v14788_v30 = vand.u32 4294901760, %v12390_v13 }
 0x1ca   : > { %v3977_v1 = vand.u32 4294901760, %v12511_v35  ;;  %v12741_v27 = vsub.f32 %v6236_v0, %v6236_v0  ;;  %9735 = vmatpush3.bf16.msra.mxu1 %v9734_v40  ;;  %v9737_v58 = vpack.c.bf16 %v3937_v31, %v3930_v56  ;;  %v3944_v24 = vand.u32 4294901760, %v3943_v43 }
 0x1cb   : > { %v3964_v42 = vsub.f32 %v12390_v13, %v14788_v30  ;;  %v3951_v4 = vand.u32 4294901760, %v3950_v20  ;;  %9736 = vmatprep.subr.bf16.mxu1 %v14423_v51  ;;  %v3253_v32 = vand.u32 4294901760, %v3252_v21  ;;  %v3260_v44 = vand.u32 4294901760, %v3259_v48 }
 0x1cc   : > { %v14789_v11 = vand.u32 4294901760, %v12498_v53  ;;  %v14790_v30 = vand.u32 4294901760, %v12500_v52  ;;  %v12750_v17 = vsub.f32 %v6302_v49, %v6302_v49  ;;  %9594 = vmatpush3.bf16.msra.mxu0 %v9593_v63  ;;  %v9596_v0 = vpack.c.bf16 %v3246_v6, %v3239_v22 }
 0x1cd   : > { %v3279_v40 = vand.u32 4294901760, %v12529_v62  ;;  %v14293_v56 = vand.u32 4294901760, %v12531_v15  ;;  %9595 = vmatprep.subr.bf16.mxu0 %v14423_v51  ;;  %v3958_v31 = vand.u32 4294901760, %v3957_v47  ;;  %v3965_v43 = vand.u32 4294901760, %v3964_v42 }
 0x1ce   : > { %v3266_v16 = vsub.f32 %v12498_v53, %v14789_v11  ;;  %v3273_v29 = vsub.f32 %v12500_v52, %v14790_v30  ;;  %v14791_v20 = vand.u32 4294901760, %v12502_v12  ;;  %v3978_v21 = vsub.f32 %v12511_v35, %v3977_v1  ;;  %9738 = vmatpush3.bf16.msra.mxu1 %v9737_v58 }
 0x1cf   : > { %v12761_v49 = vsub.f32 %v6303_v55, %v6303_v55  ;;  %v9740_v6 = vpack.c.bf16 %v3951_v4, %v3944_v24  ;;  %v14295_v48 = vand.u32 4294901760, %v12533_v25  ;;  %v14294_v63 = vand.u32 4294901760, %v12535_v61  ;;  %9739 = vmatprep.subr.bf16.mxu1 %v14423_v51 }
 0x1d0   : > { %v3971_v11 = vsub.f32 %v12502_v12, %v14791_v20  ;;  %v9599_v47 = vpack.c.bf16 %v3260_v44, %v3253_v32  ;;  %v3267_v22 = vand.u32 4294901760, %v3266_v16  ;;  %v3274_v42 = vand.u32 4294901760, %v3273_v29  ;;  %9597 = vmatpush3.bf16.msra.mxu0 %v9596_v0 }
 0x1d1   : > { %v3280_v30 = vsub.f32 %v12529_v62, %v3279_v40  ;;  %v3287_v55 = vsub.f32 %v12531_v15, %v14293_v56  ;;  %v14299_v58 = vand.u32 4294901760, %v12730_v7  ;;  %v14298_v24 = vand.u32 4294901760, %v12741_v27  ;;  %9598 = vmatprep.subr.bf16.mxu0 %v14423_v51 }
 0x1d2   : > { %v9743_v4 = vpack.c.bf16 %v3965_v43, %v3958_v31  ;;  %v3972_v20 = vand.u32 4294901760, %v3971_v11  ;;  %v3979_v32 = vand.u32 4294901760, %v3978_v21  ;;  %9741 = vmatpush3.bf16.msra.mxu1 %v9740_v6  ;;  %v3985_v16 = vsub.f32 %v12533_v25, %v14295_v48 }
 0x1d3   : > { %v3992_v29 = vsub.f32 %v12535_v61, %v14294_v63  ;;  %v14297_v44 = vand.u32 4294901760, %v12750_v17  ;;  %v14296_v0 = vand.u32 4294901760, %v12761_v49  ;;  %9742 = vmatprep.subr.bf16.mxu1 %v14423_v51  ;;  %v9602_v56 = vpack.c.bf16 %v3274_v42, %v3267_v22 }
 0x1d4   : > { %9600 = vmatpush3.bf16.msra.mxu0 %v9599_v47  ;;  %v3281_v31 = vand.u32 4294901760, %v3280_v30  ;;  %v3288_v43 = vand.u32 4294901760, %v3287_v55  ;;  %v3294_v11 = vsub.f32 %v12730_v7, %v14299_v58  ;;  %v3301_v21 = vsub.f32 %v12741_v27, %v14298_v24 }
 0x1d5   : > { %9601 = vmatprep.subr.bf16.mxu0 %v14423_v51  ;;  %v9746_v6 = vpack.c.bf16 %v3979_v32, %v3972_v20  ;;  %v3986_v63 = vand.u32 4294901760, %v3985_v16  ;;  %v3993_v48 = vand.u32 4294901760, %v3992_v29  ;;  %v3999_v47 = vsub.f32 %v12750_v17, %v14297_v44 }
 0x1d6   : > { %9744 = vmatpush3.bf16.msra.mxu1 %v9743_v4  ;;  %v4006_v22 = vsub.f32 %v12761_v49, %v14296_v0  ;;  %v9605_v42 = vpack.c.bf16 %v3288_v43, %v3281_v31  ;;  %v3295_v30 = vand.u32 4294901760, %v3294_v11  ;;  %v3302_v55 = vand.u32 4294901760, %v3301_v21 }
 0x1d7   : > { %9745 = vmatprep.subr.bf16.mxu1 %v14423_v51  ;;  %v9749_v4 = vpack.c.bf16 %v3993_v48, %v3986_v63  ;;  %v4000_v20 = vand.u32 4294901760, %v3999_v47  ;;  %v9755_v48 = vpack.c.bf16 %v12208_v41, %v12194_v33  ;;  %v9614_v63 = vpack.c.bf16 %v12212_v26, %v12210_v60 }
 0x1d8   : > { %9603 = vmatpush3.bf16.msra.mxu0 %v9602_v56  ;;  %v4007_v32 = vand.u32 4294901760, %v4006_v22  ;;  %v9608_v16 = vpack.c.bf16 %v3302_v55, %v3295_v30  ;;  %v9611_v56 = vpack.c.bf16 %v12192_v5, %v12190_v45  ;;  %v9758_v31 = vpack.c.bf16 %v12219_v57, %v12217_v54 }
 0x1d9   : > { %9604 = vmatprep.subr.bf16.mxu0 %v14423_v51  ;;  %v9617_v43 = vpack.c.bf16 %v12343_v50, %v12341_v9  ;;  %v9761_v11 = vpack.c.bf16 %v12357_v23, %v12355_v3  ;;  %v9620_v21 = vpack.c.bf16 %v12364_v14, %v12362_v37  ;;  %v9623_v47 = vpack.c.bf16 %v12386_v2, %v12384_v19 }
 0x1da   : > { %9747 = vmatpush3.bf16.msra.mxu1 %v9746_v6  ;;  %v9752_v29 = vpack.c.bf16 %v4007_v32, %v4000_v20  ;;  %v9764_v6 = vpack.c.bf16 %v12368_v18, %v12366_v36  ;;  %v9767_v22 = vpack.c.bf16 %v12390_v13, %v12388_v34  ;;  %v9770_v30 = vpack.c.bf16 %v12511_v35, %v12502_v12 }
 0x1db   : > { %9748 = vmatprep.subr.bf16.mxu1 %v14423_v51  ;;  %v9629_v55 = vpack.c.bf16 %v12531_v15, %v12529_v62  ;;  %v9632_v20 = vpack.c.bf16 %v12741_v27, %v12730_v7  ;;  %v9776_v32 = vpack.c.bf16 %v12761_v49, %v12750_v17  ;;  %v14814_v0 = vand.u32 4294901760, %v12194_v33 }
 0x1dc   : > { %9606 = vmatpush3.bf16.msra.mxu0 %v9605_v42  ;;  %v9626_v42 = vpack.c.bf16 %v12500_v52, %v12498_v53  ;;  %v14815_v44 = vand.u32 4294901760, %v12208_v41  ;;  %v14816_v58 = vand.u32 4294901760, %v12505_v59  ;;  %v14820_v33 = vand.u32 4294901760, %v12217_v54 }
 0x1dd   : > { %9607 = vmatprep.subr.bf16.mxu0 %v14423_v51  ;;  %v14821_v41 = vand.u32 4294901760, %v12219_v57  ;;  %v14825_v54 = vand.u32 4294901760, %v12357_v23  ;;  %v14831_v23 = vand.u32 4294901760, %v12386_v2  ;;  %v14841_v35 = vand.u32 4294901760, %v12741_v27 }
 0x1de   : > { %9750 = vmatpush3.bf16.msra.mxu1 %v9749_v4  ;;  %v9773_v4 = vpack.c.bf16 %v12535_v61, %v12533_v25  ;;  %v9803_v24 = vpack.c.bf16 %v14815_v44, %v14814_v0  ;;  %v14827_v44 = vand.u32 4294901760, %v12364_v14  ;;  %v14833_v14 = vand.u32 4294901760, %v12390_v13 }
 0x1df   : > { %9751 = vmatprep.subr.bf16.mxu1 %v14423_v51  ;;  %v14842_v62 = vand.u32 4294901760, %v12750_v17  ;;  %v13073_v17 = vld [vmem:[%s10300_s23 + $0x7] ss:$0 sm:$0xff] }
 0x1e0   : > { %9609 = vmatpush3.bf16.msra.mxu0 %v9608_v16 }
 0x1e1   : > { %9610 = vmatprep.subr.bf16.mxu0 %v14423_v51 }
 0x1e2   : > { %9753 = vmatpush3.bf16.msra.mxu1 %v9752_v29  ;;  %v14847_v29 = vld [vmem:[#allocation5_spill] sm:$0xff] }
 0x1e3   : > { %9754 = vmatprep.subr.bf16.mxu1 %v14423_v51  ;;  %8214 = vmatmul.mubr.f32.vlgmr.msra.gmra.mrb[4].mxu0 %v12423_v28 }
 0x1e4   : > { %9612 = vmatpush3.bf16.msra.mxu0 %v9611_v56  ;;  %8248 = vmatprep.mubr.msk.f32.mxu0 %vm14453_vm1, %v14503_v8  ;;  %v14848_v56 = vld [vmem:[#allocation6_spill] sm:$0xff] }
 0x1e5   : > { %8424 = vmatmul.mubr.f32.vlgmr.msra.gmra.mrb[4].mxu1 %v12440_v46  ;;  %9613 = vmatprep.subr.bf16.mxu0 %v14423_v51 }
 0x1e6   : > { %9756 = vmatpush3.bf16.msra.mxu1 %v9755_v48  ;;  %8458 = vmatprep.mubr.msk.f32.mxu1 %vm14453_vm1, %v14503_v8 }
 0x1e7   : > { %9757 = vmatprep.subr.bf16.mxu1 %v14423_v51 }
 0x1e8   : > { %9615 = vmatpush3.bf16.msra.mxu0 %v9614_v63 }
 0x1e9   : > { %9616 = vmatprep.subr.bf16.mxu0 %v14423_v51 }
 0x1ea   : > { %9759 = vmatpush3.bf16.msra.mxu1 %v9758_v31 }
 0x1eb   : > { %9760 = vmatprep.subr.bf16.mxu1 %v14423_v51 }
 0x1ec   : > { %9618 = vmatpush3.bf16.msra.mxu0 %v9617_v43 }
 0x1ed   : > { %9619 = vmatprep.subr.bf16.mxu0 %v14423_v51 }
 0x1ee   : > { %9762 = vmatpush3.bf16.msra.mxu1 %v9761_v11 }
 0x1ef   : > { %9763 = vmatprep.subr.bf16.mxu1 %v14423_v51 }
 0x1f0   : > { %9621 = vmatpush3.bf16.msra.mxu0 %v9620_v21  ;;  %v14800_v21 = vld [vmem:[#allocation13_spill] sm:$0xff] }
 0x1f1   : > { %9622 = vmatprep.subr.bf16.mxu0 %v14423_v51  ;;  %vm14801_vm6 = vnez %v14800_v21 }
 0x1f2   : > { %9765 = vmatpush3.bf16.msra.mxu1 %v9764_v6  ;;  %v14802_v6 = vld [vmem:[#allocation7_spill] sm:$0xff] }
 0x1f3   : > { %9766 = vmatprep.subr.bf16.mxu1 %v14423_v51  ;;  %vm14803_vm7 = vnez %v14802_v6 }
 0x1f4   : > { %9624 = vmatpush3.bf16.msra.mxu0 %v9623_v47  ;;  %v14804_v47 = vld [vmem:[#allocation22_spill] sm:$0xff] }
 0x1f5   : > { %9625 = vmatprep.subr.bf16.mxu0 %v14423_v51  ;;  %vm14805_vm10 = vnez %v14804_v47 }
 0x1f6   : > { %9768 = vmatpush3.bf16.msra.mxu1 %v9767_v22  ;;  %v14806_v22 = vld [vmem:[#allocation8_spill] sm:$0xff] }
 0x1f7   : > { %9769 = vmatprep.subr.bf16.mxu1 %v14423_v51  ;;  %vm14807_vm2 = vnez %v14806_v22 }
 0x1f8   : > { %9627 = vmatpush3.bf16.msra.mxu0 %v9626_v42  ;;  %v14808_v42 = vld [vmem:[#allocation14_spill] sm:$0xff] }
 0x1f9   : > { %9628 = vmatprep.subr.bf16.mxu0 %v14423_v51 }
 0x1fa   : > { %9771 = vmatpush3.bf16.msra.mxu1 %v9770_v30 }
 0x1fb   : > { %9772 = vmatprep.subr.bf16.mxu1 %v14423_v51 }
 0x1fc   : > { %9630 = vmatpush3.bf16.msra.mxu0 %v9629_v55  ;;  %v14811_v55 = vand.u32 4294901760, %v12190_v45  ;;  %v14817_v45 = vand.u32 4294901760, %v12210_v60  ;;  %v14822_v60 = vand.u32 4294901760, %v12341_v9  ;;  %v14828_v9 = vand.u32 4294901760, %v12366_v36 }
 0x1fd   : > { %9631 = vmatprep.subr.bf16.mxu0 %v14423_v51  ;;  %v14834_v36 = vand.u32 4294901760, %v12498_v53  ;;  %v14839_v53 = vand.u32 4294901760, %v12535_v61  ;;  %v14845_v61 = vld [vmem:[#allocation3_spill] sm:$0xff] }
 0x1fe   : > { %9774 = vmatpush3.bf16.msra.mxu1 %v9773_v4  ;;  %v14812_v4 = vand.u32 4294901760, %v12192_v5  ;;  %v14818_v5 = vand.u32 4294901760, %v12212_v26  ;;  %v14823_v26 = vand.u32 4294901760, %v12343_v50  ;;  %v14829_v50 = vand.u32 4294901760, %v12368_v18 }
 0x1ff   : > { %9775 = vmatprep.subr.bf16.mxu1 %v14423_v51  ;;  %v14835_v18 = vand.u32 4294901760, %v12500_v52  ;;  %v14838_v52 = vand.u32 4294901760, %v12533_v25  ;;  %v14846_v25 = vld [vmem:[#allocation4_spill] sm:$0xff] }
 0x200   : > { %9633 = vmatpush3.bf16.msra.mxu0 %v9632_v20  ;;  %v9659_v20 = vpack.c.bf16 %v14812_v4, %v14811_v55  ;;  %v9662_v55 = vpack.c.bf16 %v14818_v5, %v14817_v45  ;;  %v14819_v4 = vand.u32 4294901760, %v12514_v39 }
 0x201   : > { %9634 = vmatprep.subr.bf16.mxu0 %v14423_v51 }
 0x202   : > { %9777 = vmatpush3.bf16.msra.mxu1 %v9776_v32 }
 0x203   : > { %9778 = vmatprep.subr.bf16.mxu1 %v14423_v51  ;;  %8249 = vmatmul.mubr.f32.vlgmr.msra.gmra.mrb[4].mxu0 %v12505_v59  ;;  %v9806_v59 = vpack.c.bf16 %v14821_v41, %v14820_v33  ;;  %v14854_v41 = vld [vmem:[#allocation11_spill] sm:$0xff] }
 0x204   : > { %9636 = vmatpush3.bf16.msk.msra.mxu0 %vm12175_vm12, %v14506_v10  ;;  %8283 = vmatprep.mubr.msk.f32.mxu0 %vm14453_vm1, %v14503_v8 }
 0x205   : > { %8459 = vmatmul.mubr.f32.vlgmr.msra.gmra.mrb[4].mxu1 %v12514_v39  ;;  %9637 = vmatprep.subr.bf16.mxu0 %v14423_v51  ;;  %v9665_v39 = vpack.c.bf16 %v14823_v26, %v14822_v60  ;;  %v14856_v60 = vmov 0 }
 0x206   : > { %9780 = vmatpush3.bf16.msk.msra.mxu1 %vm12204_vm11, %v14506_v10  ;;  %8493 = vmatprep.mubr.msk.f32.mxu1 %vm14453_vm1, %v14503_v8 }
 0x207   : > { %9781 = vmatprep.subr.bf16.mxu1 %v14423_v51 }
 0x208   : > { %9639 = vmatpush3.bf16.msk.msra.mxu0 %vm12233_vm4, %v14506_v10 }
 0x209   : > { %9640 = vmatprep.subr.bf16.mxu0 %v14423_v51 }
 0x20a   : > { %9783 = vmatpush3.bf16.msk.msra.mxu1 %vm12271_vm14, %v14506_v10 }
 0x20b   : > { %9784 = vmatprep.subr.bf16.mxu1 %v14423_v51 }
 0x20c   : > { %9642 = vmatpush3.bf16.msk.msra.mxu0 %vm12309_vm5, %v14506_v10 }
 0x20d   : > { %9643 = vmatprep.subr.bf16.mxu0 %v14423_v51 }
 0x20e   : > { %9786 = vmatpush3.bf16.msk.msra.mxu1 %vm12351_vm8, %v14506_v10 }
 0x20f   : > { %9787 = vmatprep.subr.bf16.mxu1 %v14423_v51 }
 0x210   : > { %9645 = vmatpush3.bf16.msk.msra.mxu0 %vm12380_vm3, %v14506_v10 }
 0x211   : > { %9646 = vmatprep.subr.bf16.mxu0 %v14423_v51 }
 0x212   : > { %9789 = vmatpush3.bf16.msk.msra.mxu1 %vm12413_vm13, %v14506_v10 }
 0x213   : > { %9790 = vmatprep.subr.bf16.mxu1 %v14423_v51 }
 0x214   : > { %9648 = vmatpush3.bf16.msk.msra.mxu0 %vm12449_vm0, %v14506_v10 }
 0x215   : > { %9649 = vmatprep.subr.bf16.mxu0 %v14423_v51 }
 0x216   : > { %9792 = vmatpush3.bf16.msk.msra.mxu1 %vm14801_vm6, %v14506_v10  ;;  %vm14809_vm6 = vnez %v14808_v42  ;;  %v14851_v42 = vmov 0 }
 0x217   : > { %9793 = vmatprep.subr.bf16.mxu1 %v14423_v51 }
 0x218   : > { %9651 = vmatpush3.bf16.msk.msra.mxu0 %vm14803_vm7, %v14506_v10 }
 0x219   : > { %9652 = vmatprep.subr.bf16.mxu0 %v14423_v51 }
 0x21a   : > { %9795 = vmatpush3.bf16.msk.msra.mxu1 %vm14805_vm10, %v14506_v10 }
 0x21b   : > { %9796 = vmatprep.subr.bf16.mxu1 %v14423_v51 }
 0x21c   : > { %9654 = vmatpush3.bf16.msk.msra.mxu0 %vm14807_vm2, %v14506_v10 }
 0x21d   : > { %9655 = vmatprep.subr.bf16.mxu0 %v14423_v51 }
 0x21e   : > { %9798 = vmatpush3.bf16.msk.msra.mxu1 %vm14809_vm6, %v14506_v10 }
 0x21f   : > { %9799 = vmatprep.subr.bf16.mxu1 %v14423_v51 }
 0x220   : > { %9657 = vmatpush3.bf16.msk.msra.mxu0 %vm12631_vm15, %v14506_v10 }
 0x221   : > { %9658 = vmatprep.subr.bf16.mxu0 %v14423_v51 }
 0x222   : > { %9801 = vmatpush3.bf16.msk.msra.mxu1 %vm12664_vm9, %v14506_v10 }
 0x223   : > { %9802 = vmatprep.subr.bf16.mxu1 %v14423_v51  ;;  %8284 = vmatmul.mubr.f32.vlgmr.msra.gmra.mrb[4].mxu0 %v14816_v58  ;;  %v14824_v58 = vand.u32 4294901760, %v12355_v3  ;;  %v14830_v3 = vand.u32 4294901760, %v12384_v19  ;;  %v14836_v19 = vand.u32 4294901760, %v12502_v12  ;;  %v14840_v12 = vand.u32 4294901760, %v12730_v7 }
 0x224   : > { %9660 = vmatpush3.bf16.msra.mxu0 %v9659_v20  ;;  %8318 = vmatprep.mubr.msk.f32.mxu0 %vm14453_vm1, %v14503_v8  ;;  %v9812_v20 = vpack.c.bf16 %v14829_v50, %v14828_v9 }
 0x225   : > { %8494 = vmatmul.mubr.f32.vlgmr.msra.gmra.mrb[4].mxu1 %v14819_v4  ;;  %9661 = vmatprep.subr.bf16.mxu0 %v14423_v51  ;;  %v9809_v57 = vpack.c.bf16 %v14825_v54, %v14824_v58  ;;  %v9671_v45 = vpack.c.bf16 %v14831_v23, %v14830_v3  ;;  %v9818_v2 = vpack.c.bf16 %v3977_v1, %v14836_v19  ;;  %v14859_v54 = vld [vmem:[#allocation15_spill] sm:$0xff]  ;;  %v14865_v3 = vld [vmem:[#allocation18_spill] sm:$0xff]  ;;  %v14866_v23 = vmov 0 }
 0x226   : > { %9804 = vmatpush3.bf16.msra.mxu1 %v9803_v24  ;;  %8528 = vmatprep.mubr.msk.f32.mxu1 %vm14453_vm1, %v14503_v8  ;;  %v14826_v24 = vand.u32 4294901760, %v12362_v37  ;;  %v14832_v37 = vand.u32 4294901760, %v12388_v34  ;;  %v14837_v34 = vand.u32 4294901760, %v12531_v15  ;;  %v9821_v4 = vpack.c.bf16 %v14839_v53, %v14838_v52 }
 0x227   : > { %9805 = vmatprep.subr.bf16.mxu1 %v14423_v51  ;;  %v9680_v1 = vpack.c.bf16 %v14841_v35, %v14840_v12  ;;  %v14843_v15 = vand.u32 4294901760, %v12761_v49  ;;  %v6371_v35 = vld [vmem:[%s14055_s2 + $0x30] sm:$0xff] }
 0x228   : > { %9663 = vmatpush3.bf16.msra.mxu0 %v9662_v55  ;;  %v9668_v0 = vpack.c.bf16 %v14827_v44, %v14826_v24  ;;  %v9815_v5 = vpack.c.bf16 %v14833_v14, %v14832_v37  ;;  %v9674_v55 = vpack.c.bf16 %v14835_v18, %v14834_v36  ;;  %v9677_v13 = vpack.c.bf16 %v14837_v34, %v3279_v40 }
 0x229   : > { %9664 = vmatprep.subr.bf16.mxu0 %v14423_v51  ;;  %v9824_v40 = vpack.c.bf16 %v14843_v15, %v14842_v62  ;;  %v14861_v24 = vmov 0 }
 0x22a   : > { %9807 = vmatpush3.bf16.msra.mxu1 %v9806_v59  ;;  %v14855_v59 = vld [vmem:[#allocation12_spill] sm:$0xff] }
 0x22b   : > { %9808 = vmatprep.subr.bf16.mxu1 %v14423_v51 }
 0x22c   : > { %9666 = vmatpush3.bf16.msra.mxu0 %v9665_v39 }
 0x22d   : > { %9667 = vmatprep.subr.bf16.mxu0 %v14423_v51 }
 0x22e   : > { %9810 = vmatpush3.bf16.msra.mxu1 %v9809_v57  ;;  %v14860_v57 = vld [vmem:[#allocation16_spill] sm:$0xff] }
 0x22f   : > { %9811 = vmatprep.subr.bf16.mxu1 %v14423_v51 }
 0x230   : > { %9669 = vmatpush3.bf16.msra.mxu0 %v9668_v0 }
 0x231   : > { %9670 = vmatprep.subr.bf16.mxu0 %v14423_v51 }
 0x232   : > { %9813 = vmatpush3.bf16.msra.mxu1 %v9812_v20  ;;  %v14864_v20 = vld [vmem:[#allocation17_spill] sm:$0xff] }
 0x233   : > { %9814 = vmatprep.subr.bf16.mxu1 %v14423_v51 }
 0x234   : > { %9672 = vmatpush3.bf16.msra.mxu0 %v9671_v45 }
 0x235   : > { %9673 = vmatprep.subr.bf16.mxu0 %v14423_v51 }
 0x236   : > { %9816 = vmatpush3.bf16.msra.mxu1 %v9815_v5 }
 0x237   : > { %9817 = vmatprep.subr.bf16.mxu1 %v14423_v51 }
 0x238   : > { %9675 = vmatpush3.bf16.msra.mxu0 %v9674_v55  ;;  %v14869_v55 = vmov 0 }
 0x239   : > { %9676 = vmatprep.subr.bf16.mxu0 %v14423_v51 }
 0x23a   : > { %9819 = vmatpush3.bf16.msra.mxu1 %v9818_v2 }
 0x23b   : > { %9820 = vmatprep.subr.bf16.mxu1 %v14423_v51 }
 0x23c   : > { %9678 = vmatpush3.bf16.msra.mxu0 %v9677_v13 }
 0x23d   : > { %9679 = vmatprep.subr.bf16.mxu0 %v14423_v51 }
 0x23e   : > { %9822 = vmatpush3.bf16.msra.mxu1 %v9821_v4 }
 0x23f   : > { %9823 = vmatprep.subr.bf16.mxu1 %v14423_v51 }
 0x240   : > { %9681 = vmatpush3.bf16.msra.mxu0 %v9680_v1  ;;  %v14872_v1 = vmov 0 }
 0x241   : > { %9682 = vmatprep.subr.bf16.mxu0 %v14423_v51 }
 0x242   : > { %9825 = vmatpush3.bf16.msra.mxu1 %v9824_v40  ;;  %v14875_v40 = vld [vmem:[#allocation20_spill] sm:$0xff] }
 0x243   : > { %9826 = vmatprep.subr.bf16.mxu1 %v14423_v51  ;;  %8319 = vmatmul.mubr.f32.vlgmr.msra.gmra.mrb[4].mxu0 %v12423_v28 }
 0x244   : > { %9684 = vmatpush3.bf16.msk.msra.mxu0 %vm12175_vm12, %v14506_v10  ;;  %8353 = vmatprep.mubr.msk.f32.mxu0 %vm14453_vm1, %v14503_v8  ;;  %vm14844_vm12 = vnez %v14800_v21 }
 0x245   : > { %8529 = vmatmul.mubr.f32.vlgmr.msra.gmra.mrb[4].mxu1 %v12440_v46  ;;  %9685 = vmatprep.subr.bf16.mxu0 %v14423_v51 }
 0x246   : > { %9828 = vmatpush3.bf16.msk.msra.mxu1 %vm12204_vm11, %v14506_v10  ;;  %8563 = vmatprep.mubr.msk.f32.mxu1 %vm14453_vm1, %v14503_v8  ;;  %vm4461_vm11 = vcmp.eq.s32.totalorder %v14845_v61, %v13070_v38 }
 0x247   : > { %9829 = vmatprep.subr.bf16.mxu1 %v14423_v51  ;;  %v6355_v7 = vsel %vm4461_vm11, 1.0, %v14503_v8 }
 0x248   : > { %9687 = vmatpush3.bf16.msk.msra.mxu0 %vm12233_vm4, %v14506_v10  ;;  %vm4462_vm4 = vcmp.eq.s32.totalorder %v14846_v25, %v13070_v38  ;;  %v13149_v21 = vsub.f32 %v6355_v7, %v6355_v7 }
 0x249   : > { %9688 = vmatprep.subr.bf16.mxu0 %v14423_v51  ;;  %v6356_v27 = vsel %vm4462_vm4, 1.0, %v14503_v8 }
 0x24a   : > { %9831 = vmatpush3.bf16.msk.msra.mxu1 %vm12271_vm14, %v14506_v10  ;;  %vm5166_vm14 = vcmp.eq.s32.totalorder %v14845_v61, %v13073_v17  ;;  %v13151_v6 = vsub.f32 %v6356_v27, %v6356_v27  ;;  %v14876_v61 = vld [vmem:[#allocation21_spill] sm:$0xff] }
 0x24b   : > { %9832 = vmatprep.subr.bf16.mxu1 %v14423_v51  ;;  %v6422_v49 = vsel %vm5166_vm14, 1.0, %v14503_v8 }
 0x24c   : > { %9690 = vmatpush3.bf16.msk.msra.mxu0 %vm12309_vm5, %v14506_v10  ;;  %vm5167_vm5 = vcmp.eq.s32.totalorder %v14846_v25, %v13073_v17  ;;  %v13153_v47 = vsub.f32 %v6422_v49, %v6422_v49  ;;  %v6438_v25 = vld [vmem:[%s14055_s2 + $0x38] sm:$0xff]  ;;  %v14879_v49 = vmov 0 }
 0x24d   : > { %9691 = vmatprep.subr.bf16.mxu0 %v14423_v51  ;;  %v6423_v16 = vsel %vm5167_vm5, 1.0, %v14503_v8 }
 0x24e   : > { %9834 = vmatpush3.bf16.msk.msra.mxu1 %vm12351_vm8, %v14506_v10  ;;  %vm4464_vm8 = vcmp.eq.s32.totalorder %v14848_v56, %v13070_v38  ;;  %v13155_v22 = vsub.f32 %v6423_v16, %v6423_v16  ;;  %v14882_v16 = vld [vmem:[#allocation28_spill] sm:$0xff] }
 0x24f   : > { %9835 = vmatprep.subr.bf16.mxu1 %v14423_v51  ;;  %v6358_v63 = vsel %vm4464_vm8, 1.0, %v14503_v8 }
 0x250   : > { %9693 = vmatpush3.bf16.msk.msra.mxu0 %vm12380_vm3, %v14506_v10  ;;  %vm5168_vm3 = vcmp.eq.s32.totalorder %v14847_v29, %v13073_v17  ;;  %v13171_v32 = vsub.f32 %v6358_v63, %v6358_v63 }
 0x251   : > { %9694 = vmatprep.subr.bf16.mxu0 %v14423_v51  ;;  %v6424_v31 = vsel %vm5168_vm3, 1.0, %v14503_v8 }
 0x252   : > { %9837 = vmatpush3.bf16.msk.msra.mxu1 %vm12413_vm13, %v14506_v10  ;;  %vm4463_vm13 = vcmp.eq.s32.totalorder %v14847_v29, %v13070_v38  ;;  %v13173_v33 = vsub.f32 %v6424_v31, %v6424_v31  ;;  %v14883_v29 = vld [vmem:[#allocation31_spill] sm:$0xff] }
 0x253   : > { %9838 = vmatprep.subr.bf16.mxu1 %v14423_v51  ;;  %v6357_v48 = vsel %vm4463_vm13, 1.0, %v14503_v8 }
 0x254   : > { %9696 = vmatpush3.bf16.msk.msra.mxu0 %vm12449_vm0, %v14506_v10  ;;  %vm5169_vm0 = vcmp.eq.s32.totalorder %v14848_v56, %v13073_v17  ;;  %v13169_v30 = vsub.f32 %v6357_v48, %v6357_v48  ;;  %v13390_v56 = vand.u32 4294901760, %v6371_v35 }
 0x255   : > { %9697 = vmatprep.subr.bf16.mxu0 %v14423_v51  ;;  %v6425_v11 = vsel %vm5169_vm0, 1.0, %v14503_v8 }
 0x256   : > { %9840 = vmatpush3.bf16.msk.msra.mxu1 %vm14844_vm12, %v14506_v10  ;;  %vm5171_vm12 = vcmp.eq.s32.totalorder %v14855_v59, %v13073_v17 }
 0x257   : > { %9841 = vmatprep.subr.bf16.mxu1 %v14423_v51  ;;  %v6427_v58 = vsel %vm5171_vm12, 1.0, %v14503_v8 }
 0x258   : > { %9699 = vmatpush3.bf16.msk.msra.mxu0 %vm14803_vm7, %v14506_v10  ;;  %vm4466_vm7 = vcmp.eq.s32.totalorder %v14855_v59, %v13070_v38  ;;  %v13316_v2 = vsub.f32 %v6427_v58, %v6427_v58 }
 0x259   : > { %9700 = vmatprep.subr.bf16.mxu0 %v14423_v51 }
 0x25a   : > { %9843 = vmatpush3.bf16.msk.msra.mxu1 %vm14805_vm10, %v14506_v10  ;;  %vm13194_vm10 = vmpackc.low %vm4464_vm8, %vm4463_vm13  ;;  %vm14300_vm13 = vcmp.eq.s32.totalorder %v14860_v57, %v13073_v17  ;;  %vm14307_vm8 = vcmp.eq.s32.totalorder %v14864_v20, %v13070_v38 }
 0x25b   : > { %9844 = vmatprep.subr.bf16.mxu1 %v14423_v51  ;;  %v14857_v60 = vsel %vm13194_vm10, 4294967295, %v14856_v60  ;;  %v6429_v50 = vsel %vm14300_vm13, 1.0, %v14503_v8  ;;  %v6363_v45 = vsel %vm14307_vm8, 1.0, %v14503_v8  ;;  %vm14303_vm13 = vcmp.eq.s32.totalorder %v14864_v20, %v13073_v17 }
 0x25c   : > { %9702 = vmatpush3.bf16.msk.msra.mxu0 %vm14807_vm2, %v14506_v10  ;;  %14858 = vst [vmem:[#allocation26_spill] sm:$0xff] %v14857_v60  ;;  %vm5170_vm2 = vcmp.eq.s32.totalorder %v14854_v41, %v13073_v17  ;;  %v6430_v36 = vsel %vm14303_vm13, 1.0, %v14503_v8  ;;  %v13327_v53 = vsub.f32 %v6429_v50, %v6429_v50  ;;  %v13329_v4 = vsub.f32 %v6363_v45, %v6363_v45 }
 0x25d   : > { %9703 = vmatprep.subr.bf16.mxu0 %v14423_v51  ;;  %v6426_v39 = vsel %vm5170_vm2, 1.0, %v14503_v8  ;;  %v13347_v62 = vsub.f32 %v6430_v36, %v6430_v36  ;;  %vm14878_vm13 = vcmp.eq.s32.totalorder %v14860_v57, %v13073_v17  ;;  %vm14312_vm8 = vcmp.eq.s32.totalorder %v14882_v16, %v13073_v17 }
 0x25e   : > { %9846 = vmatpush3.bf16.msk.msra.mxu1 %vm14809_vm6, %v14506_v10  ;;  %vm13165_vm6 = vmpackc.low %vm5167_vm5, %vm5166_vm14  ;;  %vm14301_vm5 = vcmp.eq.s32.totalorder %v14859_v54, %v13073_v17  ;;  %v13314_v19 = vsub.f32 %v6426_v39, %v6426_v39  ;;  %v6434_v39 = vsel %vm14312_vm8, 1.0, %v14503_v8  ;;  %v13461_v45 = vsub.f32 %v6371_v35, %v13390_v56 }
 0x25f   : > { %9847 = vmatprep.subr.bf16.mxu1 %v14423_v51  ;;  %v14852_v42 = vsel %vm13165_vm6, 4294967295, %v14851_v42  ;;  %vm13234_vm14 = vmpackc.low %vm5169_vm0, %vm5168_vm3  ;;  %v6428_v9 = vsel %vm14301_vm5, 1.0, %v14503_v8  ;;  %vm14306_vm3 = vcmp.eq.s32.totalorder %v14865_v3, %v13070_v38  ;;  %vm14302_vm5 = vcmp.eq.s32.totalorder %v14865_v3, %v13073_v17 }
 0x260   : > { %9705 = vmatpush3.bf16.msk.msra.mxu0 %vm12631_vm15, %v14506_v10  ;;  %vm13138_vm15 = vmpackc.low %vm4462_vm4, %vm4461_vm11  ;;  %14853 = vst [vmem:[#allocation25_spill] sm:$0xff] %v14852_v42  ;;  %vm4467_vm11 = vcmp.eq.s32.totalorder %v14859_v54, %v13070_v38  ;;  %vm4468_vm4 = vcmp.eq.s32.totalorder %v14860_v57, %v13070_v38  ;;  %v14862_v24 = vsel %vm13234_vm14, 4294967295, %v14861_v24  ;;  %v6364_v37 = vsel %vm14306_vm3, 1.0, %v14503_v8 }
 0x261   : > { %9850 = vmatprep.subr.bf16.mxu0 %v14423_v51  ;;  %14863 = vst [vmem:[#allocation27_spill] sm:$0xff] %v14862_v24  ;;  %v6361_v44 = vsel %vm4467_vm11, 1.0, %v14503_v8  ;;  %v6362_v0 = vsel %vm4468_vm4, 1.0, %v14503_v8  ;;  %v6431_v18 = vsel %vm14302_vm5, 1.0, %v14503_v8  ;;  %v13325_v52 = vsub.f32 %v6428_v9, %v6428_v9 }
 0x262   : > { %9849 = vmatpush3.bf16.msk.msra.mxu1 %vm12664_vm9, %v14506_v10  ;;  %vm4465_vm9 = vcmp.eq.s32.totalorder %v14854_v41, %v13070_v38  ;;  %v13318_v34 = vsub.f32 %v6361_v44, %v6361_v44  ;;  %v13320_v13 = vsub.f32 %v6362_v0, %v6362_v0  ;;  %v13331_v12 = vsub.f32 %v6364_v37, %v6364_v37 }
 0x263   : > { %8354 = vmatmul.mubr.f32.vlgmr.msra.gmra.mrb[4].mxu0 %v12423_v28  ;;  %9994 = vmatprep.subr.bf16.mxu1 %v14423_v51  ;;  %v13178_v28 = vsub.f32 %v6425_v11, %v6425_v11  ;;  %v6359_v26 = vsel %vm4465_vm9, 1.0, %v14503_v8  ;;  %vm13272_vm0 = vmpackc.low %vm4466_vm7, %vm4465_vm9  ;;  %v13349_v15 = vsub.f32 %v6431_v18, %v6431_v18  ;;  %vm14877_vm5 = vcmp.eq.s32.totalorder %v14859_v54, %v13073_v17 }
 0x264   : > { %9852 = vmatpush3.bf16.msk.msra.mxu0 %vm13138_vm15, %v14506_v10  ;;  %8598 = vmatprep.mubr.msk.f32.mxu0 %vm14453_vm1, %v14503_v8  ;;  %v14867_v23 = vsel %vm13272_vm0, 4294967295, %v14866_v23  ;;  %v13291_v14 = vsub.f32 %v6359_v26, %v6359_v26  ;;  %vm13310_vm9 = vmpackc.low %vm5171_vm12, %vm5170_vm2  ;;  %vm14304_vm2 = vcmp.eq.s32.totalorder %v14875_v40, %v13070_v38  ;;  %vm14305_vm12 = vcmp.eq.s32.totalorder %v14876_v61, %v13070_v38 }
 0x265   : > { %8564 = vmatmul.mubr.f32.vlgmr.msra.gmra.mrb[4].mxu1 %v12440_v46  ;;  %9853 = vmatprep.subr.bf16.mxu0 %v14423_v51  ;;  %v6360_v46 = vsel %vm4466_vm7, 1.0, %v14503_v8  ;;  %14868 = vst [vmem:[#allocation29_spill] sm:$0xff] %v14867_v23  ;;  %v14870_v55 = vsel %vm13310_vm9, 4294967295, %v14869_v55  ;;  %vm13343_vm7 = vmpackc.low %vm4468_vm4, %vm4467_vm11  ;;  %v6365_v7 = vsel %vm14304_vm2, 1.0, %v14503_v8  ;;  %v6366_v27 = vsel %vm14305_vm12, 1.0, %v14503_v8 }
 0x266   : > { %9996 = vmatpush3.bf16.msk.msra.mxu1 %vm13165_vm6, %v14506_v10  ;;  %8808 = vmatprep.mubr.msk.f32.mxu1 %vm14453_vm1, %v14503_v8  ;;  %v13293_v5 = vsub.f32 %v6360_v46, %v6360_v46  ;;  %14871 = vst [vmem:[#allocation30_spill] sm:$0xff] %v14870_v55  ;;  %v14873_v1 = vsel %vm13343_vm7, 4294967295, %v14872_v1  ;;  %vm14308_vm11 = vcmp.eq.s32.totalorder %v14875_v40, %v13073_v17  ;;  %vm13380_vm2 = vmpackc.low %vm14878_vm13, %vm14877_vm5  ;;  %v13407_v11 = vand.u32 4294901760, %v6438_v25 }
 0x267   : > { %9997 = vmatprep.subr.bf16.mxu1 %v14423_v51  ;;  %14874 = vst [vmem:[#allocation33_spill] sm:$0xff] %v14873_v1  ;;  %vm14313_vm4 = vcmp.eq.s32.totalorder %v14876_v61, %v13073_v17  ;;  %v14880_v49 = vsel %vm13380_vm2, 4294967295, %v14879_v49  ;;  %vm14309_vm12 = vcmp.eq.s32.totalorder %v14882_v16, %v13070_v38  ;;  %vm14310_vm3 = vcmp.eq.s32.totalorder %v14883_v29, %v13070_v38 }
 0x268   : > { %9855 = vmatpush3.bf16.msk.msra.mxu0 %vm13194_vm10, %v14506_v10  ;;  %14881 = vst [vmem:[#allocation34_spill] sm:$0xff] %v14880_v49  ;;  %v6432_v48 = vsel %vm14308_vm11, 1.0, %v14503_v8  ;;  %v6433_v63 = vsel %vm14313_vm4, 1.0, %v14503_v8  ;;  %v6367_v31 = vsel %vm14309_vm12, 1.0, %v14503_v8  ;;  %vm14884_vm5 = vcmp.eq.s32.totalorder %v14864_v20, %v13070_v38 }
 0x269   : > { %9856 = vmatprep.subr.bf16.mxu0 %v14423_v51  ;;  %vm14885_vm13 = vcmp.eq.s32.totalorder %v14865_v3, %v13070_v38  ;;  %v14886_v41 = vmov 0  ;;  %v13420_v59 = vsub.f32 %v6365_v7, %v6365_v7  ;;  %v13422_v26 = vsub.f32 %v6366_v27, %v6366_v27  ;;  %v14899_v27 = vld [vmem:[#allocation32_spill] sm:$0xff] }
 0x26a   : > { %9999 = vmatpush3.bf16.msk.msra.mxu1 %vm13234_vm14, %v14506_v10  ;;  %vm13416_vm11 = vmpackc.low %vm14885_vm13, %vm14884_vm5  ;;  %v6368_v46 = vsel %vm14310_vm3, 1.0, %v14503_v8  ;;  %vm14311_vm12 = vcmp.eq.s32.totalorder %v14883_v29, %v13073_v17  ;;  %v14316_v54 = vand.u32 4294901760, %v13149_v21  ;;  %v14319_v57 = vand.u32 4294901760, %v13151_v6 }
 0x26b   : > { %10000 = vmatprep.subr.bf16.mxu1 %v14423_v51  ;;  %v14887_v41 = vsel %vm13416_vm11, 4294967295, %v14886_v41  ;;  %v6435_v58 = vsel %vm14311_vm12, 1.0, %v14503_v8  ;;  %vm14889_vm5 = vcmp.eq.s32.totalorder %v14864_v20, %v13073_v17  ;;  %vm14890_vm13 = vcmp.eq.s32.totalorder %v14865_v3, %v13073_v17  ;;  %v6152_v20 = vld [vmem:[%s12458_s10 + $0x2] ss:$0 sm:$0xff] }
 0x26c   : > { %9858 = vmatpush3.bf16.msk.msra.mxu0 %vm13272_vm0, %v14506_v10  ;;  %14888 = vst [vmem:[#allocation36_spill] sm:$0xff] %v14887_v41  ;;  %vm13450_vm3 = vmpackc.low %vm14890_vm13, %vm14889_vm5  ;;  %v14891_v44 = vmov 0  ;;  %v13454_v0 = vsub.f32 %v6432_v48, %v6432_v48  ;;  %v13456_v9 = vsub.f32 %v6433_v63, %v6433_v63  ;;  %v13458_v50 = vsub.f32 %v6367_v31, %v6367_v31  ;;  %v14900_v48 = vld [vmem:[#allocation35_spill] sm:$0xff] }
 0x26d   : > { %9859 = vmatprep.subr.bf16.mxu0 %v14423_v51  ;;  %v14892_v44 = vsel %vm13450_vm3, 4294967295, %v14891_v44  ;;  %v13467_v3 = vsub.f32 %v6368_v46, %v6368_v46  ;;  %v13470_v37 = vsub.f32 %v6438_v25, %v13407_v11  ;;  %vm14894_vm5 = vcmp.eq.s32.totalorder %v14875_v40, %v13070_v38  ;;  %v6219_v31 = vld [vmem:[%s12458_s10 + $0x3] ss:$0 sm:$0xff] }
 0x26e   : > { %10002 = vmatpush3.bf16.msk.msra.mxu1 %vm13310_vm9, %v14506_v10  ;;  %14893 = vst [vmem:[#allocation37_spill] sm:$0xff] %v14892_v44  ;;  %vm14895_vm13 = vcmp.eq.s32.totalorder %v14876_v61, %v13070_v38  ;;  %v14896_v35 = vmov 0  ;;  %v13485_v7 = vsub.f32 %v6434_v39, %v6434_v39  ;;  %v13487_v25 = vsub.f32 %v6435_v58, %v6435_v58  ;;  %v14908_v44 = vld [vmem:[#allocation10_spill] sm:$0xff] }
 0x26f   : > { %10003 = vmatprep.subr.bf16.mxu1 %v14423_v51  ;;  %vm13481_vm12 = vmpackc.low %vm14895_vm13, %vm14894_vm5  ;;  %v4606_v46 = vsub.f32 %v13149_v21, %v14316_v54  ;;  %v4613_v39 = vsub.f32 %v13151_v6, %v14319_v57  ;;  %vm14901_vm5 = vcmp.eq.s32.totalorder %v14875_v40, %v13073_v17  ;;  %vm14902_vm13 = vcmp.eq.s32.totalorder %v14876_v61, %v13073_v17  ;;  %v14916_v40 = vld [vmem:[#allocation19_spill] sm:$0xff] }
 0x270   : > { %9861 = vmatpush3.bf16.msk.msra.mxu0 %vm13343_vm7, %v14506_v10  ;;  %v14897_v35 = vsel %vm13481_vm12, 4294967295, %v14896_v35  ;;  %vm13512_vm4 = vmpackc.low %vm14902_vm13, %vm14901_vm5  ;;  %v14903_v54 = vmov 0  ;;  %v14906_v61 = vand.u32 4294901760, %v13153_v47  ;;  %v14907_v57 = vand.u32 4294901760, %v13155_v22 }
 0x271   : > { %9862 = vmatprep.subr.bf16.mxu0 %v14423_v51  ;;  %14898 = vst [vmem:[#allocation38_spill] sm:$0xff] %v14897_v35  ;;  %v14904_v54 = vsel %vm13512_vm4, 4294967295, %v14903_v54  ;;  %vm14909_vm5 = vcmp.eq.s32.totalorder %v14882_v16, %v13070_v38  ;;  %vm14910_vm13 = vcmp.eq.s32.totalorder %v14883_v29, %v13070_v38  ;;  %v14943_v60 = vand.u32 4294901760, %v13320_v13 }
 0x272   : > { %10005 = vmatpush3.bf16.msk.msra.mxu1 %vm13380_vm2, %v14506_v10  ;;  %14905 = vst [vmem:[#allocation39_spill] sm:$0xff] %v14904_v54  ;;  %v5318_v18 = vsub.f32 %v13155_v22, %v14907_v57  ;;  %v14342_v57 = vand.u32 4294901760, %v13178_v28 }
 0x273   : > { %10006 = vmatprep.subr.bf16.mxu1 %v14423_v51 }
 0x274   : > { %9864 = vmatpush3.bf16.msk.msra.mxu0 %vm13416_vm11, %v14506_v10 }
 0x275   : > { %9865 = vmatprep.subr.bf16.mxu0 %v14423_v51 }
 0x276   : > { %10008 = vmatpush3.bf16.msk.msra.mxu1 %vm13450_vm3, %v14506_v10  ;;  %v2328_v63 = vpop.f32.mrb[2].mxu0  ;;  %vm13540_vm3 = vmpackc.low %vm14910_vm13, %vm14909_vm5  ;;  %vm14918_vm5 = vcmp.eq.s32.totalorder %v14882_v16, %v13073_v17  ;;  %vm14919_vm13 = vcmp.eq.s32.totalorder %v14883_v29, %v13073_v17  ;;  %v14927_v29 = vmov 0  ;;  %v14937_v16 = vand.u32 4294901760, %v13291_v14 }
 0x277   : > { %v2336_v36 = vmul.f32 %v6152_v20, %v2328_v63  ;;  %v7935_v41 = vpop.f32.mrb[3].mxu0  ;;  %10009 = vmatprep.subr.bf16.mxu1 %v14423_v51  ;;  %v5311_v63 = vsub.f32 %v13153_v47, %v14906_v61  ;;  %v14911_v61 = vmov 0  ;;  %vm13564_vm8 = vmpackc.low %vm14919_vm13, %vm14918_vm5  ;;  %vm14925_vm5 = vcmp.eq.s32.totalorder %v14899_v27, %v13070_v38 }
 0x278   : > { %v3033_v20 = vpop.f32.mrb[2].mxu1  ;;  %9867 = vmatpush3.bf16.msk.msra.mxu0 %vm13481_vm12, %v14506_v10  ;;  %v14912_v61 = vsel %vm13540_vm3, 4294967295, %v14911_v61  ;;  %vm14926_vm13 = vcmp.eq.s32.totalorder %v14900_v48, %v13070_v38 }
 0x279   : > { %v2337_v49 = vadd.f32 %v2336_v36, %v14908_v44  ;;  %v2338_v41 = vmul.f32 %v2336_v36, %v2336_v36  ;;  %v3041_v1 = vmul.f32 %v6219_v31, %v3033_v20  ;;  %v8145_v55 = vpop.f32.mrb[3].mxu1  ;;  %9868 = vmatprep.subr.bf16.mxu0 %v14423_v51  ;;  %14913 = vst [vmem:[#allocation40_spill] sm:$0xff] %v14912_v61  ;;  %v4607_v44 = vand.u32 4294901760, %v4606_v46 }
 0x27a   : > { %10011 = vmatpush3.bf16.msk.msra.mxu1 %vm13512_vm4, %v14506_v10  ;;  %v4614_v55 = vand.u32 4294901760, %v4613_v39  ;;  %v14914_v36 = vand.u32 4294901760, %v13169_v30  ;;  %v14915_v20 = vand.u32 4294901760, %v13171_v32  ;;  %v14920_v46 = vmov 0  ;;  %vm13585_vm4 = vmpackc.low %vm14926_vm13, %vm14925_vm5 }
 0x27b   : > { %v2339_v35 = vadd.f32 %v2338_v41, %v14916_v40  ;;  %v13555_v23 = vadd.f32 %v3041_v1, %v2337_v49  ;;  %v3043_v24 = vmul.f32 %v3041_v1, %v3041_v1  ;;  %10012 = vmatprep.subr.bf16.mxu1 %v14423_v51  ;;  %v14921_v46 = vsel %vm13564_vm8, 4294967295, %v14920_v46 }
 0x27c   : > { %v4620_v31 = vsub.f32 %v13169_v30, %v14914_v36  ;;  %v4627_v58 = vsub.f32 %v13171_v32, %v14915_v20  ;;  %14922 = vst [vmem:[#allocation13_spill] sm:$0xff] %v14921_v46  ;;  %v14923_v39 = vand.u32 4294901760, %v13461_v45  ;;  %9870 = vmatpush3.bf16.msk.msra.mxu0 %vm13540_vm3, %v14506_v10  ;;  %v5312_v1 = vand.u32 4294901760, %v5311_v63 }
 0x27d   : > { %14917 = vst [vmem:[#allocation9_spill] sm:$0xff] %v13555_v23  ;;  %v5319_v49 = vand.u32 4294901760, %v5318_v18  ;;  %v13576_v40 = vadd.f32 %v3043_v24, %v2339_v35  ;;  %9871 = vmatprep.subr.bf16.mxu0 %v14423_v51  ;;  %v14928_v29 = vsel %vm13585_vm4, 4294967295, %v14927_v29  ;;  %v14930_v18 = vand.u32 4294901760, %v13470_v37 }
 0x27e   : > { %v4595_v36 = vsub.f32 %v13461_v45, %v14923_v39  ;;  %14929 = vst [vmem:[#allocation22_spill] sm:$0xff] %v14928_v29  ;;  %v14931_v20 = vand.u32 4294901760, %v13173_v33  ;;  %v5332_v35 = vsub.f32 %v13178_v28, %v14342_v57  ;;  %10014 = vmatpush3.bf16.msk.msra.mxu1 %vm13564_vm8, %v14506_v10  ;;  %v6369_v39 = vsel %vm14925_vm5, 1.0, %v14503_v8 }
 0x27f   : > { %14924 = vst [vmem:[#allocation7_spill] sm:$0xff] %v13576_v40  ;;  %v5300_v63 = vsub.f32 %v13470_v37, %v14930_v18  ;;  %v6370_v18 = vsel %vm14926_vm13, 1.0, %v14503_v8  ;;  %10015 = vmatprep.subr.bf16.mxu1 %v14423_v51  ;;  %vm14932_vm3 = vcmp.eq.s32.totalorder %v14899_v27, %v13073_v17  ;;  %vm14933_vm8 = vcmp.eq.s32.totalorder %v14900_v48, %v13073_v17 }
 0x280   : > { %v5325_v24 = vsub.f32 %v13173_v33, %v14931_v20  ;;  %vm13618_vm12 = vmpackc.low %vm14933_vm8, %vm14932_vm3  ;;  %v14934_v57 = vmov 0  ;;  %v4596_v41 = vand.u32 4294901760, %v4595_v36  ;;  %v9875_v40 = vpack.c.bf16 %v4614_v55, %v4607_v44  ;;  %9873 = vmatpush3.bf16.msk.msra.mxu0 %vm13585_vm4, %v14506_v10 }
 0x281   : > { %v14935_v57 = vsel %vm13618_vm12, 4294967295, %v14934_v57  ;;  %v4621_v38 = vand.u32 4294901760, %v4620_v31  ;;  %v4628_v23 = vand.u32 4294901760, %v4627_v58  ;;  %v4634_v20 = vsub.f32 %v13291_v14, %v14937_v16  ;;  %9874 = vmatprep.subr.bf16.mxu0 %v14423_v51  ;;  %vm14941_vm8 = vmmov %vm14932_vm3 }
 0x282   : > { %14936 = vst [vmem:[#allocation8_spill] sm:$0xff] %v14935_v57  ;;  %v14938_v46 = vand.u32 4294901760, %v13293_v5  ;;  %v5301_v44 = vand.u32 4294901760, %v5300_v63  ;;  %v10019_v58 = vpack.c.bf16 %v5319_v49, %v5312_v1  ;;  %v5326_v55 = vand.u32 4294901760, %v5325_v24  ;;  %10017 = vmatpush3.bf16.msk.msra.mxu1 %vm13618_vm12, %v14506_v10 }
 0x283   : > { %v5333_v31 = vand.u32 4294901760, %v5332_v35  ;;  %v14939_v36 = vand.u32 4294901760, %v13314_v19  ;;  %v6436_v1 = vsel %vm14941_vm8, 1.0, %v14503_v8  ;;  %10018 = vmatprep.subr.bf16.mxu1 %v14423_v51  ;;  %8599 = vmatmul.mubr.f32.vlgmr.msra.gmra.mrb[6].mxu0 %v4596_v41  ;;  %v9878_v49 = vpack.c.bf16 %v4628_v23, %v4621_v38 }
 0x284   : > { %v4641_v61 = vsub.f32 %v13293_v5, %v14938_v46  ;;  %v14940_v46 = vand.u32 4294901760, %v13316_v2  ;;  %v14353_v63 = vand.u32 4294901760, %v13329_v4  ;;  %9876 = vmatpush3.bf16.msra.mxu0 %v9875_v40  ;;  %v4635_v35 = vand.u32 4294901760, %v4634_v20  ;;  %8633 = vmatprep.mubr.msk.f32.mxu0 %vm14453_vm1, %v14503_v8 }
 0x285   : > { %v5339_v16 = vsub.f32 %v13314_v19, %v14939_v36  ;;  %v4655_v27 = vsub.f32 %v13320_v13, %v14943_v60  ;;  %vm14944_vm3 = vcmp.eq.s32.totalorder %v14900_v48, %v13073_v17  ;;  %8809 = vmatmul.mubr.f32.vlgmr.msra.gmra.mrb[6].mxu1 %v5301_v44  ;;  %9877 = vmatprep.subr.bf16.mxu0 %v14423_v51  ;;  %v14354_v41 = vand.u32 4294901760, %v13347_v62 }
 0x286   : > { %v5346_v54 = vsub.f32 %v13316_v2, %v14940_v46  ;;  %v4642_v36 = vand.u32 4294901760, %v4641_v61  ;;  %v14942_v46 = vand.u32 4294901760, %v13318_v34  ;;  %v6437_v23 = vsel %vm14944_vm3, 1.0, %v14503_v8  ;;  %10020 = vmatpush3.bf16.msra.mxu1 %v10019_v58  ;;  %8843 = vmatprep.mubr.msk.f32.mxu1 %vm14453_vm1, %v14503_v8 }
 0x287   : > { %v10022_v61 = vpack.c.bf16 %v5333_v31, %v5326_v55  ;;  %v14357_v40 = vand.u32 4294901760, %v13349_v15  ;;  %v5340_v20 = vand.u32 4294901760, %v5339_v16  ;;  %v14945_v60 = vand.u32 4294901760, %v13325_v52  ;;  %10021 = vmatprep.subr.bf16.mxu1 %v14423_v51 }
 0x288   : > { %v4648_v29 = vsub.f32 %v13318_v34, %v14942_v46  ;;  %v5347_v38 = vand.u32 4294901760, %v5346_v54  ;;  %v14946_v24 = vand.u32 4294901760, %v13327_v53  ;;  %v4662_v48 = vsub.f32 %v13329_v4, %v14353_v63  ;;  %9879 = vmatpush3.bf16.msra.mxu0 %v9878_v49 }
 0x289   : > { %v5353_v46 = vsub.f32 %v13325_v52, %v14945_v60  ;;  %v14947_v44 = vand.u32 4294901760, %v13331_v12  ;;  %v13684_v31 = vsub.f32 %v6369_v39, %v6369_v39  ;;  %v9881_v16 = vpack.c.bf16 %v4642_v36, %v4635_v35  ;;  %9880 = vmatprep.subr.bf16.mxu0 %v14423_v51 }
 0x28a   : > { %v5360_v17 = vsub.f32 %v13327_v53, %v14946_v24  ;;  %v4649_v24 = vand.u32 4294901760, %v4648_v29  ;;  %v4656_v60 = vand.u32 4294901760, %v4655_v27  ;;  %v5367_v63 = vsub.f32 %v13347_v62, %v14354_v41  ;;  %10023 = vmatpush3.bf16.msra.mxu1 %v10022_v61 }
 0x28b   : > { %v4669_v54 = vsub.f32 %v13331_v12, %v14947_v44  ;;  %v5374_v44 = vsub.f32 %v13349_v15, %v14357_v40  ;;  %v5387_v55 = vand.u32 4294901760, %v13456_v9  ;;  %v13695_v39 = vsub.f32 %v6370_v18, %v6370_v18  ;;  %10024 = vmatprep.subr.bf16.mxu1 %v14423_v51 }
 0x28c   : > { %v10025_v49 = vpack.c.bf16 %v5347_v38, %v5340_v20  ;;  %v5354_v29 = vand.u32 4294901760, %v5353_v46  ;;  %v5361_v35 = vand.u32 4294901760, %v5360_v17  ;;  %v4663_v36 = vand.u32 4294901760, %v4662_v48  ;;  %9882 = vmatpush3.bf16.msra.mxu0 %v9881_v16 }
 0x28d   : > { %v4670_v27 = vand.u32 4294901760, %v4669_v54  ;;  %v14948_v41 = vand.u32 4294901760, %v13420_v59  ;;  %v14949_v40 = vand.u32 4294901760, %v13422_v26  ;;  %v13704_v42 = vsub.f32 %v6436_v1, %v6436_v1  ;;  %9883 = vmatprep.subr.bf16.mxu0 %v14423_v51 }
 0x28e   : > { %v9884_v18 = vpack.c.bf16 %v4656_v60, %v4649_v24  ;;  %v4689_v61 = vand.u32 4294901760, %v13458_v50  ;;  %v14360_v20 = vand.u32 4294901760, %v13467_v3  ;;  %v5368_v38 = vand.u32 4294901760, %v5367_v63  ;;  %10026 = vmatpush3.bf16.msra.mxu1 %v10025_v49 }
 0x28f   : > { %v4676_v57 = vsub.f32 %v13420_v59, %v14948_v41  ;;  %v4683_v58 = vsub.f32 %v13422_v26, %v14949_v40  ;;  %v5375_v46 = vand.u32 4294901760, %v5374_v44  ;;  %v14950_v17 = vand.u32 4294901760, %v13454_v0  ;;  %10027 = vmatprep.subr.bf16.mxu1 %v14423_v51 }
 0x290   : > { %v5388_v40 = vsub.f32 %v13456_v9, %v5387_v55  ;;  %v13715_v1 = vsub.f32 %v6437_v23, %v6437_v23  ;;  %v10028_v48 = vpack.c.bf16 %v5361_v35, %v5354_v29  ;;  %v14362_v54 = vand.u32 4294901760, %v13485_v7  ;;  %9885 = vmatpush3.bf16.msra.mxu0 %v9884_v18 }
 0x291   : > { %v5381_v41 = vsub.f32 %v13454_v0, %v14950_v17  ;;  %v14361_v16 = vand.u32 4294901760, %v13487_v25  ;;  %v9887_v63 = vpack.c.bf16 %v4670_v27, %v4663_v36  ;;  %v4677_v24 = vand.u32 4294901760, %v4676_v57  ;;  %9886 = vmatprep.subr.bf16.mxu0 %v14423_v51 }
 0x292   : > { %v4684_v60 = vand.u32 4294901760, %v4683_v58  ;;  %v4690_v44 = vsub.f32 %v13458_v50, %v4689_v61  ;;  %v4697_v23 = vsub.f32 %v13467_v3, %v14360_v20  ;;  %v14366_v49 = vand.u32 4294901760, %v13684_v31  ;;  %10029 = vmatpush3.bf16.msra.mxu1 %v10028_v48 }
 0x293   : > { %v14365_v29 = vand.u32 4294901760, %v13695_v39  ;;  %v10031_v35 = vpack.c.bf16 %v5375_v46, %v5368_v38  ;;  %v5382_v17 = vand.u32 4294901760, %v5381_v41  ;;  %v5389_v36 = vand.u32 4294901760, %v5388_v40  ;;  %10030 = vmatprep.subr.bf16.mxu1 %v14423_v51 }
 0x294   : > { %v5395_v57 = vsub.f32 %v13485_v7, %v14362_v54  ;;  %v5402_v58 = vsub.f32 %v13487_v25, %v14361_v16  ;;  %v14364_v27 = vand.u32 4294901760, %v13704_v42  ;;  %v14363_v18 = vand.u32 4294901760, %v13715_v1  ;;  %9888 = vmatpush3.bf16.msra.mxu0 %v9887_v63 }
 0x295   : > { %v9890_v20 = vpack.c.bf16 %v4684_v60, %v4677_v24  ;;  %v4691_v38 = vand.u32 4294901760, %v4690_v44  ;;  %v4698_v46 = vand.u32 4294901760, %v4697_v23  ;;  %v4704_v41 = vsub.f32 %v13684_v31, %v14366_v49  ;;  %9889 = vmatprep.subr.bf16.mxu0 %v14423_v51 }
 0x296   : > { %v4711_v40 = vsub.f32 %v13695_v39, %v14365_v29  ;;  %v10034_v48 = vpack.c.bf16 %v5389_v36, %v5382_v17  ;;  %10032 = vmatpush3.bf16.msra.mxu1 %v10031_v35  ;;  %v5396_v16 = vand.u32 4294901760, %v5395_v57  ;;  %v5403_v54 = vand.u32 4294901760, %v5402_v58 }
 0x297   : > { %v5409_v63 = vsub.f32 %v13704_v42, %v14364_v27  ;;  %v5416_v24 = vsub.f32 %v13715_v1, %v14363_v18  ;;  %10033 = vmatprep.subr.bf16.mxu1 %v14423_v51  ;;  %v9893_v60 = vpack.c.bf16 %v4698_v46, %v4691_v38  ;;  %v4705_v44 = vand.u32 4294901760, %v4704_v41 }
 0x298   : > { %9891 = vmatpush3.bf16.msra.mxu0 %v9890_v20  ;;  %v4712_v23 = vand.u32 4294901760, %v4711_v40  ;;  %v10037_v35 = vpack.c.bf16 %v5403_v54, %v5396_v16  ;;  %v9899_v20 = vpack.c.bf16 %v13151_v6, %v13149_v21  ;;  %v10043_v54 = vpack.c.bf16 %v13155_v22, %v13153_v47 }
 0x299   : > { %9892 = vmatprep.subr.bf16.mxu0 %v14423_v51  ;;  %v5410_v17 = vand.u32 4294901760, %v5409_v63  ;;  %v5417_v36 = vand.u32 4294901760, %v5416_v24  ;;  %v9902_v16 = vpack.c.bf16 %v13171_v32, %v13169_v30  ;;  %v10046_v38 = vpack.c.bf16 %v13178_v28, %v13173_v33 }
 0x29a   : > { %10035 = vmatpush3.bf16.msra.mxu1 %v10034_v48  ;;  %v9896_v57 = vpack.c.bf16 %v4712_v23, %v4705_v44  ;;  %v9905_v46 = vpack.c.bf16 %v13293_v5, %v13291_v14  ;;  %v10049_v41 = vpack.c.bf16 %v13316_v2, %v13314_v19  ;;  %v9908_v40 = vpack.c.bf16 %v13320_v13, %v13318_v34 }
 0x29b   : > { %10036 = vmatprep.subr.bf16.mxu1 %v14423_v51  ;;  %v10040_v58 = vpack.c.bf16 %v5417_v36, %v5410_v17  ;;  %v10052_v48 = vpack.c.bf16 %v13327_v53, %v13325_v52  ;;  %v9911_v63 = vpack.c.bf16 %v13331_v12, %v13329_v4  ;;  %v10055_v24 = vpack.c.bf16 %v13349_v15, %v13347_v62 }
 0x29c   : > { %9894 = vmatpush3.bf16.msra.mxu0 %v9893_v60  ;;  %v9914_v60 = vpack.c.bf16 %v13422_v26, %v13420_v59  ;;  %v10058_v44 = vpack.c.bf16 %v13456_v9, %v13454_v0  ;;  %v9917_v23 = vpack.c.bf16 %v13467_v3, %v13458_v50  ;;  %v9920_v17 = vpack.c.bf16 %v13695_v39, %v13684_v31 }
 0x29d   : > { %9895 = vmatprep.subr.bf16.mxu0 %v14423_v51  ;;  %v10064_v36 = vpack.c.bf16 %v13715_v1, %v13704_v42  ;;  %v14973_v18 = vand.u32 4294901760, %v13153_v47  ;;  %v14974_v27 = vand.u32 4294901760, %v13155_v22  ;;  %v14975_v49 = vand.u32 4294901760, %v13461_v45 }
 0x29e   : > { %10038 = vmatpush3.bf16.msra.mxu1 %v10037_v35  ;;  %v10061_v35 = vpack.c.bf16 %v13487_v25, %v13485_v7  ;;  %v14979_v47 = vand.u32 4294901760, %v13173_v33  ;;  %v14980_v22 = vand.u32 4294901760, %v13178_v28  ;;  %v14984_v33 = vand.u32 4294901760, %v13316_v2 }
 0x29f   : > { %10039 = vmatprep.subr.bf16.mxu1 %v14423_v51  ;;  %v10091_v29 = vpack.c.bf16 %v14974_v27, %v14973_v18  ;;  %v14986_v27 = vand.u32 4294901760, %v13320_v13  ;;  %v14990_v2 = vand.u32 4294901760, %v13331_v12  ;;  %v14992_v13 = vand.u32 4294901760, %v13349_v15 }
 0x2a0   : > { %9897 = vmatpush3.bf16.msra.mxu0 %v9896_v57  ;;  %v15000_v9 = vand.u32 4294901760, %v13695_v39  ;;  %v15001_v50 = vand.u32 4294901760, %v13704_v42  ;;  %v6353_v42 = vld [vmem:[%s12458_s10 + $0x5] ss:$0 sm:$0xff] }
 0x2a1   : > { %9898 = vmatprep.subr.bf16.mxu0 %v14423_v51 }
 0x2a2   : > { %10041 = vmatpush3.bf16.msra.mxu1 %v10040_v58 }
 0x2a3   : > { %10042 = vmatprep.subr.bf16.mxu1 %v14423_v51  ;;  %8634 = vmatmul.mubr.f32.vlgmr.msra.gmra.mrb[6].mxu0 %v13390_v56 }
 0x2a4   : > { %9900 = vmatpush3.bf16.msra.mxu0 %v9899_v20  ;;  %8668 = vmatprep.mubr.msk.f32.mxu0 %vm14453_vm1, %v14503_v8  ;;  %v15005_v20 = vld [vmem:[#allocation7_spill] sm:$0xff] }
 0x2a5   : > { %8844 = vmatmul.mubr.f32.vlgmr.msra.gmra.mrb[6].mxu1 %v13407_v11  ;;  %9901 = vmatprep.subr.bf16.mxu0 %v14423_v51 }
 0x2a6   : > { %10044 = vmatpush3.bf16.msra.mxu1 %v10043_v54  ;;  %8878 = vmatprep.mubr.msk.f32.mxu1 %vm14453_vm1, %v14503_v8 }
 0x2a7   : > { %10045 = vmatprep.subr.bf16.mxu1 %v14423_v51 }
 0x2a8   : > { %9903 = vmatpush3.bf16.msra.mxu0 %v9902_v16 }
 0x2a9   : > { %9904 = vmatprep.subr.bf16.mxu0 %v14423_v51 }
 0x2aa   : > { %10047 = vmatpush3.bf16.msra.mxu1 %v10046_v38  ;;  %v6420_v38 = vld [vmem:[%s12458_s10 + $0x6] ss:$0 sm:$0xff] }
 0x2ab   : > { %10048 = vmatprep.subr.bf16.mxu1 %v14423_v51 }
 0x2ac   : > { %9906 = vmatpush3.bf16.msra.mxu0 %v9905_v46 }
 0x2ad   : > { %9907 = vmatprep.subr.bf16.mxu0 %v14423_v51 }
 0x2ae   : > { %10050 = vmatpush3.bf16.msra.mxu1 %v10049_v41 }
 0x2af   : > { %10051 = vmatprep.subr.bf16.mxu1 %v14423_v51 }
 0x2b0   : > { %9909 = vmatpush3.bf16.msra.mxu0 %v9908_v40  ;;  %v14959_v40 = vld [vmem:[#allocation37_spill] sm:$0xff] }
 0x2b1   : > { %9910 = vmatprep.subr.bf16.mxu0 %v14423_v51  ;;  %vm14960_vm5 = vnez %v14959_v40 }
 0x2b2   : > { %10053 = vmatpush3.bf16.msra.mxu1 %v10052_v48  ;;  %v14961_v48 = vld [vmem:[#allocation38_spill] sm:$0xff] }
 0x2b3   : > { %10054 = vmatprep.subr.bf16.mxu1 %v14423_v51  ;;  %vm14962_vm13 = vnez %v14961_v48 }
 0x2b4   : > { %9912 = vmatpush3.bf16.msra.mxu0 %v9911_v63  ;;  %v14963_v63 = vld [vmem:[#allocation39_spill] sm:$0xff] }
 0x2b5   : > { %9913 = vmatprep.subr.bf16.mxu0 %v14423_v51  ;;  %vm14964_vm8 = vnez %v14963_v63 }
 0x2b6   : > { %10056 = vmatpush3.bf16.msra.mxu1 %v10055_v24  ;;  %v14965_v24 = vld [vmem:[#allocation40_spill] sm:$0xff] }
 0x2b7   : > { %10057 = vmatprep.subr.bf16.mxu1 %v14423_v51  ;;  %vm14966_vm3 = vnez %v14965_v24 }
 0x2b8   : > { %9915 = vmatpush3.bf16.msra.mxu0 %v9914_v60  ;;  %v14967_v60 = vld [vmem:[#allocation13_spill] sm:$0xff] }
 0x2b9   : > { %9916 = vmatprep.subr.bf16.mxu0 %v14423_v51 }
 0x2ba   : > { %10059 = vmatpush3.bf16.msra.mxu1 %v10058_v44 }
 0x2bb   : > { %10060 = vmatprep.subr.bf16.mxu1 %v14423_v51 }
 0x2bc   : > { %9918 = vmatpush3.bf16.msra.mxu0 %v9917_v23  ;;  %v14970_v23 = vand.u32 4294901760, %v13149_v21  ;;  %v14976_v21 = vand.u32 4294901760, %v13169_v30  ;;  %v14981_v30 = vand.u32 4294901760, %v13291_v14  ;;  %v14987_v14 = vand.u32 4294901760, %v13325_v52 }
 0x2bd   : > { %9919 = vmatprep.subr.bf16.mxu0 %v14423_v51  ;;  %v14993_v52 = vand.u32 4294901760, %v13420_v59  ;;  %v14997_v59 = vand.u32 4294901760, %v13485_v7 }
 0x2be   : > { %10062 = vmatpush3.bf16.msra.mxu1 %v10061_v35  ;;  %v14971_v35 = vand.u32 4294901760, %v13151_v6  ;;  %v14977_v6 = vand.u32 4294901760, %v13171_v32  ;;  %v14982_v32 = vand.u32 4294901760, %v13293_v5  ;;  %v14988_v5 = vand.u32 4294901760, %v13327_v53 }
 0x2bf   : > { %10063 = vmatprep.subr.bf16.mxu1 %v14423_v51  ;;  %v14994_v53 = vand.u32 4294901760, %v13422_v26  ;;  %v14998_v26 = vand.u32 4294901760, %v13487_v25 }
 0x2c0   : > { %9921 = vmatpush3.bf16.msra.mxu0 %v9920_v17  ;;  %v9947_v17 = vpack.c.bf16 %v14971_v35, %v14970_v23  ;;  %v9950_v23 = vpack.c.bf16 %v14977_v6, %v14976_v21  ;;  %v14978_v35 = vand.u32 4294901760, %v13470_v37 }
 0x2c1   : > { %9922 = vmatprep.subr.bf16.mxu0 %v14423_v51 }
 0x2c2   : > { %10065 = vmatpush3.bf16.msra.mxu1 %v10064_v36 }
 0x2c3   : > { %10066 = vmatprep.subr.bf16.mxu1 %v14423_v51  ;;  %8669 = vmatmul.mubr.f32.vlgmr.msra.gmra.mrb[6].mxu0 %v13461_v45  ;;  %v10094_v45 = vpack.c.bf16 %v14980_v22, %v14979_v47 }
 0x2c4   : > { %9924 = vmatpush3.bf16.msk.msra.mxu0 %vm13138_vm15, %v14506_v10  ;;  %8703 = vmatprep.mubr.msk.f32.mxu0 %vm14453_vm1, %v14503_v8 }
 0x2c5   : > { %8879 = vmatmul.mubr.f32.vlgmr.msra.gmra.mrb[6].mxu1 %v13470_v37  ;;  %9925 = vmatprep.subr.bf16.mxu0 %v14423_v51  ;;  %v9953_v37 = vpack.c.bf16 %v14982_v32, %v14981_v30 }
 0x2c6   : > { %10068 = vmatpush3.bf16.msk.msra.mxu1 %vm13165_vm6, %v14506_v10  ;;  %8913 = vmatprep.mubr.msk.f32.mxu1 %vm14453_vm1, %v14503_v8 }
 0x2c7   : > { %10069 = vmatprep.subr.bf16.mxu1 %v14423_v51 }
 0x2c8   : > { %9927 = vmatpush3.bf16.msk.msra.mxu0 %vm13194_vm10, %v14506_v10 }
 0x2c9   : > { %9928 = vmatprep.subr.bf16.mxu0 %v14423_v51 }
 0x2ca   : > { %10071 = vmatpush3.bf16.msk.msra.mxu1 %vm13234_vm14, %v14506_v10 }
 0x2cb   : > { %10072 = vmatprep.subr.bf16.mxu1 %v14423_v51 }
 0x2cc   : > { %9930 = vmatpush3.bf16.msk.msra.mxu0 %vm13272_vm0, %v14506_v10 }
 0x2cd   : > { %9931 = vmatprep.subr.bf16.mxu0 %v14423_v51 }
 0x2ce   : > { %10074 = vmatpush3.bf16.msk.msra.mxu1 %vm13310_vm9, %v14506_v10 }
 0x2cf   : > { %10075 = vmatprep.subr.bf16.mxu1 %v14423_v51 }
 0x2d0   : > { %9933 = vmatpush3.bf16.msk.msra.mxu0 %vm13343_vm7, %v14506_v10 }
 0x2d1   : > { %9934 = vmatprep.subr.bf16.mxu0 %v14423_v51 }
 0x2d2   : > { %10077 = vmatpush3.bf16.msk.msra.mxu1 %vm13380_vm2, %v14506_v10 }
 0x2d3   : > { %10078 = vmatprep.subr.bf16.mxu1 %v14423_v51 }
 0x2d4   : > { %9936 = vmatpush3.bf16.msk.msra.mxu0 %vm13416_vm11, %v14506_v10 }
 0x2d5   : > { %9937 = vmatprep.subr.bf16.mxu0 %v14423_v51 }
 0x2d6   : > { %10080 = vmatpush3.bf16.msk.msra.mxu1 %vm14960_vm5, %v14506_v10  ;;  %vm14968_vm5 = vnez %v14967_v60 }
 0x2d7   : > { %10081 = vmatprep.subr.bf16.mxu1 %v14423_v51 }
 0x2d8   : > { %9939 = vmatpush3.bf16.msk.msra.mxu0 %vm14962_vm13, %v14506_v10 }
 0x2d9   : > { %9940 = vmatprep.subr.bf16.mxu0 %v14423_v51 }
 0x2da   : > { %10083 = vmatpush3.bf16.msk.msra.mxu1 %vm14964_vm8, %v14506_v10 }
 0x2db   : > { %10084 = vmatprep.subr.bf16.mxu1 %v14423_v51 }
 0x2dc   : > { %9942 = vmatpush3.bf16.msk.msra.mxu0 %vm14966_vm3, %v14506_v10 }
 0x2dd   : > { %9943 = vmatprep.subr.bf16.mxu0 %v14423_v51 }
 0x2de   : > { %10086 = vmatpush3.bf16.msk.msra.mxu1 %vm14968_vm5, %v14506_v10 }
 0x2df   : > { %10087 = vmatprep.subr.bf16.mxu1 %v14423_v51 }
 0x2e0   : > { %9945 = vmatpush3.bf16.msk.msra.mxu0 %vm13585_vm4, %v14506_v10 }
 0x2e1   : > { %9946 = vmatprep.subr.bf16.mxu0 %v14423_v51 }
 0x2e2   : > { %10089 = vmatpush3.bf16.msk.msra.mxu1 %vm13618_vm12, %v14506_v10 }
 0x2e3   : > { %10090 = vmatprep.subr.bf16.mxu1 %v14423_v51  ;;  %8704 = vmatmul.mubr.f32.vlgmr.msra.gmra.mrb[6].mxu0 %v14975_v49  ;;  %v14983_v49 = vand.u32 4294901760, %v13314_v19  ;;  %v14989_v19 = vand.u32 4294901760, %v13329_v4  ;;  %v14995_v4 = vand.u32 4294901760, %v13454_v0  ;;  %v14999_v0 = vand.u32 4294901760, %v13684_v31  ;;  %v15004_v31 = vld [vmem:[#allocation9_spill] sm:$0xff] }
 0x2e4   : > { %9948 = vmatpush3.bf16.msra.mxu0 %v9947_v17  ;;  %8738 = vmatprep.mubr.msk.f32.mxu0 %vm14453_vm1, %v14503_v8  ;;  %v10100_v17 = vpack.c.bf16 %v14988_v5, %v14987_v14 }
 0x2e5   : > { %8914 = vmatmul.mubr.f32.vlgmr.msra.gmra.mrb[6].mxu1 %v14978_v35  ;;  %9949 = vmatprep.subr.bf16.mxu0 %v14423_v51  ;;  %v10097_v28 = vpack.c.bf16 %v14984_v33, %v14983_v49  ;;  %v9959_v21 = vpack.c.bf16 %v14990_v2, %v14989_v19  ;;  %v10106_v12 = vpack.c.bf16 %v5387_v55, %v14995_v4 }
 0x2e6   : > { %10092 = vmatpush3.bf16.msra.mxu1 %v10091_v29  ;;  %8948 = vmatprep.mubr.msk.f32.mxu1 %vm14453_vm1, %v14503_v8  ;;  %v14985_v29 = vand.u32 4294901760, %v13318_v34  ;;  %v14991_v34 = vand.u32 4294901760, %v13347_v62  ;;  %v14996_v62 = vand.u32 4294901760, %v13467_v3  ;;  %v10109_v35 = vpack.c.bf16 %v14998_v26, %v14997_v59 }
 0x2e7   : > { %10093 = vmatprep.subr.bf16.mxu1 %v14423_v51  ;;  %v9968_v55 = vpack.c.bf16 %v15000_v9, %v14999_v0  ;;  %v15002_v3 = vand.u32 4294901760, %v13715_v1 }
 0x2e8   : > { %9951 = vmatpush3.bf16.msra.mxu0 %v9950_v23  ;;  %v9956_v18 = vpack.c.bf16 %v14986_v27, %v14985_v29  ;;  %v10103_v6 = vpack.c.bf16 %v14992_v13, %v14991_v34  ;;  %v9962_v23 = vpack.c.bf16 %v14994_v53, %v14993_v52  ;;  %v9965_v15 = vpack.c.bf16 %v14996_v62, %v4689_v61 }
 0x2e9   : > { %9952 = vmatprep.subr.bf16.mxu0 %v14423_v51  ;;  %v10112_v61 = vpack.c.bf16 %v15002_v3, %v15001_v50 }
 0x2ea   : > { %10095 = vmatpush3.bf16.msra.mxu1 %v10094_v45 }
 0x2eb   : > { %10096 = vmatprep.subr.bf16.mxu1 %v14423_v51 }
 0x2ec   : > { %9954 = vmatpush3.bf16.msra.mxu0 %v9953_v37 }
 0x2ed   : > { %9955 = vmatprep.subr.bf16.mxu0 %v14423_v51 }
 0x2ee   : > { %10098 = vmatpush3.bf16.msra.mxu1 %v10097_v28 }
 0x2ef   : > { %10099 = vmatprep.subr.bf16.mxu1 %v14423_v51 }
 0x2f0   : > { %9957 = vmatpush3.bf16.msra.mxu0 %v9956_v18 }
 0x2f1   : > { %9958 = vmatprep.subr.bf16.mxu0 %v14423_v51 }
 0x2f2   : > { %10101 = vmatpush3.bf16.msra.mxu1 %v10100_v17 }
 0x2f3   : > { %10102 = vmatprep.subr.bf16.mxu1 %v14423_v51 }
 0x2f4   : > { %9960 = vmatpush3.bf16.msra.mxu0 %v9959_v21 }
 0x2f5   : > { %9961 = vmatprep.subr.bf16.mxu0 %v14423_v51 }
 0x2f6   : > { %10104 = vmatpush3.bf16.msra.mxu1 %v10103_v6  ;;  %v5884_v6 = vstv %s5883_s15 }
 0x2f7   : > { %10105 = vmatprep.subr.bf16.mxu1 %v14423_v51 }
 0x2f8   : > { %9963 = vmatpush3.bf16.msra.mxu0 %v9962_v23 }
 0x2f9   : > { %9964 = vmatprep.subr.bf16.mxu0 %v14423_v51 }
 0x2fa   : > { %10107 = vmatpush3.bf16.msra.mxu1 %v10106_v12 }
 0x2fb   : > { %10108 = vmatprep.subr.bf16.mxu1 %v14423_v51 }
 0x2fc   : > { %9966 = vmatpush3.bf16.msra.mxu0 %v9965_v15 }
 0x2fd   : > { %9967 = vmatprep.subr.bf16.mxu0 %v14423_v51 }
 0x2fe   : > { %10110 = vmatpush3.bf16.msra.mxu1 %v10109_v35 }
 0x2ff   : > { %10111 = vmatprep.subr.bf16.mxu1 %v14423_v51 }
 0x300   : > { %9969 = vmatpush3.bf16.msra.mxu0 %v9968_v55 }
 0x301   : > { %9970 = vmatprep.subr.bf16.mxu0 %v14423_v51 }
 0x302   : > { %10113 = vmatpush3.bf16.msra.mxu1 %v10112_v61 }
 0x303   : > { %10114 = vmatprep.subr.bf16.mxu1 %v14423_v51  ;;  %8739 = vmatmul.mubr.f32.vlgmr.msra.gmra.mrb[6].mxu0 %v13390_v56 }
 0x304   : > { %9972 = vmatpush3.bf16.msk.msra.mxu0 %vm13138_vm15, %v14506_v10  ;;  %8773 = vmatprep.mubr.msk.f32.mxu0 %vm14453_vm1, %v14503_v8 }
 0x305   : > { %8949 = vmatmul.mubr.f32.vlgmr.msra.gmra.mrb[6].mxu1 %v13407_v11  ;;  %9973 = vmatprep.subr.bf16.mxu0 %v14423_v51 }
 0x306   : > { %10116 = vmatpush3.bf16.msk.msra.mxu1 %vm13165_vm6, %v14506_v10  ;;  %8983 = vmatprep.mubr.msk.f32.mxu1 %vm14453_vm1, %v14503_v8  ;;  %vm15003_vm1 = vnez %v14959_v40  ;;  %v6286_v8 = vld [vmem:[%s12458_s10 + $0x4] ss:$0 sm:$0xff] }
 0x307   : > { %10117 = vmatprep.subr.bf16.mxu1 %v14423_v51 }
 0x308   : > { %9975 = vmatpush3.bf16.msk.msra.mxu0 %vm13194_vm10, %v14506_v10 }
 0x309   : > { %9976 = vmatprep.subr.bf16.mxu0 %v14423_v51 }
 0x30a   : > { %10119 = vmatpush3.bf16.msk.msra.mxu1 %vm13234_vm14, %v14506_v10 }
 0x30b   : > { %10120 = vmatprep.subr.bf16.mxu1 %v14423_v51 }
 0x30c   : > { %9978 = vmatpush3.bf16.msk.msra.mxu0 %vm13272_vm0, %v14506_v10 }
 0x30d   : > { %9979 = vmatprep.subr.bf16.mxu0 %v14423_v51 }
 0x30e   : > { %10122 = vmatpush3.bf16.msk.msra.mxu1 %vm13310_vm9, %v14506_v10 }
 0x30f   : > { %10123 = vmatprep.subr.bf16.mxu1 %v14423_v51 }
 0x310   : > { %9981 = vmatpush3.bf16.msk.msra.mxu0 %vm13343_vm7, %v14506_v10 }
 0x311   : > { %9982 = vmatprep.subr.bf16.mxu0 %v14423_v51 }
 0x312   : > { %10125 = vmatpush3.bf16.msk.msra.mxu1 %vm13380_vm2, %v14506_v10 }
 0x313   : > { %10126 = vmatprep.subr.bf16.mxu1 %v14423_v51 }
 0x314   : > { %9984 = vmatpush3.bf16.msk.msra.mxu0 %vm13416_vm11, %v14506_v10 }
 0x315   : > { %9985 = vmatprep.subr.bf16.mxu0 %v14423_v51 }
 0x316   : > { %10128 = vmatpush3.bf16.msk.msra.mxu1 %vm15003_vm1, %v14506_v10 }
 0x317   : > { %10129 = vmatprep.subr.bf16.mxu1 %v14423_v51 }
 0x318   : > { %9987 = vmatpush3.bf16.msk.msra.mxu0 %vm14962_vm13, %v14506_v10 }
 0x319   : > { %9988 = vmatprep.subr.bf16.mxu0 %v14423_v51 }
 0x31a   : > { %10131 = vmatpush3.bf16.msk.msra.mxu1 %vm14964_vm8, %v14506_v10 }
 0x31b   : > { %10132 = vmatprep.subr.bf16.mxu1 %v14423_v51 }
 0x31c   : > { %9990 = vmatpush3.bf16.msk.msra.mxu0 %vm14966_vm3, %v14506_v10 }
 0x31d   : > { %9991 = vmatprep.subr.bf16.mxu0 %v14423_v51 }
 0x31e   : > { %10134 = vmatpush3.bf16.msk.msra.mxu1 %vm14968_vm5, %v14506_v10 }
 0x31f   : > { %10135 = vmatprep.subr.bf16.mxu1 %v14423_v51 }
 0x320   : > { %9993 = vmatpush3.bf16.msk.msra.mxu0 %vm13585_vm4, %v14506_v10 }
 0x322   : > { %10137 = vmatpush3.bf16.msk.msra.mxu1 %vm13618_vm12, %v14506_v10 }
 0x323   : > { %8774 = vmatmul.mubr.f32.vlgmr.msra.gmra.mrb[6].mxu0 %v13390_v56 }
 0x325   : > { %8984 = vmatmul.mubr.f32.vlgmr.msra.gmra.mrb[6].mxu1 %v13407_v11  ;;  %v6487_v11 = vld [vmem:[%s12458_s10 + $0x7] ss:$0 sm:$0xff] }
 0x336   : > { %v3738_v43 = vpop.f32.mrb[4].mxu0 }
 0x337   : > { %v3746_v7 = vmul.f32 %v6286_v8, %v3738_v43  ;;  %v8355_v25 = vpop.f32.mrb[5].mxu0 }
 0x338   : > { %v4443_v51 = vpop.f32.mrb[4].mxu1 }
 0x339   : > { %v3747_v39 = vadd.f32 %v3746_v7, %v15004_v31  ;;  %v3748_v1 = vmul.f32 %v3746_v7, %v3746_v7  ;;  %v4451_v57 = vmul.f32 %v6353_v42, %v4443_v51  ;;  %v8565_v58 = vpop.f32.mrb[5].mxu1 }
 0x33b   : > { %v3749_v54 = vadd.f32 %v3748_v1, %v15005_v20  ;;  %v4452_v10 = vadd.f32 %v4451_v57, %v3747_v39  ;;  %v4453_v16 = vmul.f32 %v4451_v57, %v4451_v57 }
 0x33d   : > { %v4454_v56 = vadd.f32 %v4453_v16, %v3749_v54 }
 0x3f6   : > { %v5148_v46 = vpop.f32.mrb[6].mxu0 }
 0x3f7   : > { %v5156_v41 = vmul.f32 %v6420_v38, %v5148_v46  ;;  %v8775_v40 = vpop.f32.mrb[7].mxu0 }
 0x3f8   : > { %v5853_v48 = vpop.f32.mrb[6].mxu1 }
 0x3f9   : > { %v5157_v63 = vadd.f32 %v5156_v41, %v4452_v10  ;;  %v5158_v24 = vmul.f32 %v5156_v41, %v5156_v41  ;;  %v5861_v60 = vmul.f32 %v6487_v11, %v5853_v48  ;;  %v8985_v44 = vpop.f32.mrb[7].mxu1 }
 0x3fb   : > { %v5159_v36 = vadd.f32 %v5158_v24, %v4454_v56  ;;  %v5862_v47 = vadd.f32 %v5861_v60, %v5157_v63  ;;  %v5863_v22 = vmul.f32 %v5861_v60, %v5861_v60 }
 0x3fd   : > { %v5864_v45 = vadd.f32 %v5863_v22, %v5159_v36  ;;  %v5865_v30 = vmul.f32 %v5862_v47, %v5862_v47 }
 0x3ff   : > { %v5866_v32 = vrot.slane %v5865_v30, 4  ;;  %v5873_v37 = vrot.slane %v5864_v45, 4 }
 0x401   : > { %v5867_v49 = vadd.f32 %v5866_v32, %v5865_v30  ;;  %v5874_v33 = vadd.f32 %v5873_v37, %v5864_v45 }
 0x403   : > { %v5868_v28 = vrot.slane %v5867_v49, 2  ;;  %v5875_v29 = vrot.slane %v5874_v33, 2 }
 0x405   : > { %v5869_v27 = vadd.f32 %v5868_v28, %v5867_v49  ;;  %v5876_v18 = vadd.f32 %v5875_v29, %v5874_v33 }
 0x407   : > { %v5870_v14 = vrot.slane %v5869_v27, 1  ;;  %v5877_v5 = vrot.slane %v5876_v18, 1 }
 0x409   : > { %v5871_v17 = vadd.f32 %v5870_v14, %v5869_v27  ;;  %v5878_v19 = vadd.f32 %v5877_v5, %v5876_v18 }
 0x40b   : > { %v5872_v2 = vsub.f32 %v5871_v17, %v5865_v30  ;;  %v5879_v21 = vsub.f32 %v5878_v19, %v5864_v45 }
 0x40d   : > { %v5880_v34 = vsub.f32 %v5872_v2, %v5879_v21 }
 0x40f   : > { %v5881_v13 = vmul.f32 0.5, %v5880_v34 }
 0x411   : > { %v5882_v52 = vadd.f32 %v5881_v13, %v5862_v47 }
 0x413   : > { %v5885_v53 = vadd.f32 %v5884_v6, %v5882_v52 }
 0x415   : > { %5886 = vst [vmem:[%s208_s19] sm:$0x1] %v5885_v53 }
 0x416 PF: > { %s15_s17 = sadd.s32 1, %s10236_s17  }
 0x417   : > { %p12_p4 = scmp.ge.s32.totalorder %s15_s17, 5  }
 0x419   :  { %14 = sbr.rel (!%p12_p4) target bundleno = 2 (0x2), region = 76 }

</bundles_post_ra>
